<compile_context>
chip_gen: v6e
topology: v6e:2x2x1
jax: 0.10.0
libtpu: 0.0.40
codegen_flags: <defaults>
</compile_context>

<pallas_src>
import functools

import jax
import jax.numpy as jnp
from jax.experimental import pallas as pl
from jax.experimental.pallas import tpu as pltpu


def rot_red_kernel(x_ref,
                   w1_ref, b1_ref,
                   w2_ref, b2_ref,
                   w3_ref, b3_ref,
                   w4_ref, b4_ref,
                   o_ref):
    # x_ref: (1, 960, TL) bf16 tile in native NCL layout.
    x = x_ref[0]                                                       # (960, TL) bf16

    # conv1 (+ folded bn1) + relu : 960 -> 512
    h = jnp.dot(w1_ref[...], x, preferred_element_type=jnp.float32) + b1_ref[...]
    h = jnp.maximum(h, 0.0).astype(jnp.bfloat16)                       # (512, TL)

    # conv2 (+ folded bn2) + relu : 512 -> 256
    h = jnp.dot(w2_ref[...], h, preferred_element_type=jnp.float32) + b2_ref[...]
    h = jnp.maximum(h, 0.0).astype(jnp.bfloat16)                       # (256, TL)

    # conv3 (+ folded bn3) + relu : 256 -> 128
    h = jnp.dot(w3_ref[...], h, preferred_element_type=jnp.float32) + b3_ref[...]
    h = jnp.maximum(h, 0.0).astype(jnp.bfloat16)                       # (128, TL)

    # conv4 (no bn / relu) : 128 -> 3
    out = jnp.dot(w4_ref[...], h, preferred_element_type=jnp.float32) + b4_ref[...]
    o_ref[0] = out.astype(o_ref.dtype)                                 # (3, TL)


def _round_up(x, m):
    return ((x + m - 1) // m) * m


@functools.partial(jax.jit, static_argnames=("tile_l",))
def rot_red_pallas(x_ncl, params, *, tile_l=1024):
    """x_ncl: (B, 960, L) float32 or bfloat16.  Returns (B, 3, L) float32."""
    B, C_in, L = x_ncl.shape
    assert C_in == 960

    # bf16 activations into the kernel (halves HBM input traffic; weights
    # are already bf16, accumulation stays f32 inside the kernel).
    if x_ncl.dtype != jnp.bfloat16:
        x_ncl = x_ncl.astype(jnp.bfloat16)

    (w1, b1), (w2, b2), (w3, b3), (w4, b4) = params
    k_out = w4.shape[0]

    # Effective tile: lane-aligned, never larger than the (lane-rounded) L.
    tl = min(_round_up(tile_l, 128), _round_up(L, 128))
    # Keep at least 2 grid points so both v7x TensorCores get work.
    if B * pl.cdiv(L, tl) < 2 and tl > 128:
        tl = max(128, _round_up(pl.cdiv(L, 2), 128))
    n_l = pl.cdiv(L, tl)   # partial final block handled by Pallas masking

    def full(arr):
        # Whole-array block, constant across the grid -> stays resident in VMEM.
        return pl.BlockSpec(arr.shape, lambda b, l, _n=arr.ndim: (0,) * _n)

    out = pl.pallas_call(
        rot_red_kernel,
        out_shape=jax.ShapeDtypeStruct((B, k_out, L), jnp.float32),
        grid_spec=pltpu.PrefetchScalarGridSpec(
            num_scalar_prefetch=0,
            grid=(B, n_l),
            in_specs=[
                pl.BlockSpec((1, C_in, tl), lambda b, l: (b, 0, l)),
                full(w1), full(b1),
                full(w2), full(b2),
                full(w3), full(b3),
                full(w4), full(b4),
            ],
            out_specs=pl.BlockSpec((1, k_out, tl), lambda b, l: (b, 0, l)),
        ),
        compiler_params=pltpu.CompilerParams(
            dimension_semantics=("parallel", "parallel"),
            vmem_limit_bytes=48 * 1024 * 1024),
    )(x_ncl, w1, b1, w2, b2, w3, b3, w4, b4)

    return out


def _init_conv(key, c_in, c_out):
    """PyTorch-like Conv1d(kernel_size=1) init: U(-1/sqrt(fan_in), +1/sqrt(fan_in))."""
    kw, kb = jax.random.split(key)
    bound = 1.0 / jnp.sqrt(float(c_in))
    w = jax.random.uniform(kw, (c_out, c_in), jnp.float32, -bound, bound)
    b = jax.random.uniform(kb, (c_out,), jnp.float32, -bound, bound)
    return w, b


def _init_bn(key, c):
    k1, k2, k3, k4 = jax.random.split(key, 4)
    gamma = 1.0 + 0.1 * jax.random.normal(k1, (c,), jnp.float32)
    beta = 0.1 * jax.random.normal(k2, (c,), jnp.float32)
    running_mean = 0.1 * jax.random.normal(k3, (c,), jnp.float32)
    running_var = jnp.abs(jax.random.normal(k4, (c,), jnp.float32)) + 0.5
    return gamma, beta, running_mean, running_var


def _fold_bn(w, b, bn, eps=1e-5):
    """Fold eval-mode BatchNorm into a pointwise conv.

    Returns (W, bias_col) with W: (c_out, c_in) bf16 (for h = W @ x),
    bias: (c_out, 1) f32 (added after the f32 accumulation)."""
    gamma, beta, mean, var = bn
    scale = gamma / jnp.sqrt(var + eps)                    # (c_out,)
    w_f = (w * scale[:, None]).astype(jnp.bfloat16)        # (c_out, c_in) bf16
    b_f = ((b - mean) * scale + beta)[:, None]             # (c_out, 1) f32
    return w_f, b_f


def build_params(key):
    keys = jax.random.split(key, 7)
    w1, b1 = _init_conv(keys[0], 960, 512)
    w2, b2 = _init_conv(keys[1], 512, 256)
    w3, b3 = _init_conv(keys[2], 256, 128)
    w4, b4 = _init_conv(keys[3], 128, 3)
    bn1 = _init_bn(keys[4], 512)
    bn2 = _init_bn(keys[5], 256)
    bn3 = _init_bn(keys[6], 128)

    p1 = _fold_bn(w1, b1, bn1)
    p2 = _fold_bn(w2, b2, bn2)
    p3 = _fold_bn(w3, b3, bn3)
    p4 = (w4.astype(jnp.bfloat16), b4[:, None])            # conv4: no BN
    return (p1, p2, p3, p4)


def rot_red_reference(x_ncl, params):
    """Pure-JAX reference using the same folded params and the same
    bf16-operand / f32-accumulation precision strategy as the kernel."""
    B, C, L = x_ncl.shape
    h = jnp.transpose(x_ncl, (0, 2, 1)).reshape(B * L, C).astype(jnp.bfloat16)
    (w1, b1), (w2, b2), (w3, b3), (w4, b4) = params

    def layer(h, w, b, relu=True):
        y = jnp.dot(h, w.T, preferred_element_type=jnp.float32) + b[:, 0]
        if relu:
            y = jnp.maximum(y, 0.0).astype(jnp.bfloat16)
        return y

    h = layer(h, w1, b1)
    h = layer(h, w2, b2)
    h = layer(h, w3, b3)
    h = layer(h, w4, b4, relu=False)
    return jnp.transpose(h.reshape(B, L, -1), (0, 2, 1))


if __name__ == "__main__":
    key = jax.random.PRNGKey(0)
    k_x, k_p, k_x2 = jax.random.split(key, 3)
    params = build_params(k_p)

    # Small primary test (channels fixed at 960 by the module).
    B, L = 2, 16
    x = jax.random.normal(k_x, (B, 960, L), jnp.float32)
    out = jax.block_until_ready(rot_red_pallas(x, params))
    ref = rot_red_reference(x, params)
    assert out.shape == (B, 3, L), out.shape
    assert jnp.allclose(out, ref, atol=5e-2, rtol=5e-2), "mismatch vs reference"

    # Secondary test: B=1 and L not a multiple of 128 exercises the
    # no-pad partial-block path and the >=2-grid-point tiling logic.
    B2, L2 = 1, 200
    x2 = jax.random.normal(k_x2, (B2, 960, L2), jnp.float32)
    out2 = jax.block_until_ready(rot_red_pallas(x2, params))
    ref2 = rot_red_reference(x2, params)
    assert out2.shape == (B2, 3, L2), out2.shape
    assert jnp.allclose(out2, ref2, atol=5e-2, rtol=5e-2), "mismatch vs reference (partial block)"

    print("KERNEL_OK")
</pallas_src>

<mosaic_0001>
module attributes {stable_mosaic.version = 11 : i64} {
  func.func @rot_red_kernel(%arg0: i32, %arg1: i32, %arg2: memref<1x960x128xbf16, #tpu.memory_space<vmem>>, %arg3: memref<512x960xbf16, #tpu.memory_space<vmem>>, %arg4: memref<512x1xf32, #tpu.memory_space<vmem>>, %arg5: memref<256x512xbf16, #tpu.memory_space<vmem>>, %arg6: memref<256x1xf32, #tpu.memory_space<vmem>>, %arg7: memref<128x256xbf16, #tpu.memory_space<vmem>>, %arg8: memref<128x1xf32, #tpu.memory_space<vmem>>, %arg9: memref<3x128xbf16, #tpu.memory_space<vmem>>, %arg10: memref<3x1xf32, #tpu.memory_space<vmem>>, %arg11: memref<1x3x128xf32, #tpu.memory_space<vmem>>) attributes {dimension_semantics = [#tpu.dimension_semantics<parallel>, #tpu.dimension_semantics<parallel>], iteration_bounds = array<i64: 2, 1>, scalar_prefetch = 0 : i64, scratch_operands = 0 : i64, tpu.core_type = #tpu.core_type<tc>, window_params = [{transform_indices = @transform_0, window_bounds = array<i64: 1, 960, 128>}, {pipeline_mode = #tpu.pipeline_mode<synchronous>, transform_indices = @transform_1, window_bounds = array<i64: 512, 960>}, {pipeline_mode = #tpu.pipeline_mode<synchronous>, transform_indices = @transform_2, window_bounds = array<i64: 512, 1>}, {pipeline_mode = #tpu.pipeline_mode<synchronous>, transform_indices = @transform_3, window_bounds = array<i64: 256, 512>}, {pipeline_mode = #tpu.pipeline_mode<synchronous>, transform_indices = @transform_4, window_bounds = array<i64: 256, 1>}, {pipeline_mode = #tpu.pipeline_mode<synchronous>, transform_indices = @transform_5, window_bounds = array<i64: 128, 256>}, {pipeline_mode = #tpu.pipeline_mode<synchronous>, transform_indices = @transform_6, window_bounds = array<i64: 128, 1>}, {pipeline_mode = #tpu.pipeline_mode<synchronous>, transform_indices = @transform_7, window_bounds = array<i64: 3, 128>}, {pipeline_mode = #tpu.pipeline_mode<synchronous>, transform_indices = @transform_8, window_bounds = array<i64: 3, 1>}, {transform_indices = @transform_9, window_bounds = array<i64: 1, 3, 128>}]} {
    %c0 = arith.constant 0 : index
    %c0_0 = arith.constant 0 : index
    %c0_1 = arith.constant 0 : index
    %0 = vector.load %arg2[%c0, %c0_0, %c0_1] : memref<1x960x128xbf16, #tpu.memory_space<vmem>>, vector<1x960x128xbf16>
    %1 = vector.shape_cast %0 : vector<1x960x128xbf16> to vector<960x128xbf16>
    %c0_2 = arith.constant 0 : index
    %c0_3 = arith.constant 0 : index
    %2 = vector.load %arg3[%c0_2, %c0_3] : memref<512x960xbf16, #tpu.memory_space<vmem>>, vector<512x960xbf16>
    %cst = arith.constant dense<0.000000e+00> : vector<512x128xf32>
    %3 = tpu.matmul %2, %1, %cst {dimension_numbers = #tpu.dot_dimension_numbers<[1], [0], [0], [1], [0, 0, 1, 1], [], []>} : vector<512x960xbf16>, vector<960x128xbf16>, vector<512x128xf32> -> vector<512x128xf32>
    %c0_4 = arith.constant 0 : index
    %c0_5 = arith.constant 0 : index
    %4 = vector.load %arg4[%c0_4, %c0_5] : memref<512x1xf32, #tpu.memory_space<vmem>>, vector<512x1xf32>
    %5 = vector.broadcast %4 : vector<512x1xf32> to vector<512x128xf32>
    %6 = arith.addf %3, %5 : vector<512x128xf32>
    %cst_6 = arith.constant 0.000000e+00 : f32
    %7 = vector.broadcast %cst_6 : f32 to vector<512x128xf32>
    %8 = arith.maximumf %6, %7 : vector<512x128xf32>
    %9 = arith.truncf %8 : vector<512x128xf32> to vector<512x128xbf16>
    %c0_7 = arith.constant 0 : index
    %c0_8 = arith.constant 0 : index
    %10 = vector.load %arg5[%c0_7, %c0_8] : memref<256x512xbf16, #tpu.memory_space<vmem>>, vector<256x512xbf16>
    %cst_9 = arith.constant dense<0.000000e+00> : vector<256x128xf32>
    %11 = tpu.matmul %10, %9, %cst_9 {dimension_numbers = #tpu.dot_dimension_numbers<[1], [0], [0], [1], [0, 0, 1, 1], [], []>} : vector<256x512xbf16>, vector<512x128xbf16>, vector<256x128xf32> -> vector<256x128xf32>
    %c0_10 = arith.constant 0 : index
    %c0_11 = arith.constant 0 : index
    %12 = vector.load %arg6[%c0_10, %c0_11] : memref<256x1xf32, #tpu.memory_space<vmem>>, vector<256x1xf32>
    %13 = vector.broadcast %12 : vector<256x1xf32> to vector<256x128xf32>
    %14 = arith.addf %11, %13 : vector<256x128xf32>
    %cst_12 = arith.constant 0.000000e+00 : f32
    %15 = vector.broadcast %cst_12 : f32 to vector<256x128xf32>
    %16 = arith.maximumf %14, %15 : vector<256x128xf32>
    %17 = arith.truncf %16 : vector<256x128xf32> to vector<256x128xbf16>
    %c0_13 = arith.constant 0 : index
    %c0_14 = arith.constant 0 : index
    %18 = vector.load %arg7[%c0_13, %c0_14] : memref<128x256xbf16, #tpu.memory_space<vmem>>, vector<128x256xbf16>
    %cst_15 = arith.constant dense<0.000000e+00> : vector<128x128xf32>
    %19 = tpu.matmul %18, %17, %cst_15 {dimension_numbers = #tpu.dot_dimension_numbers<[1], [0], [0], [1], [0, 0, 1, 1], [], []>} : vector<128x256xbf16>, vector<256x128xbf16>, vector<128x128xf32> -> vector<128x128xf32>
    %c0_16 = arith.constant 0 : index
    %c0_17 = arith.constant 0 : index
    %20 = vector.load %arg8[%c0_16, %c0_17] : memref<128x1xf32, #tpu.memory_space<vmem>>, vector<128x1xf32>
    %21 = vector.broadcast %20 : vector<128x1xf32> to vector<128x128xf32>
    %22 = arith.addf %19, %21 : vector<128x128xf32>
    %cst_18 = arith.constant 0.000000e+00 : f32
    %23 = vector.broadcast %cst_18 : f32 to vector<128x128xf32>
    %24 = arith.maximumf %22, %23 : vector<128x128xf32>
    %25 = arith.truncf %24 : vector<128x128xf32> to vector<128x128xbf16>
    %c0_19 = arith.constant 0 : index
    %c0_20 = arith.constant 0 : index
    %26 = vector.load %arg9[%c0_19, %c0_20] : memref<3x128xbf16, #tpu.memory_space<vmem>>, vector<3x128xbf16>
    %cst_21 = arith.constant dense<0.000000e+00> : vector<3x128xf32>
    %27 = tpu.matmul %26, %25, %cst_21 {dimension_numbers = #tpu.dot_dimension_numbers<[1], [0], [0], [1], [0, 0, 1, 1], [], []>} : vector<3x128xbf16>, vector<128x128xbf16>, vector<3x128xf32> -> vector<3x128xf32>
    %c0_22 = arith.constant 0 : index
    %c0_23 = arith.constant 0 : index
    %28 = vector.load %arg10[%c0_22, %c0_23] : memref<3x1xf32, #tpu.memory_space<vmem>>, vector<3x1xf32>
    %29 = vector.broadcast %28 : vector<3x1xf32> to vector<3x128xf32>
    %30 = arith.addf %27, %29 : vector<3x128xf32>
    %c0_24 = arith.constant 0 : index
    %c0_25 = arith.constant 0 : index
    %c0_26 = arith.constant 0 : index
    %31 = vector.load %arg11[%c0_24, %c0_25, %c0_26] : memref<1x3x128xf32, #tpu.memory_space<vmem>>, vector<1x3x128xf32>
    %32 = vector.shape_cast %31 : vector<1x3x128xf32> to vector<3x128xf32>
    %33 = vector.shape_cast %30 : vector<3x128xf32> to vector<1x3x128xf32>
    tpu.vector_store %arg11[%c0_24, %c0_25, %c0_26], %33 {strides = array<i32>} : memref<1x3x128xf32, #tpu.memory_space<vmem>>, vector<1x3x128xf32>,
    return
  }
  func.func @transform_0(%arg0: i32, %arg1: i32) -> (i32, i32, i32) {
    %c0_i32 = arith.constant 0 : i32
    %c0_i32_0 = arith.constant 0 : i32
    return %arg0, %c0_i32, %arg1 : i32, i32, i32
  }
  func.func @transform_1(%arg0: i32, %arg1: i32) -> (i32, i32) {
    %c0_i32 = arith.constant 0 : i32
    %c0_i32_0 = arith.constant 0 : i32
    %c0_i32_1 = arith.constant 0 : i32
    return %c0_i32, %c0_i32_0 : i32, i32
  }
  func.func @transform_2(%arg0: i32, %arg1: i32) -> (i32, i32) {
    %c0_i32 = arith.constant 0 : i32
    %c0_i32_0 = arith.constant 0 : i32
    %c0_i32_1 = arith.constant 0 : i32
    return %c0_i32, %c0_i32_0 : i32, i32
  }
  func.func @transform_3(%arg0: i32, %arg1: i32) -> (i32, i32) {
    %c0_i32 = arith.constant 0 : i32
    %c0_i32_0 = arith.constant 0 : i32
    %c0_i32_1 = arith.constant 0 : i32
    return %c0_i32, %c0_i32_0 : i32, i32
  }
  func.func @transform_4(%arg0: i32, %arg1: i32) -> (i32, i32) {
    %c0_i32 = arith.constant 0 : i32
    %c0_i32_0 = arith.constant 0 : i32
    %c0_i32_1 = arith.constant 0 : i32
    return %c0_i32, %c0_i32_0 : i32, i32
  }
  func.func @transform_5(%arg0: i32, %arg1: i32) -> (i32, i32) {
    %c0_i32 = arith.constant 0 : i32
    %c0_i32_0 = arith.constant 0 : i32
    %c0_i32_1 = arith.constant 0 : i32
    return %c0_i32, %c0_i32_0 : i32, i32
  }
  func.func @transform_6(%arg0: i32, %arg1: i32) -> (i32, i32) {
    %c0_i32 = arith.constant 0 : i32
    %c0_i32_0 = arith.constant 0 : i32
    %c0_i32_1 = arith.constant 0 : i32
    return %c0_i32, %c0_i32_0 : i32, i32
  }
  func.func @transform_7(%arg0: i32, %arg1: i32) -> (i32, i32) {
    %c0_i32 = arith.constant 0 : i32
    %c0_i32_0 = arith.constant 0 : i32
    %c0_i32_1 = arith.constant 0 : i32
    return %c0_i32, %c0_i32_0 : i32, i32
  }
  func.func @transform_8(%arg0: i32, %arg1: i32) -> (i32, i32) {
    %c0_i32 = arith.constant 0 : i32
    %c0_i32_0 = arith.constant 0 : i32
    %c0_i32_1 = arith.constant 0 : i32
    return %c0_i32, %c0_i32_0 : i32, i32
  }
  func.func @transform_9(%arg0: i32, %arg1: i32) -> (i32, i32, i32) {
    %c0_i32 = arith.constant 0 : i32
    %c0_i32_0 = arith.constant 0 : i32
    return %arg0, %c0_i32, %arg1 : i32, i32, i32
  }
}

</mosaic_0001>

<bundles_post_ra>
// kernel: rot_red_pallas.1
= control target key start
LH: loop header
LB: loop body
LE: loop exit
PB: predicated region body
PF: predicated region fallthrough
CT: control target
= control target key end

     0   :  { %s6505_s30 = smov 0   ;;  %s6507_s10 = smov 0   ;;  %s8781_s0 = inlined_call_operand.vmem [shape: bf16[2,960,16], index: 0, kind: input, shape index: {}]   ;;  %s8782_s1 = inlined_call_operand.vmem [shape: bf16[512,960], index: 1, kind: input, shape index: {}]   ;;  %s8783_s2 = inlined_call_operand.vmem [shape: f32[512,1], index: 2, kind: input, shape index: {}]   ;;  %s8784_s3 = inlined_call_operand.vmem [shape: bf16[256,512], index: 3, kind: input, shape index: {}]   ;;  %s8785_s4 = inlined_call_operand.vmem [shape: f32[256,1], index: 4, kind: input, shape index: {}]   ;;  %s8786_s5 = inlined_call_operand.vmem [shape: bf16[128,256], index: 5, kind: input, shape index: {}]   ;;  %s8787_s6 = inlined_call_operand.vmem [shape: f32[128,1], index: 6, kind: input, shape index: {}]   ;;  %s8788_s7 = inlined_call_operand.vmem [shape: bf16[3,128], index: 7, kind: input, shape index: {}]   ;;  %s8789_s8 = inlined_call_operand.vmem [shape: f32[3,1], index: 8, kind: input, shape index: {}]   ;;  %s8790_s9 = inlined_call_operand.vmem [shape: f32[2,3,16], index: 9, kind: output, shape index: {}]  }
   0x1   :  { %s6509_s11 = smov 0  }
   0x2 LB: > { %s31_s12 = sadd.s32 1, %s6446_s10  ;;  %p5468_p0 = scmp.ge.s32.totalorder %s6450_s11, 1  ;;  %s6450_s11 = sphi %s6509_s11, %s19_s11   ;;  %s6446_s10 = sphi %s6507_s10, %s8906_s10   ;;  %s6442_s30 = sphi %s6505_s30, %s8905_s30  }
   0x3   : > { %p33_p1 = scmp.ge.s32.totalorder %s31_s12, 2  ;;  %p306_p2 = scmp.lt.s32.totalorder %s6450_s11, 3 }
   0x5   : > { %s8908_s12 = smov (%p33_p1, %s31_s12), 0  ;;  %p307_p3 = pnand %p5468_p0, %p306_p2 }
   0x7   : > { %310 = sbr.rel (%p307_p3) target bundleno = 1676 (0x68c), region = 56 }
   0xc   : > { %p347_p4 = scmp.lt.s32.totalorder %s6442_s30, 1  ;;  %v769_v0 = vld [vmem:[%s8783_s2 + $0xf0] sm:$0xff]  ;;  %v6452_v2 = vmov 0   ;;  %v770_v3 = vld [vmem:[%s8783_s2 + $0xf8] sm:$0xff]  ;;  %v767_v15 = vld [vmem:[%s8783_s2 + $0xe0] sm:$0xff]  ;;  %vm2731_vm0 = vcmask 523264  }
   0xd   : > { %v753_v1 = vld [vmem:[%s8783_s2 + $0x70] sm:$0xff]  ;;  %2828 = vmatprep.subr.bf16.mxu0 %v6452_v2  ;;  %3117 = vmatprep.subr.bf16.mxu1 %v6452_v2  ;;  %v754_v4 = vld [vmem:[%s8783_s2 + $0x78] sm:$0xff]  ;;  %v768_v16 = vld [vmem:[%s8783_s2 + $0xe8] sm:$0xff]  ;;  %vm6454_vm1 = vmmov 0  }
   0xe   : > { %s8910_s30 = smov (!%p347_p4, %s6442_s30), 1  ;;  %6246 = vset.pattern.permute.xlu0 %v6452_v2  ;;  %6247 = vset.pattern.permute.xlu1 %v6452_v2  ;;  %v801_v5 = vld [vmem:[%s8783_s2 + $0x1f0] sm:$0xff]  ;;  %v802_v7 = vld [vmem:[%s8783_s2 + $0x1f8] sm:$0xff]  ;;  %v751_v19 = vld [vmem:[%s8783_s2 + $0x60] sm:$0xff] }
   0xf   : > { %955 = vperm.xlu0 %6246, %v769_v0   ;;  %875 = vperm.xlu1 %6247, %v753_v1   ;;  %s6218_s17 = smul.u32 480, %s8910_s30  ;;  %v785_v11 = vld [vmem:[%s8783_s2 + $0x170] sm:$0xff]  ;;  %v786_v12 = vld [vmem:[%s8783_s2 + $0x178] sm:$0xff]  ;;  %v752_v20 = vld [vmem:[%s8783_s2 + $0x68] sm:$0xff]  ;;  %s5470_s15 = sshll.u32 %s8910_s30, 2 }
  0x10   : > { %v799_v23 = vld [vmem:[%s8783_s2 + $0x1e0] sm:$0xff]  ;;  %v800_v24 = vld [vmem:[%s8783_s2 + $0x1e8] sm:$0xff]  ;;  %v765_v31 = vld [vmem:[%s8783_s2 + $0xd0] sm:$0xff]  ;;  %s361_s18 = scalar_lea.vmem %s8790_s9, %s5470_s15 }
  0x11   : > { %s6545_s24 = scalar_lea.vmem %s8781_s0, %s6218_s17  ;;  %v783_v27 = vld [vmem:[%s8783_s2 + $0x160] sm:$0xff]  ;;  %v784_v28 = vld [vmem:[%s8783_s2 + $0x168] sm:$0xff]  ;;  %v766_v32 = vld [vmem:[%s8783_s2 + $0xd8] sm:$0xff] }
  0x12   : > { %v6248_v6 = vld [vmem:[%s6545_s24 + $0x38] sm:$0xff]   ;;  %v6250_v9 = vld [vmem:[%s6545_s24 + $0x30] sm:$0xff]   ;;  %v6252_v13 = vld [vmem:[%s6545_s24 + $0x28] sm:$0xff]  }
  0x13   : > { %960 = vperm.xlu0 %6246, %v770_v3   ;;  %880 = vperm.xlu1 %6247, %v754_v4   ;;  %v6249_v8 = vld [vmem:[%s6545_s24 + $0xb8] sm:$0xff]   ;;  %v6251_v10 = vld [vmem:[%s6545_s24 + $0xb0] sm:$0xff]   ;;  %v6253_v14 = vld [vmem:[%s6545_s24 + $0xa8] sm:$0xff]  }
  0x14   : > { %2829 = vmatpush1.bf16.msra.mxu0 %v6248_v6  ;;  %3118 = vmatpush1.bf16.msra.mxu1 %v6249_v8  ;;  %v6254_v17 = vld [vmem:[%s6545_s24 + $0x20] sm:$0xff]   ;;  %v6256_v21 = vld [vmem:[%s6545_s24 + $0x18] sm:$0xff]   ;;  %v6258_v25 = vld [vmem:[%s6545_s24 + $0x10] sm:$0xff]  }
  0x15   : > { %2830 = vmatprep.subr.bf16.mxu0 %v6452_v2  ;;  %3119 = vmatprep.subr.bf16.mxu1 %v6452_v2  ;;  %v6255_v18 = vld [vmem:[%s6545_s24 + $0xa0] sm:$0xff]   ;;  %v6257_v22 = vld [vmem:[%s6545_s24 + $0x98] sm:$0xff]   ;;  %v6259_v26 = vld [vmem:[%s6545_s24 + $0x90] sm:$0xff]  }
  0x16   : > { %v6260_v29 = vld [vmem:[%s6545_s24 + $0x8] sm:$0xff]   ;;  %v6262_v33 = vld [vmem:[%s6545_s24] sm:$0xff]   ;;  %v749_v35 = vld [vmem:[%s8783_s2 + $0x50] sm:$0xff] }
  0x17   : > { %1115 = vperm.xlu0 %6246, %v801_v5   ;;  %1120 = vperm.xlu1 %6247, %v802_v7   ;;  %v6261_v30 = vld [vmem:[%s6545_s24 + $0x88] sm:$0xff]   ;;  %v6263_v34 = vld [vmem:[%s6545_s24 + $0x80] sm:$0xff]   ;;  %v6264_v36 = vld [vmem:[%s6545_s24 + $0x78] sm:$0xff]  }
  0x18   : > { %2831 = vmatpush1.bf16.msra.mxu0 %v6250_v9  ;;  %3120 = vmatpush1.bf16.msra.mxu1 %v6251_v10  ;;  %v750_v37 = vld [vmem:[%s8783_s2 + $0x58] sm:$0xff]  ;;  %v797_v39 = vld [vmem:[%s8783_s2 + $0x1d0] sm:$0xff]  ;;  %v6635_v40 = vld [vmem:[%s8782_s1] sm:$0xff] }
  0x19   : > { %2832 = vmatprep.subr.bf16.mxu0 %v6452_v2  ;;  %3121 = vmatprep.subr.bf16.mxu1 %v6452_v2  ;;  %v6265_v38 = vld [vmem:[%s6545_s24 + $0xf8] sm:$0xff]   ;;  %v6640_v41 = vld [vmem:[%s8782_s1 + $0x20] sm:$0xff]  ;;  %v6645_v42 = vld [vmem:[%s8782_s1 + $0x8] sm:$0xff] }
  0x1a   : > { %v6650_v43 = vld [vmem:[%s8782_s1 + $0x28] sm:$0xff]  ;;  %v6266_v44 = vld [vmem:[%s6545_s24 + $0x70] sm:$0xff]   ;;  %v798_v45 = vld [vmem:[%s8783_s2 + $0x1d8] sm:$0xff]  ;;  %v5472_v46 = vcombine.high %v6635_v40, %v6640_v41 }
  0x1b   : > { %1035 = vperm.xlu0 %6246, %v785_v11   ;;  %1040 = vperm.xlu1 %6247, %v786_v12   ;;  %v5474_v47 = vcombine.high %v6645_v42, %v6650_v43  ;;  %v6267_v48 = vld [vmem:[%s6545_s24 + $0xf0] sm:$0xff]   ;;  %v6268_v50 = vld [vmem:[%s6545_s24 + $0x68] sm:$0xff]   ;;  %v782_v51 = vld [vmem:[%s8783_s2 + $0x158] sm:$0xff] }
  0x1c   : > { %2833 = vmatpush1.bf16.msra.mxu0 %v6252_v13  ;;  %3122 = vmatpush1.bf16.msra.mxu1 %v6253_v14  ;;  %v781_v49 = vld [vmem:[%s8783_s2 + $0x150] sm:$0xff]  ;;  %v6269_v52 = vld [vmem:[%s6545_s24 + $0xe8] sm:$0xff]   ;;  %v763_v53 = vld [vmem:[%s8783_s2 + $0xc0] sm:$0xff]  ;;  %v5471_v14 = vcombine.low %v6635_v40, %v6640_v41 }
  0x1d   : > { %2834 = vmatprep.subr.bf16.mxu0 %v6452_v2  ;;  %3123 = vmatprep.subr.bf16.mxu1 %v6452_v2  ;;  %v6270_v54 = vld [vmem:[%s6545_s24 + $0x60] sm:$0xff]   ;;  %v764_v55 = vld [vmem:[%s8783_s2 + $0xc8] sm:$0xff]  ;;  %v6272_v58 = vld [vmem:[%s6545_s24 + $0x58] sm:$0xff]  }
  0x1e   : > { %2860 = vmatprep.mubr.bf16.mxu0 %v5472_v46  ;;  %3149 = vmatprep.mubr.bf16.mxu1 %v5474_v47  ;;  %v6271_v56 = vld [vmem:[%s6545_s24 + $0xe0] sm:$0xff]   ;;  %v748_v59 = vld [vmem:[%s8783_s2 + $0x48] sm:$0xff]  ;;  %v6273_v60 = vld [vmem:[%s6545_s24 + $0xd8] sm:$0xff]  }
  0x1f   : > { %945 = vperm.xlu0 %6246, %v767_v15   ;;  %950 = vperm.xlu1 %6247, %v768_v16   ;;  %v747_v57 = vld [vmem:[%s8783_s2 + $0x40] sm:$0xff]  ;;  %v6274_v62 = vld [vmem:[%s6545_s24 + $0x50] sm:$0xff]   ;;  %v796_v63 = vld [vmem:[%s8783_s2 + $0x1c8] sm:$0xff]  ;;  %v5473_v16 = vcombine.low %v6645_v42, %v6650_v43 }
  0x20   : > { %2835 = vmatpush1.bf16.msra.mxu0 %v6254_v17  ;;  %3124 = vmatpush1.bf16.msra.mxu1 %v6255_v18  ;;  %v795_v61 = vld [vmem:[%s8783_s2 + $0x1c0] sm:$0xff]  ;;  %v6275_v0 = vld [vmem:[%s6545_s24 + $0xd0] sm:$0xff]   ;;  %v6276_v3 = vld [vmem:[%s6545_s24 + $0x48] sm:$0xff]  }
  0x21   : > { %2836 = vmatprep.subr.bf16.mxu0 %v6452_v2  ;;  %3125 = vmatprep.subr.bf16.mxu1 %v6452_v2  ;;  %v779_v1 = vld [vmem:[%s8783_s2 + $0x140] sm:$0xff]  ;;  %v780_v4 = vld [vmem:[%s8783_s2 + $0x148] sm:$0xff]  ;;  %v761_v6 = vld [vmem:[%s8783_s2 + $0xb0] sm:$0xff] }
  0x22   : > { %v6277_v5 = vld [vmem:[%s6545_s24 + $0xc8] sm:$0xff]   ;;  %v6278_v7 = vld [vmem:[%s6545_s24 + $0x40] sm:$0xff]   ;;  %v762_v8 = vld [vmem:[%s8783_s2 + $0xb8] sm:$0xff] }
  0x23   : > { %865 = vperm.xlu0 %6246, %v751_v19   ;;  %870 = vperm.xlu1 %6247, %v752_v20   ;;  %v6279_v9 = vld [vmem:[%s6545_s24 + $0xc0] sm:$0xff]   ;;  %v492_v12 = vld [vmem:[%s8782_s1 + $0x48] sm:$0xff]  ;;  %v745_v15 = vld [vmem:[%s8783_s2 + $0x30] sm:$0xff] }
  0x24   : > { %2837 = vmatpush1.bf16.msra.mxu0 %v6256_v21  ;;  %3126 = vmatpush1.bf16.msra.mxu1 %v6257_v22  ;;  %v491_v10 = vld [vmem:[%s8782_s1 + $0x40] sm:$0xff]  ;;  %v496_v13 = vld [vmem:[%s8782_s1 + $0x68] sm:$0xff]  ;;  %v746_v18 = vld [vmem:[%s8783_s2 + $0x38] sm:$0xff] }
  0x25   : > { %2838 = vmatprep.subr.bf16.mxu0 %v6452_v2  ;;  %3127 = vmatprep.subr.bf16.mxu1 %v6452_v2  ;;  %v495_v11 = vld [vmem:[%s8782_s1 + $0x60] sm:$0xff]  ;;  %v5482_v19 = vcombine.high %v492_v12, %v496_v13  ;;  %v793_v20 = vld [vmem:[%s8783_s2 + $0x1b0] sm:$0xff]  ;;  %v794_v21 = vld [vmem:[%s8783_s2 + $0x1b8] sm:$0xff] }
  0x26   : > { %v5480_v17 = vcombine.high %v491_v10, %v495_v11  ;;  %v499_v22 = vld [vmem:[%s8782_s1 + $0x80] sm:$0xff]  ;;  %v516_v47 = vld [vmem:[%s8782_s1 + $0x108] sm:$0xff] }
  0x27   : > { %1105 = vperm.xlu0 %6246, %v799_v23   ;;  %1110 = vperm.xlu1 %6247, %v800_v24   ;;  %v503_v23 = vld [vmem:[%s8782_s1 + $0xa0] sm:$0xff]  ;;  %v500_v24 = vld [vmem:[%s8782_s1 + $0x88] sm:$0xff] }
  0x28   : > { %2839 = vmatpush1.bf16.msra.mxu0 %v6258_v25  ;;  %3128 = vmatpush1.bf16.msra.mxu1 %v6259_v26  ;;  %v504_v25 = vld [vmem:[%s8782_s1 + $0xa8] sm:$0xff]  ;;  %v777_v26 = vld [vmem:[%s8783_s2 + $0x130] sm:$0xff]  ;;  %v5487_v40 = vcombine.low %v499_v22, %v503_v23  ;;  %v519_v46 = vld [vmem:[%s8782_s1 + $0x120] sm:$0xff] }
  0x29   : > { %2840 = vmatprep.subr.bf16.mxu0 %v6452_v2  ;;  %3129 = vmatprep.subr.bf16.mxu1 %v6452_v2  ;;  %v5489_v41 = vcombine.low %v500_v24, %v504_v25 }
  0x2b   : > { %1025 = vperm.xlu0 %6246, %v783_v27   ;;  %1030 = vperm.xlu1 %6247, %v784_v28   ;;  %v778_v27 = vld [vmem:[%s8783_s2 + $0x138] sm:$0xff]  ;;  %v5479_v28 = vcombine.low %v491_v10, %v495_v11  ;;  %v773_v11 = vld [vmem:[%s8783_s2 + $0x110] sm:$0xff] }
  0x2c   : > { %2841 = vmatpush1.bf16.msra.mxu0 %v6260_v29  ;;  %3130 = vmatpush1.bf16.msra.mxu1 %v6261_v30  ;;  %v5481_v29 = vcombine.low %v492_v12, %v496_v13  ;;  %v5488_v30 = vcombine.high %v499_v22, %v503_v23  ;;  %v790_v10 = vld [vmem:[%s8783_s2 + $0x198] sm:$0xff]  ;;  %v756_v22 = vld [vmem:[%s8783_s2 + $0x88] sm:$0xff]  ;;  %v739_v23 = vld [vmem:[%s8783_s2] sm:$0xff] }
  0x2d   : > { %2842 = vmatprep.subr.bf16.mxu0 %v6452_v2  ;;  %3131 = vmatprep.subr.bf16.mxu1 %v6452_v2  ;;  %v774_v12 = vld [vmem:[%s8783_s2 + $0x118] sm:$0xff] }
  0x2f   : > { %935 = vperm.xlu0 %6246, %v765_v31   ;;  %940 = vperm.xlu1 %6247, %v766_v32   ;;  %v5490_v31 = vcombine.high %v500_v24, %v504_v25  ;;  %v759_v32 = vld [vmem:[%s8783_s2 + $0xa0] sm:$0xff]  ;;  %v740_v24 = vld [vmem:[%s8783_s2 + $0x8] sm:$0xff] }
  0x30   : > { %2843 = vmatpush1.bf16.msra.mxu0 %v6262_v33  ;;  %3132 = vmatpush1.bf16.msra.mxu1 %v6263_v34  ;;  %v507_v33 = vld [vmem:[%s8782_s1 + $0xc0] sm:$0xff] }
  0x31   : > { %2844 = vmatprep.subr.bf16.mxu0 %v6452_v2  ;;  %3133 = vmatprep.subr.bf16.mxu1 %v6452_v2  ;;  %v511_v34 = vld [vmem:[%s8782_s1 + $0xe0] sm:$0xff] }
  0x32   : > { %v5496_v42 = vcombine.high %v507_v33, %v511_v34 }
  0x33   : > { %855 = vperm.xlu0 %6246, %v749_v35   ;;  %860 = vperm.xlu1 %6247, %v750_v37   ;;  %v508_v35 = vld [vmem:[%s8782_s1 + $0xc8] sm:$0xff] }
  0x34   : > { %2845 = vmatpush2.bf16.msra.mxu0 %v6264_v36  ;;  %3134 = vmatpush2.bf16.msra.mxu1 %v6265_v38  ;;  %v512_v36 = vld [vmem:[%s8782_s1 + $0xe8] sm:$0xff]  ;;  %v743_v38 = vld [vmem:[%s8783_s2 + $0x20] sm:$0xff] }
  0x35   : > { %2846 = vmatprep.subr.bf16.mxu0 %v6452_v2  ;;  %3135 = vmatprep.subr.bf16.mxu1 %v6452_v2  ;;  %v760_v37 = vld [vmem:[%s8783_s2 + $0xa8] sm:$0xff]  ;;  %v5498_v43 = vcombine.high %v508_v35, %v512_v36 }
  0x37   : > { %1095 = vperm.xlu0 %6246, %v797_v39   ;;  %1100 = vperm.xlu1 %6247, %v798_v45   ;;  %v744_v39 = vld [vmem:[%s8783_s2 + $0x28] sm:$0xff]  ;;  %v515_v45 = vld [vmem:[%s8782_s1 + $0x100] sm:$0xff] }
  0x38   : > { %2847 = vmatpush2.bf16.msra.mxu0 %v6266_v44  ;;  %3136 = vmatpush2.bf16.msra.mxu1 %v6267_v48  ;;  %v791_v44 = vld [vmem:[%s8783_s2 + $0x1a0] sm:$0xff]  ;;  %v520_v48 = vld [vmem:[%s8782_s1 + $0x128] sm:$0xff] }
  0x39   : > { %2848 = vmatprep.subr.bf16.mxu0 %v6452_v2  ;;  %3137 = vmatprep.subr.bf16.mxu1 %v6452_v2 }
  0x3b   : > { %1015 = vperm.xlu0 %6246, %v781_v49   ;;  %1020 = vperm.xlu1 %6247, %v782_v51   ;;  %v792_v49 = vld [vmem:[%s8783_s2 + $0x1a8] sm:$0xff] }
  0x3c   : > { %2849 = vmatpush2.bf16.msra.mxu0 %v6268_v50  ;;  %3138 = vmatpush2.bf16.msra.mxu1 %v6269_v52  ;;  %v775_v50 = vld [vmem:[%s8783_s2 + $0x120] sm:$0xff]  ;;  %v776_v51 = vld [vmem:[%s8783_s2 + $0x128] sm:$0xff]  ;;  %v5495_v52 = vcombine.low %v507_v33, %v511_v34 }
  0x3d   : > { %2850 = vmatprep.subr.bf16.mxu0 %v6452_v2  ;;  %3139 = vmatprep.subr.bf16.mxu1 %v6452_v2 }
  0x3f   : > { %925 = vperm.xlu0 %6246, %v763_v53   ;;  %930 = vperm.xlu1 %6247, %v764_v55   ;;  %v5497_v53 = vcombine.low %v508_v35, %v512_v36  ;;  %v5506_v55 = vcombine.high %v516_v47, %v520_v48 }
  0x40   : > { %2851 = vmatpush2.bf16.msra.mxu0 %v6270_v54  ;;  %3140 = vmatpush2.bf16.msra.mxu1 %v6271_v56  ;;  %v5504_v54 = vcombine.high %v515_v45, %v519_v46  ;;  %v757_v56 = vld [vmem:[%s8783_s2 + $0x90] sm:$0xff] }
  0x41   : > { %2852 = vmatprep.subr.bf16.mxu0 %v6452_v2  ;;  %3141 = vmatprep.subr.bf16.mxu1 %v6452_v2 }
  0x43   : > { %845 = vperm.xlu0 %6246, %v747_v57   ;;  %850 = vperm.xlu1 %6247, %v748_v59   ;;  %v523_v57 = vld [vmem:[%s8782_s1 + $0x140] sm:$0xff]  ;;  %v524_v59 = vld [vmem:[%s8782_s1 + $0x148] sm:$0xff] }
  0x44   : > { %2853 = vmatpush2.bf16.msra.mxu0 %v6272_v58  ;;  %3142 = vmatpush2.bf16.msra.mxu1 %v6273_v60  ;;  %v527_v58 = vld [vmem:[%s8782_s1 + $0x160] sm:$0xff]  ;;  %v528_v60 = vld [vmem:[%s8782_s1 + $0x168] sm:$0xff] }
  0x45   : > { %2854 = vmatprep.subr.bf16.mxu0 %v6452_v2  ;;  %3143 = vmatprep.subr.bf16.mxu1 %v6452_v2  ;;  %v5511_v13 = vcombine.low %v523_v57, %v527_v58 }
  0x47   : > { %1085 = vperm.xlu0 %6246, %v795_v61   ;;  %1090 = vperm.xlu1 %6247, %v796_v63   ;;  %v758_v61 = vld [vmem:[%s8783_s2 + $0x98] sm:$0xff] }
  0x48   : > { %2855 = vmatpush2.bf16.msra.mxu0 %v6274_v62  ;;  %3144 = vmatpush2.bf16.msra.mxu1 %v6275_v0  ;;  %v741_v62 = vld [vmem:[%s8783_s2 + $0x10] sm:$0xff]  ;;  %v742_v63 = vld [vmem:[%s8783_s2 + $0x18] sm:$0xff]  ;;  %v5503_v0 = vcombine.low %v515_v45, %v519_v46 }
  0x49   : > { %2856 = vmatprep.subr.bf16.mxu0 %v6452_v2  ;;  %3145 = vmatprep.subr.bf16.mxu1 %v6452_v2 }
  0x4b   : > { %1005 = vperm.xlu0 %6246, %v779_v1   ;;  %1010 = vperm.xlu1 %6247, %v780_v4   ;;  %v5505_v1 = vcombine.low %v516_v47, %v520_v48  ;;  %v5514_v4 = vcombine.high %v524_v59, %v528_v60 }
  0x4c   : > { %2857 = vmatpush2.bf16.msra.mxu0 %v6276_v3  ;;  %3146 = vmatpush2.bf16.msra.mxu1 %v6277_v5  ;;  %v5512_v3 = vcombine.high %v523_v57, %v527_v58  ;;  %v789_v5 = vld [vmem:[%s8783_s2 + $0x190] sm:$0xff]  ;;  %v568_v57 = vld [vmem:[%s8782_s1 + $0x2a8] sm:$0xff] }
  0x4d   : > { %2858 = vmatprep.subr.bf16.mxu0 %v6452_v2  ;;  %3147 = vmatprep.subr.bf16.mxu1 %v6452_v2 }
  0x4f   : > { %915 = vperm.xlu0 %6246, %v761_v6   ;;  %920 = vperm.xlu1 %6247, %v762_v8   ;;  %v531_v6 = vld [vmem:[%s8782_s1 + $0x180] sm:$0xff]  ;;  %v532_v8 = vld [vmem:[%s8782_s1 + $0x188] sm:$0xff] }
  0x50   : > { %2859 = vmatpush2.bf16.msra.mxu0 %v6278_v7  ;;  %3148 = vmatpush2.bf16.msra.mxu1 %v6279_v9  ;;  %v535_v7 = vld [vmem:[%s8782_s1 + $0x1a0] sm:$0xff]  ;;  %v536_v9 = vld [vmem:[%s8782_s1 + $0x1a8] sm:$0xff] }
  0x51   : > { %3406 = vmatprep.subr.bf16.mxu0 %v6452_v2  ;;  %3695 = vmatprep.subr.bf16.mxu1 %v6452_v2  ;;  %v5519_v25 = vcombine.low %v531_v6, %v535_v7 }
  0x53   : > { %835 = vperm.xlu0 %6246, %v745_v15   ;;  %2861 = vmatmul.mubr.bf16.vlgmr.msra.gmra.mxu0 %v5471_v14  ;;  %v5513_v14 = vcombine.low %v524_v59, %v528_v60  ;;  %v5520_v15 = vcombine.high %v531_v6, %v535_v7  ;;  %v6281_v60 = vld [vmem:[%s6545_s24 + $0x130] sm:$0xff]   ;;  %v772_v6 = vld [vmem:[%s8783_s2 + $0x108] sm:$0xff]  ;;  %v571_v7 = vld [vmem:[%s8782_s1 + $0x2c0] sm:$0xff] }
  0x54   : > { %840 = vperm.xlu1 %6247, %v746_v18   ;;  %3150 = vmatmul.mubr.bf16.vlgmr.msra.gmra.mxu1 %v5473_v16  ;;  %v5522_v16 = vcombine.high %v532_v8, %v536_v9  ;;  %v539_v18 = vld [vmem:[%s8782_s1 + $0x1c0] sm:$0xff] }
  0x55   : > { %2868 = vmatprep.mubr.bf16.mxu0 %v5480_v17  ;;  %3157 = vmatprep.mubr.bf16.mxu1 %v5482_v19  ;;  %v755_v17 = vld [vmem:[%s8783_s2 + $0x80] sm:$0xff] }
  0x56   : > { %v543_v19 = vld [vmem:[%s8782_s1 + $0x1e0] sm:$0xff] }
  0x57   : > { %1075 = vperm.xlu0 %6246, %v793_v20   ;;  %v540_v20 = vld [vmem:[%s8782_s1 + $0x1c8] sm:$0xff]  ;;  %v5527_v33 = vcombine.low %v539_v18, %v543_v19 }
  0x58   : > { %1080 = vperm.xlu1 %6247, %v794_v21   ;;  %v544_v21 = vld [vmem:[%s8782_s1 + $0x1e8] sm:$0xff] }
  0x59   : > { %v5529_v34 = vcombine.low %v540_v20, %v544_v21 }
  0x5b   : > { %995 = vperm.xlu0 %6246, %v777_v26   ;;  %2869 = vmatmul.mubr.bf16.gmra.mxu0 %v5479_v28  ;;  %v5521_v26 = vcombine.low %v532_v8, %v536_v9  ;;  %v5530_v28 = vcombine.high %v540_v20, %v544_v21  ;;  %v575_v8 = vld [vmem:[%s8782_s1 + $0x2e0] sm:$0xff]  ;;  %v6284_v20 = vld [vmem:[%s6545_s24 + $0x118] sm:$0xff]  }
  0x5c   : > { %1000 = vperm.xlu1 %6247, %v778_v27   ;;  %3158 = vmatmul.mubr.bf16.gmra.mxu1 %v5481_v29  ;;  %v5528_v27 = vcombine.high %v539_v18, %v543_v19  ;;  %v547_v29 = vld [vmem:[%s8782_s1 + $0x200] sm:$0xff]  ;;  %v6285_v21 = vld [vmem:[%s6545_s24 + $0x1b8] sm:$0xff]  }
  0x5d   : > { %2876 = vmatprep.mubr.bf16.mxu0 %v5488_v30  ;;  %3165 = vmatprep.mubr.bf16.mxu1 %v5490_v31  ;;  %v551_v30 = vld [vmem:[%s8782_s1 + $0x220] sm:$0xff]  ;;  %v548_v31 = vld [vmem:[%s8782_s1 + $0x208] sm:$0xff] }
  0x5e   : > { %v5536_v35 = vcombine.high %v547_v29, %v551_v30  ;;  %v5535_v45 = vcombine.low %v547_v29, %v551_v30  ;;  %3696 = vmatpush1.bf16.msra.mxu1 %v6285_v21  ;;  %v6286_v29 = vld [vmem:[%s6545_s24 + $0x110] sm:$0xff]   ;;  %v603_v21 = vld [vmem:[%s8782_s1 + $0x3c0] sm:$0xff] }
  0x5f   : > { %905 = vperm.xlu0 %6246, %v759_v32   ;;  %v552_v32 = vld [vmem:[%s8782_s1 + $0x228] sm:$0xff]  ;;  %3697 = vmatprep.subr.bf16.mxu1 %v6452_v2  ;;  %v6287_v30 = vld [vmem:[%s6545_s24 + $0x1b0] sm:$0xff]  }
  0x60   : > { %910 = vperm.xlu1 %6247, %v760_v37   ;;  %v5538_v36 = vcombine.high %v548_v31, %v552_v32  ;;  %v5537_v46 = vcombine.low %v548_v31, %v552_v32 }
  0x62   : > { %3698 = vmatpush1.bf16.msra.mxu1 %v6287_v30  ;;  %v6298_v30 = vld [vmem:[%s6545_s24 + $0x160] sm:$0xff]  }
  0x63   : > { %825 = vperm.xlu0 %6246, %v743_v38   ;;  %2877 = vmatmul.mubr.bf16.gmra.mxu0 %v5487_v40  ;;  %v559_v40 = vld [vmem:[%s8782_s1 + $0x260] sm:$0xff] }
  0x64   : > { %830 = vperm.xlu1 %6247, %v744_v39   ;;  %3166 = vmatmul.mubr.bf16.gmra.mxu1 %v5489_v41  ;;  %v555_v39 = vld [vmem:[%s8782_s1 + $0x240] sm:$0xff] }
  0x65   : > { %2884 = vmatprep.mubr.bf16.mxu0 %v5496_v42  ;;  %3173 = vmatprep.mubr.bf16.mxu1 %v5498_v43  ;;  %v556_v43 = vld [vmem:[%s8782_s1 + $0x248] sm:$0xff]  ;;  %v5544_v47 = vcombine.high %v555_v39, %v559_v40  ;;  %v5543_v59 = vcombine.low %v555_v39, %v559_v40  ;;  %v587_v40 = vld [vmem:[%s8782_s1 + $0x340] sm:$0xff] }
  0x66   : > { %3699 = vmatprep.subr.bf16.mxu1 %v6452_v2  ;;  %v6289_v39 = vld [vmem:[%s6545_s24 + $0x1a8] sm:$0xff]  }
  0x67   : > { %1065 = vperm.xlu0 %6246, %v791_v44   ;;  %v560_v44 = vld [vmem:[%s8782_s1 + $0x268] sm:$0xff]  ;;  %3700 = vmatpush1.bf16.msra.mxu1 %v6289_v39 }
  0x68   : > { %1070 = vperm.xlu1 %6247, %v792_v49   ;;  %v5546_v48 = vcombine.high %v556_v43, %v560_v44  ;;  %3701 = vmatprep.subr.bf16.mxu1 %v6452_v2 }
  0x6b   : > { %985 = vperm.xlu0 %6246, %v775_v50   ;;  %2885 = vmatmul.mubr.bf16.gmra.mxu0 %v5495_v52  ;;  %v787_v52 = vld [vmem:[%s8783_s2 + $0x180] sm:$0xff] }
  0x6c   : > { %990 = vperm.xlu1 %6247, %v776_v51   ;;  %3174 = vmatmul.mubr.bf16.gmra.mxu1 %v5497_v53  ;;  %v6280_v51 = vld [vmem:[%s6545_s24 + $0x138] sm:$0xff]   ;;  %v563_v53 = vld [vmem:[%s8782_s1 + $0x280] sm:$0xff] }
  0x6d   : > { %2892 = vmatprep.mubr.bf16.mxu0 %v5504_v54  ;;  %3181 = vmatprep.mubr.bf16.mxu1 %v5506_v55  ;;  %v567_v54 = vld [vmem:[%s8782_s1 + $0x2a0] sm:$0xff] }
  0x6e   : > { %3407 = vmatpush1.bf16.msra.mxu0 %v6280_v51  ;;  %v6290_v51 = vld [vmem:[%s6545_s24 + $0x100] sm:$0xff]  }
  0x6f   : > { %895 = vperm.xlu0 %6246, %v757_v56   ;;  %v564_v56 = vld [vmem:[%s8782_s1 + $0x288] sm:$0xff]  ;;  %3408 = vmatprep.subr.bf16.mxu0 %v6452_v2 }
  0x70   : > { %900 = vperm.xlu1 %6247, %v758_v61   ;;  %v5545_v61 = vcombine.low %v556_v43, %v560_v44  ;;  %v591_v43 = vld [vmem:[%s8782_s1 + $0x360] sm:$0xff] }
  0x72   : > { %3409 = vmatpush1.bf16.msra.mxu0 %v6281_v60  ;;  %v6292_v60 = vld [vmem:[%s6545_s24 + $0x178] sm:$0xff]  }
  0x73   : > { %815 = vperm.xlu0 %6246, %v741_v62   ;;  %2893 = vmatmul.mubr.bf16.gmra.mxu0 %v5503_v0  ;;  %v5552_v62 = vcombine.high %v563_v53, %v567_v54  ;;  %v771_v0 = vld [vmem:[%s8783_s2 + $0x100] sm:$0xff] }
  0x74   : > { %820 = vperm.xlu1 %6247, %v742_v63   ;;  %3182 = vmatmul.mubr.bf16.gmra.mxu1 %v5505_v1  ;;  %v788_v63 = vld [vmem:[%s8783_s2 + $0x188] sm:$0xff]  ;;  %v5554_v1 = vcombine.high %v564_v56, %v568_v57 }
  0x75   : > { %2900 = vmatprep.mubr.bf16.mxu0 %v5512_v3  ;;  %3189 = vmatprep.mubr.bf16.mxu1 %v5514_v4 }
  0x76   : > { %3410 = vmatprep.subr.bf16.mxu0 %v6452_v2 }
  0x77   : > { %1055 = vperm.xlu0 %6246, %v789_v5   ;;  %v6282_v5 = vld [vmem:[%s6545_s24 + $0x128] sm:$0xff]  }
  0x78   : > { %1060 = vperm.xlu1 %6247, %v790_v10   ;;  %v572_v10 = vld [vmem:[%s8782_s1 + $0x2c8] sm:$0xff]  ;;  %3411 = vmatpush1.bf16.msra.mxu0 %v6282_v5 }
  0x79   : > { %3412 = vmatprep.subr.bf16.mxu0 %v6452_v2  ;;  %v600_v5 = vld [vmem:[%s8782_s1 + $0x3a8] sm:$0xff] }
  0x7b   : > { %975 = vperm.xlu0 %6246, %v773_v11   ;;  %2901 = vmatmul.mubr.bf16.gmra.mxu0 %v5511_v13  ;;  %v576_v11 = vld [vmem:[%s8782_s1 + $0x2e8] sm:$0xff]  ;;  %v5551_v13 = vcombine.low %v563_v53, %v567_v54  ;;  %v5576_v54 = vcombine.high %v587_v40, %v591_v43 }
  0x7c   : > { %980 = vperm.xlu1 %6247, %v774_v12   ;;  %3190 = vmatmul.mubr.bf16.gmra.mxu1 %v5513_v14  ;;  %v6283_v14 = vld [vmem:[%s6545_s24 + $0x120] sm:$0xff]   ;;  %v5561_v31 = vcombine.low %v572_v10, %v576_v11 }
  0x7d   : > { %2908 = vmatprep.mubr.bf16.mxu0 %v5520_v15  ;;  %3197 = vmatprep.mubr.bf16.mxu1 %v5522_v16  ;;  %v5553_v15 = vcombine.low %v564_v56, %v568_v57  ;;  %v5560_v16 = vcombine.high %v571_v7, %v575_v8 }
  0x7e   : > { %3413 = vmatpush1.bf16.msra.mxu0 %v6283_v14 }
  0x7f   : > { %885 = vperm.xlu0 %6246, %v755_v17   ;;  %v5562_v17 = vcombine.high %v572_v10, %v576_v11  ;;  %3414 = vmatprep.subr.bf16.mxu0 %v6452_v2  ;;  %v6295_v10 = vld [vmem:[%s6545_s24 + $0x190] sm:$0xff]  }
  0x80   : > { %890 = vperm.xlu1 %6247, %v756_v22   ;;  %v579_v22 = vld [vmem:[%s8782_s1 + $0x300] sm:$0xff] }
  0x82   : > { %3415 = vmatpush1.bf16.msra.mxu0 %v6284_v20  ;;  %v6297_v20 = vld [vmem:[%s6545_s24 + $0x188] sm:$0xff]  }
  0x83   : > { %805 = vperm.xlu0 %6246, %v739_v23   ;;  %2909 = vmatmul.mubr.bf16.gmra.mxu0 %v5519_v25  ;;  %v583_v23 = vld [vmem:[%s8782_s1 + $0x320] sm:$0xff]  ;;  %v580_v25 = vld [vmem:[%s8782_s1 + $0x308] sm:$0xff] }
  0x84   : > { %810 = vperm.xlu1 %6247, %v740_v24   ;;  %3198 = vmatmul.mubr.bf16.gmra.mxu1 %v5521_v26  ;;  %v584_v26 = vld [vmem:[%s8782_s1 + $0x328] sm:$0xff]  ;;  %v5568_v32 = vcombine.high %v579_v22, %v583_v23 }
  0x85   : > { %2916 = vmatprep.mubr.bf16.mxu0 %v5528_v27  ;;  %3205 = vmatprep.mubr.bf16.mxu1 %v5530_v28  ;;  %v5559_v28 = vcombine.low %v571_v7, %v575_v8  ;;  %v5569_v53 = vcombine.low %v580_v25, %v584_v26  ;;  %v5575_v7 = vcombine.low %v587_v40, %v591_v43  ;;  %v6294_v8 = vld [vmem:[%s6545_s24 + $0x170] sm:$0xff]   ;;  %v6300_v43 = vld [vmem:[%s6545_s24 + $0x158] sm:$0xff]  }
  0x86   : > { %3416 = vmatprep.subr.bf16.mxu0 %v6452_v2 }
  0x87   : > { %1045 = vperm.xlu0 %6246, %v787_v52   ;;  %3417 = vmatpush1.bf16.msra.mxu0 %v6286_v29  ;;  %v6291_v52 = vld [vmem:[%s6545_s24 + $0x1a0] sm:$0xff]  }
  0x88   : > { %1050 = vperm.xlu1 %6247, %v788_v63   ;;  %3418 = vmatprep.subr.bf16.mxu0 %v6452_v2  ;;  %v599_v63 = vld [vmem:[%s8782_s1 + $0x3a0] sm:$0xff] }
  0x89   : > { %3702 = vmatpush1.bf16.msra.mxu1 %v6291_v52  ;;  %v612_v52 = vld [vmem:[%s8782_s1 + $0x408] sm:$0xff] }
  0x8a   : > { %v6903_v37 = vpop.permute.xlu0 %955  ;;  %v6905_v38 = vpop.permute.xlu1 %875  ;;  %3703 = vmatprep.subr.bf16.mxu1 %v6452_v2 }
  0x8b   : > { %2917 = vmatmul.mubr.bf16.gmra.mxu0 %v5527_v33  ;;  %965 = vperm.xlu0 %6246, %v771_v0   ;;  %v5570_v33 = vcombine.high %v580_v25, %v584_v26  ;;  %v604_v25 = vld [vmem:[%s8782_s1 + $0x3c8] sm:$0xff] }
  0x8c   : > { %3206 = vmatmul.mubr.bf16.gmra.mxu1 %v5529_v34  ;;  %2924 = vmatprep.mubr.bf16.mxu0 %v5536_v35  ;;  %v608_v26 = vld [vmem:[%s8782_s1 + $0x3e8] sm:$0xff] }
  0x8d   : > { %3213 = vmatprep.mubr.bf16.mxu1 %v5538_v36  ;;  %970 = vperm.xlu1 %6247, %v772_v6   ;;  %v6288_v36 = vld [vmem:[%s6545_s24 + $0x108] sm:$0xff]  }
  0x8e   : > { %v6913_v41 = vpop.permute.xlu0 %960  ;;  %v6915_v42 = vpop.permute.xlu1 %880  ;;  %3419 = vmatpush1.bf16.msra.mxu0 %v6288_v36  ;;  %v5594_v36 = vcombine.high %v604_v25, %v608_v26 }
  0x8f   : > { %3420 = vmatprep.subr.bf16.mxu0 %v6452_v2 }
  0x92   : > { %v6923_v49 = vpop.permute.xlu0 %1115  ;;  %v6925_v50 = vpop.permute.xlu1 %1120  ;;  %3421 = vmatpush1.bf16.msra.mxu0 %v6290_v51 }
  0x93   : > { %8791 = vst [vmem:[#allocation2_spill] sm:$0xff] %v6923_v49  ;;  %8792 = vst [vmem:[#allocation3_spill] sm:$0xff] %v6925_v50  ;;  %2925 = vmatmul.mubr.bf16.gmra.mxu0 %v5535_v45  ;;  %v588_v45 = vld [vmem:[%s8782_s1 + $0x348] sm:$0xff]  ;;  %3422 = vmatprep.subr.bf16.mxu0 %v6452_v2  ;;  %v667_v50 = vld [vmem:[%s8782_s1 + $0x5c0] sm:$0xff] }
  0x94   : > { %3214 = vmatmul.mubr.bf16.gmra.mxu1 %v5537_v46  ;;  %2932 = vmatprep.mubr.bf16.mxu0 %v5544_v47  ;;  %v592_v46 = vld [vmem:[%s8782_s1 + $0x368] sm:$0xff] }
  0x95   : > { %3221 = vmatprep.mubr.bf16.mxu1 %v5546_v48  ;;  %v5567_v48 = vcombine.low %v579_v22, %v583_v23  ;;  %v5578_v56 = vcombine.high %v588_v45, %v592_v46  ;;  %v5577_v11 = vcombine.low %v588_v45, %v592_v46  ;;  %v607_v22 = vld [vmem:[%s8782_s1 + $0x3e0] sm:$0xff]  ;;  %v6301_v45 = vld [vmem:[%s6545_s24 + $0x1d8] sm:$0xff]  }
  0x96   : > { %v6937_v55 = vpop.permute.xlu0 %1035  ;;  %v6945_v58 = vpop.permute.xlu1 %1040  ;;  %3423 = vmatpush2.bf16.msra.mxu0 %v6292_v60  ;;  %v611_v46 = vld [vmem:[%s8782_s1 + $0x400] sm:$0xff]  ;;  %v6302_v60 = vld [vmem:[%s6545_s24 + $0x150] sm:$0xff]  }
  0x97   : > { %8793 = vst [vmem:[#allocation4_spill] sm:$0xff] %v6937_v55  ;;  %8794 = vst [vmem:[#allocation5_spill] sm:$0xff] %v6945_v58  ;;  %3424 = vmatprep.subr.bf16.mxu0 %v6452_v2 }
  0x9a   : > { %v6955_v3 = vpop.permute.xlu0 %945  ;;  %v6957_v4 = vpop.permute.xlu1 %950  ;;  %3425 = vmatpush2.bf16.msra.mxu0 %v6294_v8  ;;  %v6304_v8 = vld [vmem:[%s6545_s24 + $0x148] sm:$0xff]  }
  0x9b   : > { %2933 = vmatmul.mubr.bf16.gmra.mxu0 %v5543_v59  ;;  %3426 = vmatprep.subr.bf16.mxu0 %v6452_v2 }
  0x9c   : > { %3222 = vmatmul.mubr.bf16.gmra.mxu1 %v5545_v61  ;;  %2940 = vmatprep.mubr.bf16.mxu0 %v5552_v62  ;;  %v6293_v61 = vld [vmem:[%s6545_s24 + $0x198] sm:$0xff]   ;;  %v595_v62 = vld [vmem:[%s8782_s1 + $0x380] sm:$0xff] }
  0x9d   : > { %3229 = vmatprep.mubr.bf16.mxu1 %v5554_v1  ;;  %3704 = vmatpush1.bf16.msra.mxu1 %v6293_v61  ;;  %v596_v1 = vld [vmem:[%s8782_s1 + $0x388] sm:$0xff]  ;;  %v5583_v29 = vcombine.low %v595_v62, %v599_v63  ;;  %v6303_v61 = vld [vmem:[%s6545_s24 + $0x1d0] sm:$0xff]  }
  0x9e   : > { %v6970_v9 = vpop.permute.xlu0 %865  ;;  %v6978_v12 = vpop.permute.xlu1 %870  ;;  %3705 = vmatprep.subr.bf16.mxu1 %v6452_v2  ;;  %v5586_v14 = vcombine.high %v596_v1, %v600_v5 }
  0xa1   : > { %3706 = vmatpush1.bf16.msra.mxu1 %v6295_v10  ;;  %v6305_v10 = vld [vmem:[%s6545_s24 + $0x1c8] sm:$0xff]  }
  0xa2   : > { %v6982_v18 = vpop.permute.xlu0 %1105  ;;  %v6984_v19 = vpop.permute.xlu1 %1110  ;;  %3707 = vmatprep.subr.bf16.mxu1 %v6452_v2 }
  0xa3   : > { %8795 = vst [vmem:[#allocation6_spill] sm:$0xff] %v6982_v18  ;;  %8796 = vst [vmem:[#allocation7_spill] sm:$0xff] %v6984_v19  ;;  %2941 = vmatmul.mubr.bf16.gmra.mxu0 %v5551_v13  ;;  %v5584_v13 = vcombine.high %v595_v62, %v599_v63  ;;  %v5593_v62 = vcombine.low %v604_v25, %v608_v26  ;;  %v6306_v25 = vld [vmem:[%s6545_s24 + $0x140] sm:$0xff]  }
  0xa4   : > { %3230 = vmatmul.mubr.bf16.gmra.mxu1 %v5553_v15  ;;  %2948 = vmatprep.mubr.bf16.mxu0 %v5560_v16  ;;  %v6307_v26 = vld [vmem:[%s6545_s24 + $0x1c0] sm:$0xff]  }
  0xa5   : > { %3237 = vmatprep.mubr.bf16.mxu1 %v5562_v17  ;;  %v6296_v17 = vld [vmem:[%s6545_s24 + $0x168] sm:$0xff]   ;;  %3708 = vmatpush1.bf16.msra.mxu1 %v6297_v20  ;;  %v675_v18 = vld [vmem:[%s8782_s1 + $0x600] sm:$0xff] }
  0xa6   : > { %v6995_v24 = vpop.permute.xlu0 %1025  ;;  %v7003_v27 = vpop.permute.xlu1 %1030  ;;  %3427 = vmatpush2.bf16.msra.mxu0 %v6296_v17  ;;  %3709 = vmatprep.subr.bf16.mxu1 %v6452_v2  ;;  %v620_v17 = vld [vmem:[%s8782_s1 + $0x448] sm:$0xff] }
  0xa7   : > { %8797 = vst [vmem:[#allocation8_spill] sm:$0xff] %v7003_v27  ;;  %3428 = vmatprep.subr.bf16.mxu0 %v6452_v2  ;;  %v624_v20 = vld [vmem:[%s8782_s1 + $0x468] sm:$0xff] }
  0xaa   : > { %v7009_v34 = vpop.permute.xlu0 %935  ;;  %v7011_v35 = vpop.permute.xlu1 %940  ;;  %3429 = vmatpush2.bf16.msra.mxu0 %v6298_v30 }
  0xab   : > { %2949 = vmatmul.mubr.bf16.gmra.mxu0 %v5559_v28  ;;  %3430 = vmatprep.subr.bf16.mxu0 %v6452_v2 }
  0xac   : > { %3238 = vmatmul.mubr.bf16.gmra.mxu1 %v5561_v31  ;;  %2956 = vmatprep.mubr.bf16.mxu0 %v5568_v32  ;;  %v6299_v31 = vld [vmem:[%s6545_s24 + $0x180] sm:$0xff]   ;;  %v5585_v32 = vcombine.low %v596_v1, %v600_v5 }
  0xad   : > { %3245 = vmatprep.mubr.bf16.mxu1 %v5570_v33  ;;  %v5592_v33 = vcombine.high %v603_v21, %v607_v22  ;;  %3710 = vmatpush1.bf16.msra.mxu1 %v6299_v31  ;;  %v5610_v31 = vcombine.high %v620_v17, %v624_v20 }
  0xae   : > { %v7023_v44 = vpop.permute.xlu0 %855  ;;  %v7031_v47 = vpop.permute.xlu1 %860  ;;  %3719 = vmatprep.subr.bf16.mxu1 %v6452_v2  ;;  %3431 = vmatpush2.bf16.msra.mxu0 %v6300_v43 }
  0xaf   : > { %3432 = vmatprep.subr.bf16.mxu0 %v6452_v2 }
  0xb1   : > { %3720 = vmatpush2.bf16.msra.mxu1 %v6301_v45  ;;  %v628_v45 = vld [vmem:[%s8782_s1 + $0x488] sm:$0xff] }
  0xb2   : > { %v7037_v57 = vpop.permute.xlu0 %1095  ;;  %v7039_v59 = vpop.permute.xlu1 %1100  ;;  %3721 = vmatprep.subr.bf16.mxu1 %v6452_v2  ;;  %3433 = vmatpush2.bf16.msra.mxu0 %v6302_v60 }
  0xb3   : > { %8798 = vst [vmem:[#allocation9_spill] sm:$0xff] %v7037_v57  ;;  %8799 = vst [vmem:[#allocation10_spill] sm:$0xff] %v7039_v59  ;;  %2957 = vmatmul.mubr.bf16.gmra.mxu0 %v5567_v48  ;;  %v615_v48 = vld [vmem:[%s8782_s1 + $0x420] sm:$0xff]  ;;  %3434 = vmatprep.subr.bf16.mxu0 %v6452_v2 }
  0xb4   : > { %3246 = vmatmul.mubr.bf16.gmra.mxu1 %v5569_v53  ;;  %2964 = vmatprep.mubr.bf16.mxu0 %v5576_v54  ;;  %v616_v53 = vld [vmem:[%s8782_s1 + $0x428] sm:$0xff]  ;;  %v5600_v63 = vcombine.high %v611_v46, %v615_v48  ;;  %v683_v57 = vld [vmem:[%s8782_s1 + $0x640] sm:$0xff] }
  0xb5   : > { %3253 = vmatprep.mubr.bf16.mxu1 %v5578_v56  ;;  %v5591_v56 = vcombine.low %v603_v21, %v607_v22  ;;  %v5602_v1 = vcombine.high %v612_v52, %v616_v53  ;;  %3722 = vmatpush2.bf16.msra.mxu1 %v6303_v61  ;;  %v5599_v22 = vcombine.low %v611_v46, %v615_v48  ;;  %v632_v46 = vld [vmem:[%s8782_s1 + $0x4a8] sm:$0xff] }
  0xb6   : > { %v7051_v0 = vpop.permute.xlu0 %1015  ;;  %v7059_v6 = vpop.permute.xlu1 %1020  ;;  %3723 = vmatprep.subr.bf16.mxu1 %v6452_v2  ;;  %3435 = vmatpush2.bf16.msra.mxu0 %v6304_v8  ;;  %v640_v8 = vld [vmem:[%s8782_s1 + $0x4e8] sm:$0xff] }
  0xb7   : > { %3436 = vmatprep.subr.bf16.mxu0 %v6452_v2 }
  0xb9   : > { %3724 = vmatpush2.bf16.msra.mxu1 %v6305_v10 }
  0xba   : > { %v7065_v15 = vpop.permute.xlu0 %925  ;;  %v7067_v16 = vpop.permute.xlu1 %930  ;;  %3725 = vmatprep.subr.bf16.mxu1 %v6452_v2  ;;  %3437 = vmatpush2.bf16.msra.mxu0 %v6306_v25  ;;  %v631_v2 = vld [vmem:[%s8782_s1 + $0x4a0] sm:$0xff] }
  0xbb   : > { %2965 = vmatmul.mubr.bf16.gmra.mxu0 %v5575_v7  ;;  %v643_v25 = vld [vmem:[%s8782_s1 + $0x500] sm:$0xff] }
  0xbc   : > { %3254 = vmatmul.mubr.bf16.gmra.mxu1 %v5577_v11  ;;  %2972 = vmatprep.mubr.bf16.mxu0 %v5584_v13  ;;  %v619_v11 = vld [vmem:[%s8782_s1 + $0x440] sm:$0xff] }
  0xbd   : > { %3261 = vmatprep.mubr.bf16.mxu1 %v5586_v14  ;;  %v623_v13 = vld [vmem:[%s8782_s1 + $0x460] sm:$0xff]  ;;  %3726 = vmatpush2.bf16.msra.mxu1 %v6307_v26 }
  0xbe   : > { %v7079_v23 = vpop.permute.xlu0 %845  ;;  %v7087_v28 = vpop.permute.xlu1 %850  ;;  %v5608_v30 = vcombine.high %v619_v11, %v623_v13  ;;  %v5607_v48 = vcombine.low %v619_v11, %v623_v13  ;;  %v5617_v13 = vcombine.low %v628_v45, %v632_v46  ;;  %v647_v26 = vld [vmem:[%s8782_s1 + $0x520] sm:$0xff] }
  0xc2   : > { %v7093_v39 = vpop.permute.xlu0 %1085  ;;  %v7095_v40 = vpop.permute.xlu1 %1090 }
  0xc3   : > { %8800 = vst [vmem:[#allocation11_spill] sm:$0xff] %v7093_v39  ;;  %8801 = vst [vmem:[#allocation12_spill] sm:$0xff] %v7095_v40  ;;  %2973 = vmatmul.mubr.bf16.gmra.mxu0 %v5583_v29  ;;  %v5601_v29 = vcombine.low %v612_v52, %v616_v53  ;;  %v5609_v52 = vcombine.low %v620_v17, %v624_v20  ;;  %v687_v40 = vld [vmem:[%s8782_s1 + $0x660] sm:$0xff] }
  0xc4   : > { %3262 = vmatmul.mubr.bf16.gmra.mxu1 %v5585_v32  ;;  %2980 = vmatprep.mubr.bf16.mxu0 %v5592_v33 }
  0xc5   : > { %3269 = vmatprep.mubr.bf16.mxu1 %v5594_v36  ;;  %v627_v36 = vld [vmem:[%s8782_s1 + $0x480] sm:$0xff] }
  0xc6   : > { %v7107_v51 = vpop.permute.xlu0 %1005  ;;  %v7115_v54 = vpop.permute.xlu1 %1010  ;;  %v5616_v53 = vcombine.high %v627_v36, %v631_v2  ;;  %v5615_v10 = vcombine.low %v627_v36, %v631_v2 }
  0xca   : > { %v7121_v5 = vpop.permute.xlu0 %915  ;;  %v7123_v7 = vpop.permute.xlu1 %920 }
  0xcb   : > { %2981 = vmatmul.mubr.bf16.gmra.mxu0 %v5591_v56  ;;  %v5618_v56 = vcombine.high %v628_v45, %v632_v46  ;;  %v5632_v46 = vcombine.high %v643_v25, %v647_v26 }
  0xcc   : > { %3270 = vmatmul.mubr.bf16.gmra.mxu1 %v5593_v62  ;;  %2988 = vmatprep.mubr.bf16.mxu0 %v5600_v63  ;;  %v635_v62 = vld [vmem:[%s8782_s1 + $0x4c0] sm:$0xff] }
  0xcd   : > { %3277 = vmatprep.mubr.bf16.mxu1 %v5602_v1  ;;  %v639_v63 = vld [vmem:[%s8782_s1 + $0x4e0] sm:$0xff]  ;;  %v636_v1 = vld [vmem:[%s8782_s1 + $0x4c8] sm:$0xff] }
  0xce   : > { %v7135_v14 = vpop.permute.xlu0 %835  ;;  %v5624_v17 = vcombine.high %v635_v62, %v639_v63  ;;  %v5626_v20 = vcombine.high %v636_v1, %v640_v8  ;;  %v5623_v36 = vcombine.low %v635_v62, %v639_v63  ;;  %v5625_v45 = vcombine.low %v636_v1, %v640_v8  ;;  %v652_v63 = vld [vmem:[%s8782_s1 + $0x548] sm:$0xff] }
  0xcf   : > { %v7143_v21 = vpop.permute.xlu1 %840  ;;  %v656_v1 = vld [vmem:[%s8782_s1 + $0x568] sm:$0xff]  ;;  %v5631_v8 = vcombine.low %v643_v25, %v647_v26 }
  0xd0   : > { %v660_v25 = vld [vmem:[%s8782_s1 + $0x588] sm:$0xff] }
  0xd1   : > { %v664_v26 = vld [vmem:[%s8782_s1 + $0x5a8] sm:$0xff] }
  0xd2   : > { %v7149_v32 = vpop.permute.xlu0 %1075 }
  0xd3   : > { %8802 = vst [vmem:[#allocation13_spill] sm:$0xff] %v7149_v32  ;;  %2989 = vmatmul.mubr.bf16.gmra.mxu0 %v5599_v22  ;;  %v7151_v33 = vpop.permute.xlu1 %1080 }
  0xd4   : > { %8803 = vst [vmem:[#allocation14_spill] sm:$0xff] %v7151_v33  ;;  %3278 = vmatmul.mubr.bf16.gmra.mxu1 %v5601_v29  ;;  %2996 = vmatprep.mubr.bf16.mxu0 %v5608_v30  ;;  %v644_v30 = vld [vmem:[%s8782_s1 + $0x508] sm:$0xff] }
  0xd5   : > { %3285 = vmatprep.mubr.bf16.mxu1 %v5610_v31  ;;  %v648_v31 = vld [vmem:[%s8782_s1 + $0x528] sm:$0xff] }
  0xd6   : > { %v7159_v43 = vpop.permute.xlu0 %995 }
  0xd7   : > { %v7167_v60 = vpop.permute.xlu1 %1000 }
  0xda   : > { %v7169_v61 = vpop.permute.xlu0 %905 }
  0xdb   : > { %2997 = vmatmul.mubr.bf16.gmra.mxu0 %v5607_v48  ;;  %v7183_v11 = vpop.permute.xlu1 %910  ;;  %v5634_v48 = vcombine.high %v644_v30, %v648_v31 }
  0xdc   : > { %3286 = vmatmul.mubr.bf16.gmra.mxu1 %v5609_v52  ;;  %3004 = vmatprep.mubr.bf16.mxu0 %v5616_v53  ;;  %v651_v53 = vld [vmem:[%s8782_s1 + $0x540] sm:$0xff] }
  0xdd   : > { %3293 = vmatprep.mubr.bf16.mxu1 %v5618_v56  ;;  %v655_v56 = vld [vmem:[%s8782_s1 + $0x560] sm:$0xff] }
  0xde   : > { %v7185_v22 = vpop.permute.xlu0 %825 }
  0xdf   : > { %v7193_v29 = vpop.permute.xlu1 %830 }
  0xe2   : > { %v7201_v2 = vpop.permute.xlu0 %1065 }
  0xe3   : > { %3005 = vmatmul.mubr.bf16.gmra.mxu0 %v5615_v10  ;;  %8804 = vst [vmem:[#allocation15_spill] sm:$0xff] %v7201_v2  ;;  %v7203_v52 = vpop.permute.xlu1 %1070  ;;  %v5633_v10 = vcombine.low %v644_v30, %v648_v31  ;;  %v5639_v30 = vcombine.low %v651_v53, %v655_v56 }
  0xe4   : > { %3294 = vmatmul.mubr.bf16.gmra.mxu1 %v5617_v13  ;;  %3012 = vmatprep.mubr.bf16.mxu0 %v5624_v17  ;;  %8805 = vst [vmem:[#allocation16_spill] sm:$0xff] %v7203_v52  ;;  %v5640_v13 = vcombine.high %v651_v53, %v655_v56  ;;  %v5642_v17 = vcombine.high %v652_v63, %v656_v1  ;;  %v671_v53 = vld [vmem:[%s8782_s1 + $0x5e0] sm:$0xff]  ;;  %v668_v56 = vld [vmem:[%s8782_s1 + $0x5c8] sm:$0xff] }
  0xe5   : > { %3301 = vmatprep.mubr.bf16.mxu1 %v5626_v20 }
  0xe6   : > { %v7211_v62 = vpop.permute.xlu0 %985 }
  0xe7   : > { %v7219_v20 = vpop.permute.xlu1 %990 }
  0xeb   : > { %3013 = vmatmul.mubr.bf16.gmra.mxu0 %v5623_v36  ;;  %v7221_v36 = vpop.permute.xlu0 %895  ;;  %v7235_v31 = vpop.permute.xlu1 %900 }
  0xec   : > { %3302 = vmatmul.mubr.bf16.gmra.mxu1 %v5625_v45  ;;  %3020 = vmatprep.mubr.bf16.mxu0 %v5632_v46  ;;  %v659_v45 = vld [vmem:[%s8782_s1 + $0x580] sm:$0xff] }
  0xed   : > { %3309 = vmatprep.mubr.bf16.mxu1 %v5634_v48  ;;  %v663_v46 = vld [vmem:[%s8782_s1 + $0x5a0] sm:$0xff]  ;;  %v5641_v48 = vcombine.low %v652_v63, %v656_v1  ;;  %v672_v63 = vld [vmem:[%s8782_s1 + $0x5e8] sm:$0xff] }
  0xee   : > { %v5647_v1 = vcombine.low %v659_v45, %v663_v46 }
  0xf3   : > { %3021 = vmatmul.mubr.bf16.gmra.mxu0 %v5631_v8  ;;  %v5648_v8 = vcombine.high %v659_v45, %v663_v46  ;;  %v679_v45 = vld [vmem:[%s8782_s1 + $0x620] sm:$0xff]  ;;  %v676_v46 = vld [vmem:[%s8782_s1 + $0x608] sm:$0xff] }
  0xf4   : > { %3310 = vmatmul.mubr.bf16.gmra.mxu1 %v5633_v10  ;;  %3028 = vmatprep.mubr.bf16.mxu0 %v5640_v13  ;;  %v5650_v10 = vcombine.high %v660_v25, %v664_v26  ;;  %v7237_v13 = vpop.permute.xlu0 %815 }
  0xf5   : > { %3317 = vmatprep.mubr.bf16.mxu1 %v5642_v17  ;;  %v7239_v17 = vpop.permute.xlu1 %820 }
  0xf9   : > { %v7255_v49 = vpop.permute.xlu1 %1060 }
  0xfa   : > { %8807 = vst [vmem:[#allocation18_spill] sm:$0xff] %v7255_v49  ;;  %v691_v49 = vld [vmem:[%s8782_s1 + $0x680] sm:$0xff] }
  0xfb   : > { %3029 = vmatmul.mubr.bf16.gmra.mxu0 %v5639_v30  ;;  %v7253_v30 = vpop.permute.xlu0 %1055 }
  0xfc   : > { %3318 = vmatmul.mubr.bf16.gmra.mxu1 %v5641_v48  ;;  %3036 = vmatprep.mubr.bf16.mxu0 %v5648_v8  ;;  %8806 = vst [vmem:[#allocation17_spill] sm:$0xff] %v7253_v30  ;;  %v5649_v48 = vcombine.low %v660_v25, %v664_v26  ;;  %v5656_v8 = vcombine.high %v667_v50, %v671_v53  ;;  %v680_v25 = vld [vmem:[%s8782_s1 + $0x628] sm:$0xff] }
  0xfd   : > { %3325 = vmatprep.mubr.bf16.mxu1 %v5650_v10  ;;  %v5658_v10 = vcombine.high %v668_v56, %v672_v63  ;;  %v5655_v26 = vcombine.low %v667_v50, %v671_v53  ;;  %v684_v50 = vld [vmem:[%s8782_s1 + $0x648] sm:$0xff] }
  0xfe   : > { %v688_v53 = vld [vmem:[%s8782_s1 + $0x668] sm:$0xff] }
  0xff   : > { %v7257_v19 = vpop.permute.xlu0 %975 }
 0x103   : > { %3037 = vmatmul.mubr.bf16.gmra.mxu0 %v5647_v1  ;;  %v5657_v1 = vcombine.low %v668_v56, %v672_v63  ;;  %v7273_v59 = vpop.permute.xlu0 %885  ;;  %v5663_v63 = vcombine.low %v675_v18, %v679_v45 }
 0x104   : > { %3326 = vmatmul.mubr.bf16.gmra.mxu1 %v5649_v48  ;;  %3044 = vmatprep.mubr.bf16.mxu0 %v5656_v8  ;;  %v5664_v48 = vcombine.high %v675_v18, %v679_v45  ;;  %v7271_v8 = vpop.permute.xlu1 %980  ;;  %v695_v18 = vld [vmem:[%s8782_s1 + $0x6a0] sm:$0xff] }
 0x105   : > { %3333 = vmatprep.mubr.bf16.mxu1 %v5658_v10  ;;  %v5666_v10 = vcombine.high %v676_v46, %v680_v25 }
 0x108   : > { %v7287_v56 = vpop.permute.xlu1 %890 }
 0x10b   : > { %3045 = vmatmul.mubr.bf16.gmra.mxu0 %v5655_v26  ;;  %v5665_v26 = vcombine.low %v676_v46, %v680_v25 }
 0x10c   : > { %3334 = vmatmul.mubr.bf16.gmra.mxu1 %v5657_v1  ;;  %3052 = vmatprep.mubr.bf16.mxu0 %v5664_v48  ;;  %v5672_v1 = vcombine.high %v683_v57, %v687_v40  ;;  %v806_v48 = vpop.permute.xlu0 %805  ;;  %v811_v2 = vpop.permute.xlu1 %810 }
 0x10d   : > { %3341 = vmatprep.mubr.bf16.mxu1 %v5666_v10  ;;  %v5674_v10 = vcombine.high %v684_v50, %v688_v53 }
 0x113   : > { %v2862_v39 = vpop.f32.mrf.mxu0  ;;  %3053 = vmatmul.mubr.bf16.gmra.mxu0 %v5663_v63  ;;  %v5671_v63 = vcombine.low %v683_v57, %v687_v40  ;;  %v699_v57 = vld [vmem:[%s8782_s1 + $0x6c0] sm:$0xff] }
 0x114   : > { %v2863_v33 = vadd.f32 %v2862_v39, %v806_v48  ;;  %v3151_v32 = vpop.f32.mrf.mxu1  ;;  %3342 = vmatmul.mubr.bf16.gmra.mxu1 %v5665_v26  ;;  %3060 = vmatprep.mubr.bf16.mxu0 %v5672_v1  ;;  %v692_v39 = vld [vmem:[%s8782_s1 + $0x688] sm:$0xff]  ;;  %v5673_v48 = vcombine.low %v684_v50, %v688_v53  ;;  %v703_v40 = vld [vmem:[%s8782_s1 + $0x6e0] sm:$0xff]  ;;  %v5679_v50 = vcombine.low %v691_v49, %v695_v18 }
 0x115   : > { %v2864_v52 = vpop.f32.mrf.mxu0  ;;  %3349 = vmatprep.mubr.bf16.mxu1 %v5674_v10  ;;  %v5680_v10 = vcombine.high %v691_v49, %v695_v18  ;;  %v707_v49 = vld [vmem:[%s8782_s1 + $0x700] sm:$0xff] }
 0x116   : > { %v7295_v45 = vadd.f32 %v3151_v32, %v2863_v33  ;;  %v3153_v46 = vpop.f32.mrf.mxu1  ;;  %v696_v52 = vld [vmem:[%s8782_s1 + $0x6a8] sm:$0xff] }
 0x117   : > { %v2865_v25 = vpop.f32.mrf.mxu0  ;;  %v5682_v58 = vcombine.high %v692_v39, %v696_v52 }
 0x118   : > { %8808 = vst [vmem:[#allocation19_spill] sm:$0xff] %v7295_v45  ;;  %v2866_v26 = vadd.f32 %v2865_v25, %v811_v2  ;;  %v3154_v1 = vpop.f32.mrf.mxu1 }
 0x119   : > { %v2867_v30 = vpop.f32.mrf.mxu0 }
 0x11a   : > { %v7303_v55 = vadd.f32 %v3154_v1, %v2866_v26  ;;  %v3156_v32 = vpop.f32.mrf.mxu1  ;;  %v5688_v26 = vcombine.high %v699_v57, %v703_v40 }
 0x11b   : > { %v2870_v33 = vpop.f32.mrf.mxu0  ;;  %3061 = vmatmul.mubr.bf16.gmra.mxu0 %v5671_v63  ;;  %v5681_v63 = vcombine.low %v692_v39, %v696_v52  ;;  %v712_v52 = vld [vmem:[%s8782_s1 + $0x728] sm:$0xff] }
 0x11c   : > { %v2871_v46 = vadd.f32 %v2870_v33, %v7237_v13  ;;  %v3159_v45 = vpop.f32.mrf.mxu1  ;;  %3350 = vmatmul.mubr.bf16.gmra.mxu1 %v5673_v48  ;;  %3068 = vmatprep.mubr.bf16.mxu0 %v5680_v10  ;;  %v700_v13 = vld [vmem:[%s8782_s1 + $0x6c8] sm:$0xff] }
 0x11d   : > { %v2872_v27 = vpop.f32.mrf.mxu0  ;;  %3357 = vmatprep.mubr.bf16.mxu1 %v5682_v58 }
 0x11e   : > { %v7312_v2 = vadd.f32 %v3159_v45, %v2871_v46  ;;  %v3161_v30 = vpop.f32.mrf.mxu1  ;;  %v704_v27 = vld [vmem:[%s8782_s1 + $0x6e8] sm:$0xff] }
 0x11f   : > { %v2873_v58 = vpop.f32.mrf.mxu0  ;;  %v5690_v48 = vcombine.high %v700_v13, %v704_v27 }
 0x120   : > { %v2874_v53 = vadd.f32 %v2873_v58, %v7239_v17  ;;  %v3162_v25 = vpop.f32.mrf.mxu1  ;;  %v711_v17 = vld [vmem:[%s8782_s1 + $0x720] sm:$0xff] }
 0x121   : > { %v2875_v1 = vpop.f32.mrf.mxu0 }
 0x122   : > { %v7321_v45 = vadd.f32 %v3162_v25, %v2874_v53  ;;  %v3164_v10 = vpop.f32.mrf.mxu1 }
 0x123   : > { %v2878_v32 = vpop.f32.mrf.mxu0  ;;  %3069 = vmatmul.mubr.bf16.gmra.mxu0 %v5679_v50  ;;  %v5687_v50 = vcombine.low %v699_v57, %v703_v40  ;;  %v719_v57 = vld [vmem:[%s8782_s1 + $0x760] sm:$0xff] }
 0x124   : > { %v2879_v33 = vadd.f32 %v2878_v32, %v7185_v22  ;;  %v3167_v46 = vpop.f32.mrf.mxu1  ;;  %3358 = vmatmul.mubr.bf16.gmra.mxu1 %v5681_v63  ;;  %3076 = vmatprep.mubr.bf16.mxu0 %v5688_v26  ;;  %v708_v22 = vld [vmem:[%s8782_s1 + $0x708] sm:$0xff]  ;;  %v5689_v63 = vcombine.low %v700_v13, %v704_v27  ;;  %v5696_v26 = vcombine.high %v707_v49, %v711_v17 }
 0x125   : > { %v2880_v30 = vpop.f32.mrf.mxu0  ;;  %3365 = vmatprep.mubr.bf16.mxu1 %v5690_v48  ;;  %v5698_v48 = vcombine.high %v708_v22, %v712_v52  ;;  %v720_v27 = vld [vmem:[%s8782_s1 + $0x768] sm:$0xff] }
 0x126   : > { %v7330_v18 = vadd.f32 %v3167_v46, %v2879_v33  ;;  %v3169_v39 = vpop.f32.mrf.mxu1 }
 0x127   : > { %v2881_v58 = vpop.f32.mrf.mxu0 }
 0x128   : > { %v2882_v53 = vadd.f32 %v2881_v58, %v7193_v29  ;;  %v3170_v25 = vpop.f32.mrf.mxu1  ;;  %v715_v29 = vld [vmem:[%s8782_s1 + $0x740] sm:$0xff] }
 0x129   : > { %v2883_v1 = vpop.f32.mrf.mxu0 }
 0x12a   : > { %v7339_v10 = vadd.f32 %v3170_v25, %v2882_v53  ;;  %v3172_v32 = vpop.f32.mrf.mxu1 }
 0x12b   : > { %v2886_v33 = vpop.f32.mrf.mxu0  ;;  %3077 = vmatmul.mubr.bf16.gmra.mxu0 %v5687_v50  ;;  %v5695_v50 = vcombine.low %v707_v49, %v711_v17  ;;  %v727_v49 = vld [vmem:[%s8782_s1 + $0x7a0] sm:$0xff] }
 0x12c   : > { %v2887_v46 = vadd.f32 %v2886_v33, %v7135_v14  ;;  %v3175_v30 = vpop.f32.mrf.mxu1  ;;  %3366 = vmatmul.mubr.bf16.gmra.mxu1 %v5689_v63  ;;  %3084 = vmatprep.mubr.bf16.mxu0 %v5696_v26  ;;  %v716_v14 = vld [vmem:[%s8782_s1 + $0x748] sm:$0xff]  ;;  %v5697_v63 = vcombine.low %v708_v22, %v712_v52  ;;  %v5704_v26 = vcombine.high %v715_v29, %v719_v57 }
 0x12d   : > { %v2888_v39 = vpop.f32.mrf.mxu0  ;;  %3373 = vmatprep.mubr.bf16.mxu1 %v5698_v48  ;;  %v5706_v48 = vcombine.high %v716_v14, %v720_v27  ;;  %v728_v52 = vld [vmem:[%s8782_s1 + $0x7a8] sm:$0xff] }
 0x12e   : > { %v7348_v40 = vadd.f32 %v3175_v30, %v2887_v46  ;;  %v3177_v13 = vpop.f32.mrf.mxu1 }
 0x12f   : > { %v2889_v58 = vpop.f32.mrf.mxu0 }
 0x130   : > { %v2890_v53 = vadd.f32 %v2889_v58, %v7143_v21  ;;  %v3178_v25 = vpop.f32.mrf.mxu1  ;;  %v723_v21 = vld [vmem:[%s8782_s1 + $0x780] sm:$0xff] }
 0x131   : > { %v2891_v1 = vpop.f32.mrf.mxu0 }
 0x132   : > { %v7357_v32 = vadd.f32 %v3178_v25, %v2890_v53  ;;  %v3180_v33 = vpop.f32.mrf.mxu1 }
 0x133   : > { %v2894_v46 = vpop.f32.mrf.mxu0  ;;  %3085 = vmatmul.mubr.bf16.gmra.mxu0 %v5695_v50  ;;  %v5703_v50 = vcombine.low %v715_v29, %v719_v57  ;;  %v735_v29 = vld [vmem:[%s8782_s1 + $0x7e0] sm:$0xff] }
 0x134   : > { %v2895_v30 = vadd.f32 %v2894_v46, %v7079_v23  ;;  %v3183_v39 = vpop.f32.mrf.mxu1  ;;  %3374 = vmatmul.mubr.bf16.gmra.mxu1 %v5697_v63  ;;  %3092 = vmatprep.mubr.bf16.mxu0 %v5704_v26  ;;  %v724_v23 = vld [vmem:[%s8782_s1 + $0x788] sm:$0xff]  ;;  %v5705_v63 = vcombine.low %v716_v14, %v720_v27  ;;  %v5712_v26 = vcombine.high %v723_v21, %v727_v49 }
 0x135   : > { %v2896_v13 = vpop.f32.mrf.mxu0  ;;  %3381 = vmatprep.mubr.bf16.mxu1 %v5706_v48  ;;  %v5714_v48 = vcombine.high %v724_v23, %v728_v52  ;;  %v736_v27 = vld [vmem:[%s8782_s1 + $0x7e8] sm:$0xff] }
 0x136   : > { %v7366_v17 = vadd.f32 %v3183_v39, %v2895_v30  ;;  %v3185_v22 = vpop.f32.mrf.mxu1 }
 0x137   : > { %v2897_v58 = vpop.f32.mrf.mxu0 }
 0x138   : > { %v2898_v53 = vadd.f32 %v2897_v58, %v7087_v28  ;;  %v3186_v25 = vpop.f32.mrf.mxu1  ;;  %v731_v28 = vld [vmem:[%s8782_s1 + $0x7c0] sm:$0xff] }
 0x139   : > { %v2899_v1 = vpop.f32.mrf.mxu0 }
 0x13a   : > { %v7375_v33 = vadd.f32 %v3186_v25, %v2898_v53  ;;  %v3188_v46 = vpop.f32.mrf.mxu1 }
 0x13b   : > { %v2902_v30 = vpop.f32.mrf.mxu0  ;;  %3093 = vmatmul.mubr.bf16.gmra.mxu0 %v5703_v50  ;;  %v5711_v50 = vcombine.low %v723_v21, %v727_v49  ;;  %v489_v21 = vld [vmem:[%s8782_s1 + $0x30] sm:$0xff] }
 0x13c   : > { %v2903_v39 = vadd.f32 %v2902_v30, %v7023_v44  ;;  %v3191_v13 = vpop.f32.mrf.mxu1  ;;  %3382 = vmatmul.mubr.bf16.gmra.mxu1 %v5705_v63  ;;  %3100 = vmatprep.mubr.bf16.mxu0 %v5712_v26  ;;  %v732_v44 = vld [vmem:[%s8782_s1 + $0x7c8] sm:$0xff]  ;;  %v5713_v63 = vcombine.low %v724_v23, %v728_v52  ;;  %v5720_v26 = vcombine.high %v731_v28, %v735_v29  ;;  %v490_v52 = vld [vmem:[%s8782_s1 + $0x38] sm:$0xff] }
 0x13d   : > { %v2904_v22 = vpop.f32.mrf.mxu0  ;;  %3389 = vmatprep.mubr.bf16.mxu1 %v5714_v48  ;;  %v5722_v48 = vcombine.high %v732_v44, %v736_v27 }
 0x13e   : > { %v7384_v57 = vadd.f32 %v3191_v13, %v2903_v39  ;;  %v3193_v14 = vpop.f32.mrf.mxu1 }
 0x13f   : > { %v2905_v58 = vpop.f32.mrf.mxu0 }
 0x140   : > { %v2906_v53 = vadd.f32 %v2905_v58, %v7031_v47  ;;  %v3194_v25 = vpop.f32.mrf.mxu1  ;;  %v485_v47 = vld [vmem:[%s8782_s1 + $0x10] sm:$0xff] }
 0x141   : > { %v2907_v1 = vpop.f32.mrf.mxu0 }
 0x142   : > { %v7393_v46 = vadd.f32 %v3194_v25, %v2906_v53  ;;  %v3196_v30 = vpop.f32.mrf.mxu1 }
 0x143   : > { %v2910_v39 = vpop.f32.mrf.mxu0  ;;  %3101 = vmatmul.mubr.bf16.gmra.mxu0 %v5711_v50  ;;  %v5719_v50 = vcombine.low %v731_v28, %v735_v29  ;;  %v497_v28 = vld [vmem:[%s8782_s1 + $0x70] sm:$0xff] }
 0x144   : > { %v2911_v13 = vadd.f32 %v2910_v39, %v6970_v9  ;;  %v3199_v22 = vpop.f32.mrf.mxu1  ;;  %3390 = vmatmul.mubr.bf16.gmra.mxu1 %v5713_v63  ;;  %3108 = vmatprep.mubr.bf16.mxu0 %v5720_v26  ;;  %v486_v9 = vld [vmem:[%s8782_s1 + $0x18] sm:$0xff]  ;;  %v5721_v63 = vcombine.low %v732_v44, %v736_v27  ;;  %v5476_v26 = vcombine.high %v485_v47, %v489_v21 }
 0x145   : > { %v2912_v14 = vpop.f32.mrf.mxu0  ;;  %3397 = vmatprep.mubr.bf16.mxu1 %v5722_v48  ;;  %v5478_v48 = vcombine.high %v486_v9, %v490_v52  ;;  %v498_v27 = vld [vmem:[%s8782_s1 + $0x78] sm:$0xff] }
 0x146   : > { %v7402_v49 = vadd.f32 %v3199_v22, %v2911_v13  ;;  %v3201_v23 = vpop.f32.mrf.mxu1 }
 0x147   : > { %v2913_v58 = vpop.f32.mrf.mxu0 }
 0x148   : > { %v2914_v53 = vadd.f32 %v2913_v58, %v6978_v12  ;;  %v3202_v25 = vpop.f32.mrf.mxu1  ;;  %v493_v12 = vld [vmem:[%s8782_s1 + $0x50] sm:$0xff] }
 0x149   : > { %v2915_v1 = vpop.f32.mrf.mxu0 }
 0x14a   : > { %v7411_v30 = vadd.f32 %v3202_v25, %v2914_v53  ;;  %v3204_v39 = vpop.f32.mrf.mxu1 }
 0x14b   : > { %v2918_v13 = vpop.f32.mrf.mxu0  ;;  %3109 = vmatmul.mubr.bf16.gmra.mxu0 %v5719_v50  ;;  %v5475_v50 = vcombine.low %v485_v47, %v489_v21  ;;  %v4174_v39 = vld [vmem:[%s8785_s4 + $0xf0] sm:$0xff] }
 0x14c   : > { %v2919_v22 = vadd.f32 %v2918_v13, %v6905_v38  ;;  %v3207_v14 = vpop.f32.mrf.mxu1  ;;  %3398 = vmatmul.mubr.bf16.gmra.mxu1 %v5721_v63  ;;  %3438 = vmatprep.mubr.bf16.mxu0 %v5476_v26  ;;  %v494_v38 = vld [vmem:[%s8782_s1 + $0x58] sm:$0xff]  ;;  %v5477_v63 = vcombine.low %v486_v9, %v490_v52  ;;  %v5484_v26 = vcombine.high %v493_v12, %v497_v28  ;;  %v505_v9 = vld [vmem:[%s8782_s1 + $0xb0] sm:$0xff] }
 0x14d   : > { %v2920_v23 = vpop.f32.mrf.mxu0  ;;  %5787 = vmatprep.mubr.msk.bf16.mxu1 %vm2731_vm0, %v5478_v48  ;;  %v5486_v48 = vcombine.high %v494_v38, %v498_v27  ;;  %4328 = vperm.xlu0 %6246, %v4174_v39   ;;  %v4175_v52 = vld [vmem:[%s8785_s4 + $0xf8] sm:$0xff] }
 0x14e   : > { %v7421_v29 = vadd.f32 %v3207_v14, %v2919_v22  ;;  %v3209_v44 = vpop.f32.mrf.mxu1  ;;  %4333 = vperm.xlu1 %6247, %v4175_v52  }
 0x14f   : > { %v2921_v58 = vpop.f32.mrf.mxu0 }
 0x150   : > { %v2922_v53 = vadd.f32 %v2921_v58, %v6915_v42  ;;  %v3210_v25 = vpop.f32.mrf.mxu1  ;;  %v501_v42 = vld [vmem:[%s8782_s1 + $0x90] sm:$0xff] }
 0x151   : > { %v2923_v1 = vpop.f32.mrf.mxu0  ;;  %v5492_v39 = vcombine.high %v501_v42, %v505_v9 }
 0x152   : > { %v7433_v13 = vadd.f32 %v3210_v25, %v2922_v53  ;;  %v3212_v22 = vpop.f32.mrf.mxu1  ;;  %v506_v53 = vld [vmem:[%s8782_s1 + $0xb8] sm:$0xff] }
 0x153   : > { %v2926_v14 = vpop.f32.mrf.mxu0  ;;  %3439 = vmatmul.mubr.bf16.vlgmr.msra.gmra.mxu0 %v5475_v50  ;;  %v502_v50 = vld [vmem:[%s8782_s1 + $0x98] sm:$0xff] }
 0x154   : > { %v2927_v23 = vadd.f32 %v2926_v14, %v7273_v59  ;;  %v3215_v47 = vpop.f32.mrf.mxu1  ;;  %3728 = vmatmul.mubr.bf16.vlgmr.msra.gmra.mxu1 %v5477_v63  ;;  %3446 = vmatprep.mubr.bf16.mxu0 %v5484_v26  ;;  %v4158_v59 = vld [vmem:[%s8785_s4 + $0x70] sm:$0xff]  ;;  %v5483_v63 = vcombine.low %v493_v12, %v497_v28  ;;  %v5494_v14 = vcombine.high %v502_v50, %v506_v53 }
 0x155   : > { %v2928_v21 = vpop.f32.mrf.mxu0  ;;  %5788 = vmatprep.mubr.msk.bf16.mxu1 %vm2731_vm0, %v5486_v48  ;;  %4248 = vperm.xlu0 %6246, %v4158_v59   ;;  %v5485_v48 = vcombine.low %v494_v38, %v498_v27  ;;  %v509_v38 = vld [vmem:[%s8782_s1 + $0xd0] sm:$0xff] }
 0x156   : > { %v7449_v44 = vadd.f32 %v3215_v47, %v2927_v23  ;;  %v3217_v58 = vpop.f32.mrf.mxu1  ;;  %v4159_v23 = vld [vmem:[%s8785_s4 + $0x78] sm:$0xff]  ;;  %v4172_v47 = vld [vmem:[%s8785_s4 + $0xe0] sm:$0xff]  ;;  %v513_v59 = vld [vmem:[%s8782_s1 + $0xf0] sm:$0xff] }
 0x157   : > { %v2929_v25 = vpop.f32.mrf.mxu0  ;;  %4253 = vperm.xlu1 %6247, %v4159_v23   ;;  %v4173_v58 = vld [vmem:[%s8785_s4 + $0xe8] sm:$0xff]  ;;  %v5493_v23 = vcombine.low %v502_v50, %v506_v53  ;;  %v517_v50 = vld [vmem:[%s8782_s1 + $0x110] sm:$0xff] }
 0x158   : > { %v2930_v26 = vadd.f32 %v2929_v25, %v7287_v56  ;;  %v3218_v1 = vpop.f32.mrf.mxu1 }
 0x159   : > { %v2931_v22 = vpop.f32.mrf.mxu0  ;;  %4318 = vperm.xlu0 %6246, %v4172_v47   ;;  %v5500_v47 = vcombine.high %v509_v38, %v513_v59 }
 0x15a   : > { %v7464_v21 = vadd.f32 %v3218_v1, %v2930_v26  ;;  %v3220_v52 = vpop.f32.mrf.mxu1  ;;  %v510_v26 = vld [vmem:[%s8782_s1 + $0xd8] sm:$0xff] }
 0x15b   : > { %v2934_v12 = vpop.f32.mrf.mxu0  ;;  %3447 = vmatmul.mubr.bf16.gmra.mxu0 %v5483_v63  ;;  %v514_v1 = vld [vmem:[%s8782_s1 + $0xf8] sm:$0xff]  ;;  %4323 = vperm.xlu1 %6247, %v4173_v58  }
 0x15c   : > { %v2935_v56 = vadd.f32 %v2934_v12, %v7221_v36  ;;  %v3223_v28 = vpop.f32.mrf.mxu1  ;;  %3736 = vmatmul.mubr.bf16.gmra.mxu1 %v5485_v48  ;;  %3454 = vmatprep.mubr.bf16.mxu0 %v5492_v39  ;;  %v4156_v36 = vld [vmem:[%s8785_s4 + $0x60] sm:$0xff]  ;;  %v5491_v39 = vcombine.low %v501_v42, %v505_v9  ;;  %v5502_v12 = vcombine.high %v510_v26, %v514_v1 }
 0x15d   : > { %v2936_v27 = vpop.f32.mrf.mxu0  ;;  %5789 = vmatprep.mubr.msk.bf16.mxu1 %vm2731_vm0, %v5494_v14  ;;  %4238 = vperm.xlu0 %6246, %v4156_v36   ;;  %v521_v36 = vld [vmem:[%s8782_s1 + $0x130] sm:$0xff] }
 0x15e   : > { %v7480_v25 = vadd.f32 %v3223_v28, %v2935_v56  ;;  %v3225_v63 = vpop.f32.mrf.mxu1  ;;  %v4157_v56 = vld [vmem:[%s8785_s4 + $0x68] sm:$0xff]  ;;  %v4170_v28 = vld [vmem:[%s8785_s4 + $0xd0] sm:$0xff] }
 0x15f   : > { %v2937_v48 = vpop.f32.mrf.mxu0  ;;  %4243 = vperm.xlu1 %6247, %v4157_v56   ;;  %v4171_v63 = vld [vmem:[%s8785_s4 + $0xd8] sm:$0xff]  ;;  %v5501_v56 = vcombine.low %v510_v26, %v514_v1  ;;  %v525_v26 = vld [vmem:[%s8782_s1 + $0x150] sm:$0xff] }
 0x160   : > { %v2938_v22 = vadd.f32 %v2937_v48, %v7235_v31  ;;  %v3226_v14 = vpop.f32.mrf.mxu1 }
 0x161   : > { %v2939_v52 = vpop.f32.mrf.mxu0  ;;  %4308 = vperm.xlu0 %6246, %v4170_v28   ;;  %v5508_v28 = vcombine.high %v517_v50, %v521_v36 }
 0x162   : > { %v7495_v27 = vadd.f32 %v3226_v14, %v2938_v22  ;;  %v3228_v58 = vpop.f32.mrf.mxu1  ;;  %v518_v22 = vld [vmem:[%s8782_s1 + $0x118] sm:$0xff] }
 0x163   : > { %v2942_v42 = vpop.f32.mrf.mxu0  ;;  %3455 = vmatmul.mubr.bf16.gmra.mxu0 %v5491_v39  ;;  %v522_v14 = vld [vmem:[%s8782_s1 + $0x138] sm:$0xff]  ;;  %4313 = vperm.xlu1 %6247, %v4171_v63  }
 0x164   : > { %v2943_v31 = vadd.f32 %v2942_v42, %v7169_v61  ;;  %v3231_v9 = vpop.f32.mrf.mxu1  ;;  %3744 = vmatmul.mubr.bf16.gmra.mxu1 %v5493_v23  ;;  %3462 = vmatprep.mubr.bf16.mxu0 %v5500_v47  ;;  %v4154_v61 = vld [vmem:[%s8785_s4 + $0x50] sm:$0xff]  ;;  %v5499_v47 = vcombine.low %v509_v38, %v513_v59  ;;  %v5510_v42 = vcombine.high %v518_v22, %v522_v14 }
 0x165   : > { %v2944_v53 = vpop.f32.mrf.mxu0  ;;  %5790 = vmatprep.mubr.msk.bf16.mxu1 %vm2731_vm0, %v5502_v12  ;;  %4228 = vperm.xlu0 %6246, %v4154_v61   ;;  %v529_v61 = vld [vmem:[%s8782_s1 + $0x170] sm:$0xff] }
 0x166   : > { %v7511_v48 = vadd.f32 %v3231_v9, %v2943_v31  ;;  %v3233_v39 = vpop.f32.mrf.mxu1  ;;  %v4155_v31 = vld [vmem:[%s8785_s4 + $0x58] sm:$0xff]  ;;  %v4168_v9 = vld [vmem:[%s8785_s4 + $0xc0] sm:$0xff] }
 0x167   : > { %v2945_v23 = vpop.f32.mrf.mxu0  ;;  %4233 = vperm.xlu1 %6247, %v4155_v31   ;;  %v4169_v39 = vld [vmem:[%s8785_s4 + $0xc8] sm:$0xff]  ;;  %v5509_v31 = vcombine.low %v518_v22, %v522_v14  ;;  %v533_v22 = vld [vmem:[%s8782_s1 + $0x190] sm:$0xff] }
 0x168   : > { %v2946_v52 = vadd.f32 %v2945_v23, %v7183_v11  ;;  %v3234_v12 = vpop.f32.mrf.mxu1 }
 0x169   : > { %v2947_v58 = vpop.f32.mrf.mxu0  ;;  %4298 = vperm.xlu0 %6246, %v4168_v9   ;;  %v5516_v9 = vcombine.high %v525_v26, %v529_v61 }
 0x16a   : > { %v7526_v53 = vadd.f32 %v3234_v12, %v2946_v52  ;;  %v3236_v63 = vpop.f32.mrf.mxu1  ;;  %v526_v52 = vld [vmem:[%s8782_s1 + $0x158] sm:$0xff] }
 0x16b   : > { %v2950_v38 = vpop.f32.mrf.mxu0  ;;  %3463 = vmatmul.mubr.bf16.gmra.mxu0 %v5499_v47  ;;  %v530_v12 = vld [vmem:[%s8782_s1 + $0x178] sm:$0xff]  ;;  %4303 = vperm.xlu1 %6247, %v4169_v39  }
 0x16c   : > { %v2951_v11 = vadd.f32 %v2950_v38, %v7121_v5  ;;  %v3239_v59 = vpop.f32.mrf.mxu1  ;;  %3752 = vmatmul.mubr.bf16.gmra.mxu1 %v5501_v56  ;;  %3470 = vmatprep.mubr.bf16.mxu0 %v5508_v28  ;;  %v4152_v5 = vld [vmem:[%s8785_s4 + $0x40] sm:$0xff]  ;;  %v5507_v28 = vcombine.low %v517_v50, %v521_v36  ;;  %v5518_v38 = vcombine.high %v526_v52, %v530_v12 }
 0x16d   : > { %v2952_v1 = vpop.f32.mrf.mxu0  ;;  %5791 = vmatprep.mubr.msk.bf16.mxu1 %vm2731_vm0, %v5510_v42  ;;  %4218 = vperm.xlu0 %6246, %v4152_v5   ;;  %v537_v5 = vld [vmem:[%s8782_s1 + $0x1b0] sm:$0xff] }
 0x16e   : > { %v7542_v23 = vadd.f32 %v3239_v59, %v2951_v11  ;;  %v3241_v47 = vpop.f32.mrf.mxu1  ;;  %v4153_v11 = vld [vmem:[%s8785_s4 + $0x48] sm:$0xff]  ;;  %v4166_v59 = vld [vmem:[%s8785_s4 + $0xb0] sm:$0xff] }
 0x16f   : > { %v2953_v56 = vpop.f32.mrf.mxu0  ;;  %4223 = vperm.xlu1 %6247, %v4153_v11   ;;  %v4167_v47 = vld [vmem:[%s8785_s4 + $0xb8] sm:$0xff]  ;;  %v5517_v11 = vcombine.low %v526_v52, %v530_v12  ;;  %v541_v52 = vld [vmem:[%s8782_s1 + $0x1d0] sm:$0xff] }
 0x170   : > { %v2954_v58 = vadd.f32 %v2953_v56, %v7123_v7  ;;  %v3242_v42 = vpop.f32.mrf.mxu1 }
 0x171   : > { %v2955_v63 = vpop.f32.mrf.mxu0  ;;  %4288 = vperm.xlu0 %6246, %v4166_v59   ;;  %v5524_v59 = vcombine.high %v533_v22, %v537_v5 }
 0x172   : > { %v7557_v1 = vadd.f32 %v3242_v42, %v2954_v58  ;;  %v3244_v39 = vpop.f32.mrf.mxu1  ;;  %v534_v58 = vld [vmem:[%s8782_s1 + $0x198] sm:$0xff] }
 0x173   : > { %v2958_v50 = vpop.f32.mrf.mxu0  ;;  %3471 = vmatmul.mubr.bf16.gmra.mxu0 %v5507_v28  ;;  %v538_v42 = vld [vmem:[%s8782_s1 + $0x1b8] sm:$0xff]  ;;  %4293 = vperm.xlu1 %6247, %v4167_v47  }
 0x174   : > { %v2959_v7 = vadd.f32 %v2958_v50, %v7065_v15  ;;  %v3247_v36 = vpop.f32.mrf.mxu1  ;;  %3760 = vmatmul.mubr.bf16.gmra.mxu1 %v5509_v31  ;;  %3478 = vmatprep.mubr.bf16.mxu0 %v5516_v9  ;;  %v4150_v15 = vld [vmem:[%s8785_s4 + $0x30] sm:$0xff]  ;;  %v5515_v9 = vcombine.low %v525_v26, %v529_v61  ;;  %v5526_v50 = vcombine.high %v534_v58, %v538_v42 }
 0x175   : > { %v2960_v14 = vpop.f32.mrf.mxu0  ;;  %5792 = vmatprep.mubr.msk.bf16.mxu1 %vm2731_vm0, %v5518_v38  ;;  %4208 = vperm.xlu0 %6246, %v4150_v15   ;;  %v545_v15 = vld [vmem:[%s8782_s1 + $0x1f0] sm:$0xff] }
 0x176   : > { %v7573_v56 = vadd.f32 %v3247_v36, %v2959_v7  ;;  %v3249_v28 = vpop.f32.mrf.mxu1  ;;  %v4151_v7 = vld [vmem:[%s8785_s4 + $0x38] sm:$0xff]  ;;  %v4164_v36 = vld [vmem:[%s8785_s4 + $0xa0] sm:$0xff] }
 0x177   : > { %v2961_v31 = vpop.f32.mrf.mxu0  ;;  %4213 = vperm.xlu1 %6247, %v4151_v7   ;;  %v4165_v28 = vld [vmem:[%s8785_s4 + $0xa8] sm:$0xff]  ;;  %v5525_v7 = vcombine.low %v534_v58, %v538_v42  ;;  %v549_v58 = vld [vmem:[%s8782_s1 + $0x210] sm:$0xff] }
 0x178   : > { %v2962_v63 = vadd.f32 %v2961_v31, %v7067_v16  ;;  %v3250_v38 = vpop.f32.mrf.mxu1 }
 0x179   : > { %v2963_v39 = vpop.f32.mrf.mxu0  ;;  %4278 = vperm.xlu0 %6246, %v4164_v36   ;;  %v5532_v36 = vcombine.high %v541_v52, %v545_v15 }
 0x17a   : > { %v7588_v14 = vadd.f32 %v3250_v38, %v2962_v63  ;;  %v3252_v47 = vpop.f32.mrf.mxu1  ;;  %v542_v63 = vld [vmem:[%s8782_s1 + $0x1d8] sm:$0xff] }
 0x17b   : > { %v2966_v26 = vpop.f32.mrf.mxu0  ;;  %3479 = vmatmul.mubr.bf16.gmra.mxu0 %v5515_v9  ;;  %v546_v38 = vld [vmem:[%s8782_s1 + $0x1f8] sm:$0xff]  ;;  %4283 = vperm.xlu1 %6247, %v4165_v28  }
 0x17c   : > { %v2967_v16 = vadd.f32 %v2966_v26, %v7009_v34  ;;  %v3255_v61 = vpop.f32.mrf.mxu1  ;;  %3768 = vmatmul.mubr.bf16.gmra.mxu1 %v5517_v11  ;;  %3486 = vmatprep.mubr.bf16.mxu0 %v5524_v59  ;;  %v4148_v34 = vld [vmem:[%s8785_s4 + $0x20] sm:$0xff]  ;;  %v5523_v59 = vcombine.low %v533_v22, %v537_v5  ;;  %v5534_v26 = vcombine.high %v542_v63, %v546_v38 }
 0x17d   : > { %v2968_v12 = vpop.f32.mrf.mxu0  ;;  %5793 = vmatprep.mubr.msk.bf16.mxu1 %vm2731_vm0, %v5526_v50  ;;  %4198 = vperm.xlu0 %6246, %v4148_v34   ;;  %v553_v34 = vld [vmem:[%s8782_s1 + $0x230] sm:$0xff] }
 0x17e   : > { %v7604_v31 = vadd.f32 %v3255_v61, %v2967_v16  ;;  %v3257_v9 = vpop.f32.mrf.mxu1  ;;  %v4149_v16 = vld [vmem:[%s8785_s4 + $0x28] sm:$0xff]  ;;  %v4162_v61 = vld [vmem:[%s8785_s4 + $0x90] sm:$0xff] }
 0x17f   : > { %v2969_v11 = vpop.f32.mrf.mxu0  ;;  %4203 = vperm.xlu1 %6247, %v4149_v16   ;;  %v4163_v9 = vld [vmem:[%s8785_s4 + $0x98] sm:$0xff]  ;;  %v5533_v16 = vcombine.low %v542_v63, %v546_v38  ;;  %v557_v38 = vld [vmem:[%s8782_s1 + $0x250] sm:$0xff] }
 0x180   : > { %v2970_v39 = vadd.f32 %v2969_v11, %v7011_v35  ;;  %v3258_v50 = vpop.f32.mrf.mxu1 }
 0x181   : > { %v2971_v47 = vpop.f32.mrf.mxu0  ;;  %4268 = vperm.xlu0 %6246, %v4162_v61   ;;  %v5540_v61 = vcombine.high %v549_v58, %v553_v34 }
 0x182   : > { %v7619_v12 = vadd.f32 %v3258_v50, %v2970_v39  ;;  %v3260_v28 = vpop.f32.mrf.mxu1  ;;  %v550_v39 = vld [vmem:[%s8782_s1 + $0x218] sm:$0xff] }
 0x183   : > { %v2974_v22 = vpop.f32.mrf.mxu0  ;;  %3487 = vmatmul.mubr.bf16.gmra.mxu0 %v5523_v59  ;;  %v554_v50 = vld [vmem:[%s8782_s1 + $0x238] sm:$0xff]  ;;  %4273 = vperm.xlu1 %6247, %v4163_v9  }
 0x184   : > { %v2975_v35 = vadd.f32 %v2974_v22, %v6955_v3  ;;  %v3263_v5 = vpop.f32.mrf.mxu1  ;;  %3776 = vmatmul.mubr.bf16.gmra.mxu1 %v5525_v7  ;;  %3494 = vmatprep.mubr.bf16.mxu0 %v5532_v36  ;;  %v4146_v3 = vld [vmem:[%s8785_s4 + $0x10] sm:$0xff]  ;;  %v5531_v36 = vcombine.low %v541_v52, %v545_v15  ;;  %v5542_v22 = vcombine.high %v550_v39, %v554_v50 }
 0x185   : > { %v2976_v42 = vpop.f32.mrf.mxu0  ;;  %5794 = vmatprep.mubr.msk.bf16.mxu1 %vm2731_vm0, %v5534_v26  ;;  %4188 = vperm.xlu0 %6246, %v4146_v3  }
 0x186   : > { %v7635_v11 = vadd.f32 %v3263_v5, %v2975_v35  ;;  %v3265_v59 = vpop.f32.mrf.mxu1  ;;  %v4147_v35 = vld [vmem:[%s8785_s4 + $0x18] sm:$0xff]  ;;  %v4160_v5 = vld [vmem:[%s8785_s4 + $0x80] sm:$0xff] }
 0x187   : > { %v2977_v7 = vpop.f32.mrf.mxu0  ;;  %4193 = vperm.xlu1 %6247, %v4147_v35   ;;  %v561_v59 = vld [vmem:[%s8782_s1 + $0x270] sm:$0xff] }
 0x188   : > { %v2978_v47 = vadd.f32 %v2977_v7, %v6957_v4  ;;  %v3266_v26 = vpop.f32.mrf.mxu1  ;;  %v7652_v4 = vpop.permute.xlu0 %1045  ;;  %v4161_v7 = vld [vmem:[%s8785_s4 + $0x88] sm:$0xff] }
 0x189   : > { %v2979_v28 = vpop.f32.mrf.mxu0  ;;  %4258 = vperm.xlu0 %6246, %v4160_v5  }
 0x18a   : > { %v7650_v42 = vadd.f32 %v3266_v26, %v2978_v47  ;;  %v3268_v9 = vpop.f32.mrf.mxu1  ;;  %v558_v26 = vld [vmem:[%s8782_s1 + $0x258] sm:$0xff]  ;;  %v5539_v28 = vcombine.low %v549_v58, %v553_v34 }
 0x18b   : > { %v2982_v52 = vpop.f32.mrf.mxu0  ;;  %3495 = vmatmul.mubr.bf16.gmra.mxu0 %v5531_v36  ;;  %4263 = vperm.xlu1 %6247, %v4161_v7   ;;  %v5541_v9 = vcombine.low %v550_v39, %v554_v50  ;;  %v5056_v7 = vld [vmem:[%s8787_s6 + $0x70] sm:$0xff] }
 0x18c   : > { %v2983_v15 = vadd.f32 %v2982_v52, %v6903_v37  ;;  %v3271_v63 = vpop.f32.mrf.mxu1  ;;  %3784 = vmatmul.mubr.bf16.gmra.mxu1 %v5533_v16  ;;  %3502 = vmatprep.mubr.bf16.mxu0 %v5540_v61  ;;  %v4144_v37 = vld [vmem:[%s8785_s4] sm:$0xff]  ;;  %v562_v16 = vld [vmem:[%s8782_s1 + $0x278] sm:$0xff]  ;;  %v5548_v52 = vcombine.high %v557_v38, %v561_v59  ;;  %v565_v50 = vld [vmem:[%s8782_s1 + $0x290] sm:$0xff] }
 0x18d   : > { %v2984_v3 = vpop.f32.mrf.mxu0  ;;  %5795 = vmatprep.mubr.msk.bf16.mxu1 %vm2731_vm0, %v5542_v22  ;;  %v7676_v22 = vpop.permute.xlu1 %1050  ;;  %4178 = vperm.xlu0 %6246, %v4144_v37  }
 0x18e   : > { %v7668_v36 = vadd.f32 %v3271_v63, %v2983_v15  ;;  %v3273_v47 = vpop.f32.mrf.mxu1  ;;  %v966_v63 = vpop.permute.xlu0 %965  ;;  %v5550_v3 = vcombine.high %v558_v26, %v562_v16 }
 0x18f   : > { %v2985_v61 = vpop.f32.mrf.mxu0  ;;  %v4145_v47 = vld [vmem:[%s8785_s4 + $0x8] sm:$0xff] }
 0x190   : > { %8809 = vst [vmem:[#allocation20_spill] sm:$0xff] %v7668_v36  ;;  %v2986_v35 = vadd.f32 %v2985_v61, %v6913_v41  ;;  %v3274_v5 = vpop.f32.mrf.mxu1  ;;  %4183 = vperm.xlu1 %6247, %v4145_v47  }
 0x191   : > { %v2987_v15 = vpop.f32.mrf.mxu0  ;;  %5130 = vperm.xlu0 %6246, %v5056_v7   ;;  %v5547_v7 = vcombine.low %v557_v38, %v561_v59 }
 0x192   : > { %v7685_v58 = vadd.f32 %v3274_v5, %v2986_v35  ;;  %v3276_v34 = vpop.f32.mrf.mxu1  ;;  %v971_v15 = vpop.permute.xlu1 %970  ;;  %v569_v35 = vld [vmem:[%s8782_s1 + $0x2b0] sm:$0xff]  ;;  %v5054_v5 = vld [vmem:[%s8787_s6 + $0x60] sm:$0xff] }
 0x193   : > { %v2990_v37 = vpop.f32.mrf.mxu0  ;;  %3503 = vmatmul.mubr.bf16.gmra.mxu0 %v5539_v28  ;;  %v5057_v28 = vld [vmem:[%s8787_s6 + $0x78] sm:$0xff] }
 0x194   : > { %8810 = vst [vmem:[#allocation21_spill] sm:$0xff] %v7685_v58  ;;  %v2991_v41 = vadd.f32 %v2990_v37, %v966_v63  ;;  %v3279_v39 = vpop.f32.mrf.mxu1  ;;  %3792 = vmatmul.mubr.bf16.gmra.mxu1 %v5541_v9  ;;  %3510 = vmatprep.mubr.bf16.mxu0 %v5548_v52  ;;  %v566_v63 = vld [vmem:[%s8782_s1 + $0x298] sm:$0xff]  ;;  %v5556_v58 = vcombine.high %v565_v50, %v569_v35 }
 0x195   : > { %v2992_v61 = vpop.f32.mrf.mxu0  ;;  %5796 = vmatprep.mubr.msk.bf16.mxu1 %vm2731_vm0, %v5550_v3  ;;  %v570_v3 = vld [vmem:[%s8782_s1 + $0x2b8] sm:$0xff]  ;;  %5135 = vperm.xlu1 %6247, %v5057_v28  }
 0x196   : > { %v7700_v9 = vadd.f32 %v3279_v39, %v2991_v41  ;;  %v3281_v52 = vpop.f32.mrf.mxu1  ;;  %5120 = vperm.xlu0 %6246, %v5054_v5   ;;  %v5549_v61 = vcombine.low %v558_v26, %v562_v16  ;;  %v5558_v41 = vcombine.high %v566_v63, %v570_v3  ;;  %v5055_v39 = vld [vmem:[%s8787_s6 + $0x68] sm:$0xff]  ;;  %v5053_v5 = vld [vmem:[%s8787_s6 + $0x58] sm:$0xff] }
 0x197   : > { %v2993_v47 = vpop.f32.mrf.mxu0  ;;  %v5052_v52 = vld [vmem:[%s8787_s6 + $0x50] sm:$0xff] }
 0x198   : > { %8811 = vst [vmem:[#allocation22_spill] sm:$0xff] %v7700_v9  ;;  %v2994_v34 = vadd.f32 %v2993_v47, %v971_v15  ;;  %v3282_v37 = vpop.f32.mrf.mxu1  ;;  %v577_v15 = vld [vmem:[%s8782_s1 + $0x2f0] sm:$0xff] }
 0x199   : > { %v2995_v36 = vpop.f32.mrf.mxu0  ;;  %5125 = vperm.xlu1 %6247, %v5055_v39  }
 0x19a   : > { %v7714_v9 = vadd.f32 %v3282_v37, %v2994_v34  ;;  %v3284_v28 = vpop.f32.mrf.mxu1  ;;  %5110 = vperm.xlu0 %6246, %v5052_v52   ;;  %v573_v36 = vld [vmem:[%s8782_s1 + $0x2d0] sm:$0xff]  ;;  %v578_v34 = vld [vmem:[%s8782_s1 + $0x2f8] sm:$0xff]  ;;  %v5557_v52 = vcombine.low %v566_v63, %v570_v3 }
 0x19b   : > { %v2998_v38 = vpop.f32.mrf.mxu0  ;;  %3511 = vmatmul.mubr.bf16.gmra.mxu0 %v5547_v7  ;;  %v574_v7 = vld [vmem:[%s8782_s1 + $0x2d8] sm:$0xff]  ;;  %v5564_v28 = vcombine.high %v573_v36, %v577_v15  ;;  %v581_v63 = vld [vmem:[%s8782_s1 + $0x310] sm:$0xff] }
 0x19c   : > { %v2999_v59 = vadd.f32 %v2998_v38, %v7257_v19  ;;  %v3287_v26 = vpop.f32.mrf.mxu1  ;;  %3800 = vmatmul.mubr.bf16.gmra.mxu1 %v5549_v61  ;;  %3518 = vmatprep.mubr.bf16.mxu0 %v5556_v58  ;;  %v5050_v19 = vld [vmem:[%s8787_s6 + $0x40] sm:$0xff]  ;;  %v5555_v61 = vcombine.low %v565_v50, %v569_v35 }
 0x19d   : > { %v3000_v16 = vpop.f32.mrf.mxu0  ;;  %5797 = vmatprep.mubr.msk.bf16.mxu1 %vm2731_vm0, %v5558_v41  ;;  %5115 = vperm.xlu1 %6247, %v5053_v5  }
 0x19e   : > { %v7730_v58 = vadd.f32 %v3287_v26, %v2999_v59  ;;  %v3289_v47 = vpop.f32.mrf.mxu1  ;;  %5100 = vperm.xlu0 %6246, %v5050_v19   ;;  %v5566_v59 = vcombine.high %v574_v7, %v578_v34  ;;  %v5051_v26 = vld [vmem:[%s8787_s6 + $0x48] sm:$0xff]  ;;  %v5048_v16 = vld [vmem:[%s8787_s6 + $0x30] sm:$0xff] }
 0x19f   : > { %v3001_v37 = vpop.f32.mrf.mxu0  ;;  %v585_v19 = vld [vmem:[%s8782_s1 + $0x330] sm:$0xff] }
 0x1a0   : > { %v3002_v41 = vadd.f32 %v3001_v37, %v7271_v8  ;;  %v3290_v39 = vpop.f32.mrf.mxu1  ;;  %v5049_v37 = vld [vmem:[%s8787_s6 + $0x38] sm:$0xff] }
 0x1a1   : > { %v3003_v38 = vpop.f32.mrf.mxu0  ;;  %5105 = vperm.xlu1 %6247, %v5051_v26  }
 0x1a2   : > { %v7745_v47 = vadd.f32 %v3290_v39, %v3002_v41  ;;  %v3292_v5 = vpop.f32.mrf.mxu1  ;;  %5090 = vperm.xlu0 %6246, %v5048_v16   ;;  %v582_v39 = vld [vmem:[%s8782_s1 + $0x318] sm:$0xff]  ;;  %v5563_v38 = vcombine.low %v573_v36, %v577_v15  ;;  %v5565_v16 = vcombine.low %v574_v7, %v578_v34  ;;  %v589_v7 = vld [vmem:[%s8782_s1 + $0x350] sm:$0xff] }
 0x1a3   : > { %v3006_v50 = vpop.f32.mrf.mxu0  ;;  %3519 = vmatmul.mubr.bf16.gmra.mxu0 %v5555_v61  ;;  %v5572_v5 = vcombine.high %v581_v63, %v585_v19 }
 0x1a4   : > { %v3007_v8 = vadd.f32 %v3006_v50, %v7211_v62  ;;  %v3295_v35 = vpop.f32.mrf.mxu1  ;;  %3808 = vmatmul.mubr.bf16.gmra.mxu1 %v5557_v52  ;;  %3526 = vmatprep.mubr.bf16.mxu0 %v5564_v28  ;;  %v5046_v62 = vld [vmem:[%s8787_s6 + $0x20] sm:$0xff]  ;;  %v586_v52 = vld [vmem:[%s8782_s1 + $0x338] sm:$0xff] }
 0x1a5   : > { %v3008_v3 = vpop.f32.mrf.mxu0  ;;  %5798 = vmatprep.mubr.msk.bf16.mxu1 %vm2731_vm0, %v5566_v59  ;;  %5095 = vperm.xlu1 %6247, %v5049_v37  }
 0x1a6   : > { %v7761_v61 = vadd.f32 %v3295_v35, %v3007_v8  ;;  %v3297_v41 = vpop.f32.mrf.mxu1  ;;  %5080 = vperm.xlu0 %6246, %v5046_v62   ;;  %v5574_v8 = vcombine.high %v582_v39, %v586_v52  ;;  %v5047_v35 = vld [vmem:[%s8787_s6 + $0x28] sm:$0xff]  ;;  %v5044_v3 = vld [vmem:[%s8787_s6 + $0x10] sm:$0xff] }
 0x1a7   : > { %v3009_v28 = vpop.f32.mrf.mxu0  ;;  %v593_v62 = vld [vmem:[%s8782_s1 + $0x370] sm:$0xff] }
 0x1a8   : > { %v3010_v59 = vadd.f32 %v3009_v28, %v7219_v20  ;;  %v3298_v26 = vpop.f32.mrf.mxu1  ;;  %v5045_v28 = vld [vmem:[%s8787_s6 + $0x18] sm:$0xff] }
 0x1a9   : > { %v3011_v50 = vpop.f32.mrf.mxu0  ;;  %5085 = vperm.xlu1 %6247, %v5047_v35  }
 0x1aa   : > { %v7776_v41 = vadd.f32 %v3298_v26, %v3010_v59  ;;  %v3300_v37 = vpop.f32.mrf.mxu1  ;;  %5070 = vperm.xlu0 %6246, %v5044_v3   ;;  %v590_v26 = vld [vmem:[%s8782_s1 + $0x358] sm:$0xff]  ;;  %v5571_v50 = vcombine.low %v581_v63, %v585_v19  ;;  %v5573_v3 = vcombine.low %v582_v39, %v586_v52  ;;  %v597_v52 = vld [vmem:[%s8782_s1 + $0x390] sm:$0xff] }
 0x1ab   : > { %v3014_v36 = vpop.f32.mrf.mxu0  ;;  %3527 = vmatmul.mubr.bf16.gmra.mxu0 %v5563_v38  ;;  %v5580_v37 = vcombine.high %v589_v7, %v593_v62 }
 0x1ac   : > { %v3015_v20 = vadd.f32 %v3014_v36, %v7159_v43  ;;  %v3303_v15 = vpop.f32.mrf.mxu1  ;;  %3816 = vmatmul.mubr.bf16.gmra.mxu1 %v5565_v16  ;;  %3534 = vmatprep.mubr.bf16.mxu0 %v5572_v5  ;;  %v5042_v43 = vld [vmem:[%s8787_s6] sm:$0xff]  ;;  %v594_v16 = vld [vmem:[%s8782_s1 + $0x378] sm:$0xff] }
 0x1ad   : > { %v3016_v34 = vpop.f32.mrf.mxu0  ;;  %5799 = vmatprep.mubr.msk.bf16.mxu1 %vm2731_vm0, %v5574_v8  ;;  %5075 = vperm.xlu1 %6247, %v5045_v28  }
 0x1ae   : > { %v7792_v38 = vadd.f32 %v3303_v15, %v3015_v20  ;;  %v3305_v59 = vpop.f32.mrf.mxu1  ;;  %5060 = vperm.xlu0 %6246, %v5042_v43   ;;  %v5582_v20 = vcombine.high %v590_v26, %v594_v16  ;;  %v5043_v15 = vld [vmem:[%s8787_s6 + $0x8] sm:$0xff]  ;;  %v5340_v34 = vld [vmem:[%s8789_s8] sm:$0x7]  ;;  %v601_v43 = vld [vmem:[%s8782_s1 + $0x3b0] sm:$0xff] }
 0x1af   : > { %v3017_v5 = vpop.f32.mrf.mxu0 }
 0x1b0   : > { %v3018_v8 = vadd.f32 %v3017_v5, %v7167_v60  ;;  %v3306_v35 = vpop.f32.mrf.mxu1 }
 0x1b1   : > { %v3019_v36 = vpop.f32.mrf.mxu0  ;;  %5065 = vperm.xlu1 %6247, %v5043_v15   ;;  %v5588_v15 = vcombine.high %v597_v52, %v601_v43 }
 0x1b2   : > { %v7807_v59 = vadd.f32 %v3306_v35, %v3018_v8  ;;  %v3308_v28 = vpop.f32.mrf.mxu1  ;;  %5343 = vperm.xlu0 %6246, %v5340_v34   ;;  %v602_v8 = vld [vmem:[%s8782_s1 + $0x3b8] sm:$0xff] }
 0x1b3   : > { %v3022_v63 = vpop.f32.mrf.mxu0  ;;  %3535 = vmatmul.mubr.bf16.gmra.mxu0 %v5571_v50 }
 0x1b4   : > { %v3023_v60 = vadd.f32 %v3022_v63, %v7107_v51  ;;  %v3311_v19 = vpop.f32.mrf.mxu1  ;;  %3824 = vmatmul.mubr.bf16.gmra.mxu1 %v5573_v3  ;;  %3542 = vmatprep.mubr.bf16.mxu0 %v5580_v37  ;;  %v598_v51 = vld [vmem:[%s8782_s1 + $0x398] sm:$0xff]  ;;  %v5579_v3 = vcombine.low %v589_v7, %v593_v62  ;;  %v609_v7 = vld [vmem:[%s8782_s1 + $0x3f0] sm:$0xff] }
 0x1b5   : > { %v3024_v39 = vpop.f32.mrf.mxu0  ;;  %5800 = vmatprep.mubr.msk.bf16.mxu1 %vm2731_vm0, %v5582_v20  ;;  %v5581_v20 = vcombine.low %v590_v26, %v594_v16  ;;  %v5590_v28 = vcombine.high %v598_v51, %v602_v8  ;;  %v610_v16 = vld [vmem:[%s8782_s1 + $0x3f8] sm:$0xff] }
 0x1b6   : > { %v7817_v5 = vadd.f32 %v3311_v19, %v3023_v60  ;;  %v3313_v50 = vpop.f32.mrf.mxu1 }
 0x1b7   : > { %v3025_v35 = vpop.f32.mrf.mxu0 }
 0x1b8   : > { %8812 = vst [vmem:[#allocation23_spill] sm:$0xff] %v7817_v5  ;;  %v3026_v37 = vadd.f32 %v3025_v35, %v7115_v54  ;;  %v3314_v36 = vpop.f32.mrf.mxu1  ;;  %v605_v54 = vld [vmem:[%s8782_s1 + $0x3d0] sm:$0xff]  ;;  %v5587_v35 = vcombine.low %v597_v52, %v601_v43 }
 0x1b9   : > { %v3027_v34 = vpop.f32.mrf.mxu0  ;;  %v617_v52 = vld [vmem:[%s8782_s1 + $0x430] sm:$0xff] }
 0x1ba   : > { %v7826_v63 = vadd.f32 %v3314_v36, %v3026_v37  ;;  %v3316_v60 = vpop.f32.mrf.mxu1  ;;  %v5589_v36 = vcombine.low %v598_v51, %v602_v8  ;;  %v618_v8 = vld [vmem:[%s8782_s1 + $0x438] sm:$0xff] }
 0x1bb   : > { %v3030_v19 = vpop.f32.mrf.mxu0  ;;  %3543 = vmatmul.mubr.bf16.gmra.mxu0 %v5579_v3 }
 0x1bc   : > { %v3031_v39 = vadd.f32 %v3030_v19, %v7051_v0  ;;  %v3319_v50 = vpop.f32.mrf.mxu1  ;;  %3832 = vmatmul.mubr.bf16.gmra.mxu1 %v5581_v20  ;;  %3550 = vmatprep.mubr.bf16.mxu0 %v5588_v15  ;;  %v606_v0 = vld [vmem:[%s8782_s1 + $0x3d8] sm:$0xff]  ;;  %v5596_v20 = vcombine.high %v605_v54, %v609_v7 }
 0x1bd   : > { %v3032_v5 = vpop.f32.mrf.mxu0  ;;  %5801 = vmatprep.mubr.msk.bf16.mxu1 %vm2731_vm0, %v5590_v28  ;;  %v5598_v34 = vcombine.high %v606_v0, %v610_v16 }
 0x1be   : > { %v7836_v62 = vadd.f32 %v3319_v50, %v3031_v39  ;;  %v3321_v26 = vpop.f32.mrf.mxu1 }
 0x1bf   : > { %v3033_v5 = vpop.f32.mrf.mxu0 }
 0x1c0   : > { %v3034_v3 = vadd.f32 %v3033_v5, %v7059_v6  ;;  %v3322_v37 = vpop.f32.mrf.mxu1  ;;  %v613_v6 = vld [vmem:[%s8782_s1 + $0x410] sm:$0xff] }
 0x1c1   : > { %v3035_v15 = vpop.f32.mrf.mxu0 }
 0x1c2   : > { %v7845_v28 = vadd.f32 %v3322_v37, %v3034_v3  ;;  %v3324_v60 = vpop.f32.mrf.mxu1  ;;  %v8815_v3 = vld [vmem:[#allocation8_spill] sm:$0xff]  ;;  %v5604_v15 = vcombine.high %v613_v6, %v617_v52 }
 0x1c3   : > { %v3038_v19 = vpop.f32.mrf.mxu0  ;;  %3551 = vmatmul.mubr.bf16.gmra.mxu0 %v5587_v35  ;;  %v5595_v35 = vcombine.low %v605_v54, %v609_v7  ;;  %v621_v54 = vld [vmem:[%s8782_s1 + $0x450] sm:$0xff] }
 0x1c4   : > { %8813 = vst [vmem:[#allocation24_spill] sm:$0xff] %v7845_v28  ;;  %v3039_v39 = vadd.f32 %v3038_v19, %v6995_v24  ;;  %v3327_v50 = vpop.f32.mrf.mxu1  ;;  %3840 = vmatmul.mubr.bf16.gmra.mxu1 %v5589_v36  ;;  %3558 = vmatprep.mubr.bf16.mxu0 %v5596_v20  ;;  %v614_v24 = vld [vmem:[%s8782_s1 + $0x418] sm:$0xff]  ;;  %v5597_v20 = vcombine.low %v606_v0, %v610_v16  ;;  %v625_v7 = vld [vmem:[%s8782_s1 + $0x470] sm:$0xff] }
 0x1c5   : > { %v3040_v26 = vpop.f32.mrf.mxu0  ;;  %5802 = vmatprep.mubr.msk.bf16.mxu1 %vm2731_vm0, %v5598_v34  ;;  %v5606_v60 = vcombine.high %v614_v24, %v618_v8 }
 0x1c6   : > { %v7855_v43 = vadd.f32 %v3327_v50, %v3039_v39  ;;  %v3329_v51 = vpop.f32.mrf.mxu1  ;;  %v8816_v26 = vld [vmem:[#allocation4_spill] sm:$0xff] }
 0x1c7   : > { %v3041_v5 = vpop.f32.mrf.mxu0 }
 0x1c8   : > { %8814 = vst [vmem:[#allocation25_spill] sm:$0xff] %v7855_v43  ;;  %v3042_v37 = vadd.f32 %v3041_v5, %v8815_v3  ;;  %v3330_v36 = vpop.f32.mrf.mxu1  ;;  %v622_v5 = vld [vmem:[%s8782_s1 + $0x458] sm:$0xff]  ;;  %v5603_v3 = vcombine.low %v613_v6, %v617_v52  ;;  %v629_v6 = vld [vmem:[%s8782_s1 + $0x490] sm:$0xff] }
 0x1c9   : > { %v3043_v34 = vpop.f32.mrf.mxu0  ;;  %v633_v52 = vld [vmem:[%s8782_s1 + $0x4b0] sm:$0xff] }
 0x1ca   : > { %v7864_v19 = vadd.f32 %v3330_v36, %v3042_v37  ;;  %v3332_v39 = vpop.f32.mrf.mxu1  ;;  %v8818_v37 = vld [vmem:[#allocation5_spill] sm:$0xff]  ;;  %v5612_v34 = vcombine.high %v621_v54, %v625_v7 }
 0x1cb   : > { %v3046_v50 = vpop.f32.mrf.mxu0  ;;  %3559 = vmatmul.mubr.bf16.gmra.mxu0 %v5595_v35 }
 0x1cc   : > { %v3047_v51 = vadd.f32 %v3046_v50, %v8816_v26  ;;  %v3335_v43 = vpop.f32.mrf.mxu1  ;;  %3848 = vmatmul.mubr.bf16.gmra.mxu1 %v5597_v20  ;;  %3566 = vmatprep.mubr.bf16.mxu0 %v5604_v15  ;;  %v5605_v15 = vcombine.low %v614_v24, %v618_v8 }
 0x1cd   : > { %v3048_v28 = vpop.f32.mrf.mxu0  ;;  %5803 = vmatprep.mubr.msk.bf16.mxu1 %vm2731_vm0, %v5606_v60 }
 0x1ce   : > { %v7874_v0 = vadd.f32 %v3335_v43, %v3047_v51  ;;  %v3337_v16 = vpop.f32.mrf.mxu1  ;;  %v626_v28 = vld [vmem:[%s8782_s1 + $0x478] sm:$0xff] }
 0x1cf   : > { %v3049_v35 = vpop.f32.mrf.mxu0  ;;  %v5614_v39 = vcombine.high %v622_v5, %v626_v28 }
 0x1d0   : > { %8817 = vst [vmem:[#allocation8_spill] sm:$0xff] %v7874_v0  ;;  %v3050_v36 = vadd.f32 %v3049_v35, %v8818_v37  ;;  %v3338_v20 = vpop.f32.mrf.mxu1 }
 0x1d1   : > { %v3051_v60 = vpop.f32.mrf.mxu0 }
 0x1d2   : > { %v7883_v43 = vadd.f32 %v3338_v20, %v3050_v36  ;;  %v3340_v50 = vpop.f32.mrf.mxu1  ;;  %v5613_v20 = vcombine.low %v622_v5, %v626_v28  ;;  %v638_v28 = vld [vmem:[%s8782_s1 + $0x4d8] sm:$0xff] }
 0x1d3   : > { %v3054_v26 = vpop.f32.mrf.mxu0  ;;  %3567 = vmatmul.mubr.bf16.gmra.mxu0 %v5603_v3  ;;  %v5611_v3 = vcombine.low %v621_v54, %v625_v7  ;;  %v641_v54 = vld [vmem:[%s8782_s1 + $0x4f0] sm:$0xff] }
 0x1d4   : > { %8819 = vst [vmem:[#allocation4_spill] sm:$0xff] %v7883_v43  ;;  %v3055_v51 = vadd.f32 %v3054_v26, %v7652_v4  ;;  %v3343_v16 = vpop.f32.mrf.mxu1  ;;  %3856 = vmatmul.mubr.bf16.gmra.mxu1 %v5605_v15  ;;  %3574 = vmatprep.mubr.bf16.mxu0 %v5612_v34  ;;  %v630_v4 = vld [vmem:[%s8782_s1 + $0x498] sm:$0xff]  ;;  %v5620_v15 = vcombine.high %v629_v6, %v633_v52 }
 0x1d5   : > { %v3056_v0 = vpop.f32.mrf.mxu0  ;;  %5804 = vmatprep.mubr.msk.bf16.mxu1 %vm2731_vm0, %v5614_v39 }
 0x1d6   : > { %v7893_v24 = vadd.f32 %v3343_v16, %v3055_v51  ;;  %v3345_v8 = vpop.f32.mrf.mxu1  ;;  %v634_v0 = vld [vmem:[%s8782_s1 + $0x4b8] sm:$0xff] }
 0x1d7   : > { %v3057_v35 = vpop.f32.mrf.mxu0  ;;  %v5622_v60 = vcombine.high %v630_v4, %v634_v0  ;;  %v8822_v51 = vld [vmem:[#allocation17_spill] sm:$0xff] }
 0x1d8   : > { %8820 = vst [vmem:[#allocation5_spill] sm:$0xff] %v7893_v24  ;;  %v3058_v37 = vadd.f32 %v3057_v35, %v7676_v22  ;;  %v3346_v36 = vpop.f32.mrf.mxu1  ;;  %v637_v22 = vld [vmem:[%s8782_s1 + $0x4d0] sm:$0xff] }
 0x1d9   : > { %v3059_v34 = vpop.f32.mrf.mxu0 }
 0x1da   : > { %v7902_v39 = vadd.f32 %v3346_v36, %v3058_v37  ;;  %v3348_v50 = vpop.f32.mrf.mxu1  ;;  %v8824_v37 = vld [vmem:[#allocation18_spill] sm:$0xff]  ;;  %v5628_v34 = vcombine.high %v637_v22, %v641_v54 }
 0x1db   : > { %v3062_v26 = vpop.f32.mrf.mxu0  ;;  %3575 = vmatmul.mubr.bf16.gmra.mxu0 %v5611_v3  ;;  %v5619_v3 = vcombine.low %v629_v6, %v633_v52  ;;  %v645_v6 = vld [vmem:[%s8782_s1 + $0x510] sm:$0xff] }
 0x1dc   : > { %8821 = vst [vmem:[#allocation26_spill] sm:$0xff] %v7902_v39  ;;  %v3063_v16 = vadd.f32 %v3062_v26, %v8822_v51  ;;  %v3351_v8 = vpop.f32.mrf.mxu1  ;;  %3864 = vmatmul.mubr.bf16.gmra.mxu1 %v5613_v20  ;;  %3582 = vmatprep.mubr.bf16.mxu0 %v5620_v15  ;;  %v5621_v15 = vcombine.low %v630_v4, %v634_v0  ;;  %v649_v52 = vld [vmem:[%s8782_s1 + $0x530] sm:$0xff] }
 0x1dd   : > { %v3064_v24 = vpop.f32.mrf.mxu0  ;;  %5805 = vmatprep.mubr.msk.bf16.mxu1 %vm2731_vm0, %v5622_v60 }
 0x1de   : > { %v7912_v7 = vadd.f32 %v3351_v8, %v3063_v16  ;;  %v3353_v5 = vpop.f32.mrf.mxu1  ;;  %v642_v24 = vld [vmem:[%s8782_s1 + $0x4f8] sm:$0xff]  ;;  %v8826_v8 = vld [vmem:[#allocation15_spill] sm:$0xff] }
 0x1df   : > { %v3065_v35 = vpop.f32.mrf.mxu0  ;;  %v5630_v50 = vcombine.high %v638_v28, %v642_v24 }
 0x1e0   : > { %8823 = vst [vmem:[#allocation17_spill] sm:$0xff] %v7912_v7  ;;  %v3066_v36 = vadd.f32 %v3065_v35, %v8824_v37  ;;  %v3354_v20 = vpop.f32.mrf.mxu1  ;;  %v646_v35 = vld [vmem:[%s8782_s1 + $0x518] sm:$0xff]  ;;  %v5627_v37 = vcombine.low %v637_v22, %v641_v54  ;;  %v653_v22 = vld [vmem:[%s8782_s1 + $0x550] sm:$0xff] }
 0x1e1   : > { %v3067_v60 = vpop.f32.mrf.mxu0  ;;  %v657_v54 = vld [vmem:[%s8782_s1 + $0x570] sm:$0xff] }
 0x1e2   : > { %v7921_v26 = vadd.f32 %v3354_v20, %v3066_v36  ;;  %v3356_v51 = vpop.f32.mrf.mxu1  ;;  %v8828_v36 = vld [vmem:[#allocation16_spill] sm:$0xff]  ;;  %v5636_v60 = vcombine.high %v645_v6, %v649_v52 }
 0x1e3   : > { %v3070_v16 = vpop.f32.mrf.mxu0  ;;  %3583 = vmatmul.mubr.bf16.gmra.mxu0 %v5619_v3 }
 0x1e4   : > { %8825 = vst [vmem:[#allocation18_spill] sm:$0xff] %v7921_v26  ;;  %v3071_v5 = vadd.f32 %v3070_v16, %v8826_v8  ;;  %v3359_v7 = vpop.f32.mrf.mxu1  ;;  %3872 = vmatmul.mubr.bf16.gmra.mxu1 %v5621_v15  ;;  %3590 = vmatprep.mubr.bf16.mxu0 %v5628_v34  ;;  %v5629_v34 = vcombine.low %v638_v28, %v642_v24 }
 0x1e5   : > { %v3072_v39 = vpop.f32.mrf.mxu0  ;;  %5806 = vmatprep.mubr.msk.bf16.mxu1 %vm2731_vm0, %v5630_v50 }
 0x1e6   : > { %v7931_v4 = vadd.f32 %v3359_v7, %v3071_v5  ;;  %v3361_v0 = vpop.f32.mrf.mxu1  ;;  %v650_v39 = vld [vmem:[%s8782_s1 + $0x538] sm:$0xff] }
 0x1e7   : > { %v3073_v3 = vpop.f32.mrf.mxu0  ;;  %v5638_v51 = vcombine.high %v646_v35, %v650_v39  ;;  %v8830_v5 = vld [vmem:[#allocation13_spill] sm:$0xff] }
 0x1e8   : > { %8827 = vst [vmem:[#allocation15_spill] sm:$0xff] %v7931_v4  ;;  %v3074_v20 = vadd.f32 %v3073_v3, %v8828_v36  ;;  %v3362_v15 = vpop.f32.mrf.mxu1  ;;  %v654_v3 = vld [vmem:[%s8782_s1 + $0x558] sm:$0xff]  ;;  %v5635_v36 = vcombine.low %v645_v6, %v649_v52  ;;  %v661_v6 = vld [vmem:[%s8782_s1 + $0x590] sm:$0xff] }
 0x1e9   : > { %v3075_v50 = vpop.f32.mrf.mxu0  ;;  %v665_v52 = vld [vmem:[%s8782_s1 + $0x5b0] sm:$0xff] }
 0x1ea   : > { %v7940_v7 = vadd.f32 %v3362_v15, %v3074_v20  ;;  %v3364_v16 = vpop.f32.mrf.mxu1  ;;  %v8832_v20 = vld [vmem:[#allocation14_spill] sm:$0xff]  ;;  %v5644_v50 = vcombine.high %v653_v22, %v657_v54 }
 0x1eb   : > { %v3078_v8 = vpop.f32.mrf.mxu0  ;;  %3591 = vmatmul.mubr.bf16.gmra.mxu0 %v5627_v37 }
 0x1ec   : > { %8829 = vst [vmem:[#allocation16_spill] sm:$0xff] %v7940_v7  ;;  %v3079_v0 = vadd.f32 %v3078_v8, %v8830_v5  ;;  %v3367_v4 = vpop.f32.mrf.mxu1  ;;  %3880 = vmatmul.mubr.bf16.gmra.mxu1 %v5629_v34  ;;  %3598 = vmatprep.mubr.bf16.mxu0 %v5636_v60  ;;  %v5637_v60 = vcombine.low %v646_v35, %v650_v39 }
 0x1ed   : > { %v3080_v26 = vpop.f32.mrf.mxu0  ;;  %5807 = vmatprep.mubr.msk.bf16.mxu1 %vm2731_vm0, %v5638_v51 }
 0x1ee   : > { %v7950_v28 = vadd.f32 %v3367_v4, %v3079_v0  ;;  %v3369_v24 = vpop.f32.mrf.mxu1  ;;  %v658_v26 = vld [vmem:[%s8782_s1 + $0x578] sm:$0xff]  ;;  %v8834_v0 = vld [vmem:[#allocation11_spill] sm:$0xff] }
 0x1ef   : > { %v3081_v37 = vpop.f32.mrf.mxu0  ;;  %v5646_v16 = vcombine.high %v654_v3, %v658_v26 }
 0x1f0   : > { %8831 = vst [vmem:[#allocation13_spill] sm:$0xff] %v7950_v28  ;;  %v3082_v15 = vadd.f32 %v3081_v37, %v8832_v20  ;;  %v3370_v34 = vpop.f32.mrf.mxu1  ;;  %v662_v37 = vld [vmem:[%s8782_s1 + $0x598] sm:$0xff]  ;;  %v5643_v20 = vcombine.low %v653_v22, %v657_v54  ;;  %v669_v22 = vld [vmem:[%s8782_s1 + $0x5d0] sm:$0xff] }
 0x1f1   : > { %v3083_v51 = vpop.f32.mrf.mxu0  ;;  %v673_v54 = vld [vmem:[%s8782_s1 + $0x5f0] sm:$0xff] }
 0x1f2   : > { %v7959_v4 = vadd.f32 %v3370_v34, %v3082_v15  ;;  %v3372_v8 = vpop.f32.mrf.mxu1  ;;  %v8836_v15 = vld [vmem:[#allocation12_spill] sm:$0xff]  ;;  %v5652_v51 = vcombine.high %v661_v6, %v665_v52 }
 0x1f3   : > { %v3086_v5 = vpop.f32.mrf.mxu0  ;;  %3599 = vmatmul.mubr.bf16.gmra.mxu0 %v5635_v36 }
 0x1f4   : > { %8833 = vst [vmem:[#allocation14_spill] sm:$0xff] %v7959_v4  ;;  %v3087_v24 = vadd.f32 %v3086_v5, %v8834_v0  ;;  %v3375_v28 = vpop.f32.mrf.mxu1  ;;  %3888 = vmatmul.mubr.bf16.gmra.mxu1 %v5637_v60  ;;  %3606 = vmatprep.mubr.bf16.mxu0 %v5644_v50  ;;  %v5645_v50 = vcombine.low %v654_v3, %v658_v26 }
 0x1f5   : > { %v3088_v7 = vpop.f32.mrf.mxu0  ;;  %5808 = vmatprep.mubr.msk.bf16.mxu1 %vm2731_vm0, %v5646_v16 }
 0x1f6   : > { %v7969_v35 = vadd.f32 %v3375_v28, %v3087_v24  ;;  %v3377_v39 = vpop.f32.mrf.mxu1  ;;  %v666_v7 = vld [vmem:[%s8782_s1 + $0x5b8] sm:$0xff] }
 0x1f7   : > { %v3089_v36 = vpop.f32.mrf.mxu0  ;;  %v5654_v8 = vcombine.high %v662_v37, %v666_v7  ;;  %v8838_v24 = vld [vmem:[#allocation9_spill] sm:$0xff] }
 0x1f8   : > { %8835 = vst [vmem:[#allocation11_spill] sm:$0xff] %v7969_v35  ;;  %v3090_v34 = vadd.f32 %v3089_v36, %v8836_v15  ;;  %v3378_v60 = vpop.f32.mrf.mxu1  ;;  %v670_v36 = vld [vmem:[%s8782_s1 + $0x5d8] sm:$0xff]  ;;  %v5651_v15 = vcombine.low %v661_v6, %v665_v52  ;;  %v677_v6 = vld [vmem:[%s8782_s1 + $0x610] sm:$0xff] }
 0x1f9   : > { %v3091_v16 = vpop.f32.mrf.mxu0  ;;  %v681_v52 = vld [vmem:[%s8782_s1 + $0x630] sm:$0xff] }
 0x1fa   : > { %v7978_v28 = vadd.f32 %v3378_v60, %v3090_v34  ;;  %v3380_v5 = vpop.f32.mrf.mxu1  ;;  %v8840_v34 = vld [vmem:[#allocation10_spill] sm:$0xff]  ;;  %v5660_v16 = vcombine.high %v669_v22, %v673_v54 }
 0x1fb   : > { %v3094_v0 = vpop.f32.mrf.mxu0  ;;  %3607 = vmatmul.mubr.bf16.gmra.mxu0 %v5643_v20 }
 0x1fc   : > { %8837 = vst [vmem:[#allocation12_spill] sm:$0xff] %v7978_v28  ;;  %v3095_v39 = vadd.f32 %v3094_v0, %v8838_v24  ;;  %v3383_v35 = vpop.f32.mrf.mxu1  ;;  %3896 = vmatmul.mubr.bf16.gmra.mxu1 %v5645_v50  ;;  %3614 = vmatprep.mubr.bf16.mxu0 %v5652_v51  ;;  %v5653_v51 = vcombine.low %v662_v37, %v666_v7 }
 0x1fd   : > { %v3096_v4 = vpop.f32.mrf.mxu0  ;;  %5809 = vmatprep.mubr.msk.bf16.mxu1 %vm2731_vm0, %v5654_v8 }
 0x1fe   : > { %v7988_v3 = vadd.f32 %v3383_v35, %v3095_v39  ;;  %v3385_v26 = vpop.f32.mrf.mxu1  ;;  %v674_v4 = vld [vmem:[%s8782_s1 + $0x5f8] sm:$0xff]  ;;  %v8842_v39 = vld [vmem:[#allocation6_spill] sm:$0xff] }
 0x1ff   : > { %v3097_v20 = vpop.f32.mrf.mxu0  ;;  %v5662_v5 = vcombine.high %v670_v36, %v674_v4 }
 0x200   : > { %8839 = vst [vmem:[#allocation9_spill] sm:$0xff] %v7988_v3  ;;  %v3098_v60 = vadd.f32 %v3097_v20, %v8840_v34  ;;  %v3386_v50 = vpop.f32.mrf.mxu1  ;;  %v678_v20 = vld [vmem:[%s8782_s1 + $0x618] sm:$0xff]  ;;  %v5659_v34 = vcombine.low %v669_v22, %v673_v54  ;;  %v685_v22 = vld [vmem:[%s8782_s1 + $0x650] sm:$0xff] }
 0x201   : > { %v3099_v8 = vpop.f32.mrf.mxu0  ;;  %v689_v54 = vld [vmem:[%s8782_s1 + $0x670] sm:$0xff] }
 0x202   : > { %v7997_v35 = vadd.f32 %v3386_v50, %v3098_v60  ;;  %v3388_v0 = vpop.f32.mrf.mxu1  ;;  %v8844_v60 = vld [vmem:[#allocation7_spill] sm:$0xff]  ;;  %v5668_v8 = vcombine.high %v677_v6, %v681_v52 }
 0x203   : > { %v3102_v24 = vpop.f32.mrf.mxu0  ;;  %3615 = vmatmul.mubr.bf16.gmra.mxu0 %v5651_v15 }
 0x204   : > { %8841 = vst [vmem:[#allocation10_spill] sm:$0xff] %v7997_v35  ;;  %v3103_v26 = vadd.f32 %v3102_v24, %v8842_v39  ;;  %v3391_v3 = vpop.f32.mrf.mxu1  ;;  %3904 = vmatmul.mubr.bf16.gmra.mxu1 %v5653_v51  ;;  %3622 = vmatprep.mubr.bf16.mxu0 %v5660_v16  ;;  %v5661_v16 = vcombine.low %v670_v36, %v674_v4 }
 0x205   : > { %v3104_v28 = vpop.f32.mrf.mxu0  ;;  %5810 = vmatprep.mubr.msk.bf16.mxu1 %vm2731_vm0, %v5662_v5 }
 0x206   : > { %v8007_v37 = vadd.f32 %v3391_v3, %v3103_v26  ;;  %v3393_v7 = vpop.f32.mrf.mxu1  ;;  %v682_v28 = vld [vmem:[%s8782_s1 + $0x638] sm:$0xff]  ;;  %v8846_v26 = vld [vmem:[#allocation2_spill] sm:$0xff] }
 0x207   : > { %v3105_v15 = vpop.f32.mrf.mxu0  ;;  %v5670_v0 = vcombine.high %v678_v20, %v682_v28 }
 0x208   : > { %8843 = vst [vmem:[#allocation6_spill] sm:$0xff] %v8007_v37  ;;  %v3106_v50 = vadd.f32 %v3105_v15, %v8844_v60  ;;  %v3394_v51 = vpop.f32.mrf.mxu1  ;;  %v686_v15 = vld [vmem:[%s8782_s1 + $0x658] sm:$0xff]  ;;  %v5667_v60 = vcombine.low %v677_v6, %v681_v52  ;;  %v693_v6 = vld [vmem:[%s8782_s1 + $0x690] sm:$0xff] }
 0x209   : > { %v3107_v5 = vpop.f32.mrf.mxu0  ;;  %v697_v52 = vld [vmem:[%s8782_s1 + $0x6b0] sm:$0xff] }
 0x20a   : > { %v8016_v3 = vadd.f32 %v3394_v51, %v3106_v50  ;;  %v3396_v24 = vpop.f32.mrf.mxu1  ;;  %v8848_v50 = vld [vmem:[#allocation3_spill] sm:$0xff]  ;;  %v5676_v5 = vcombine.high %v685_v22, %v689_v54 }
 0x20b   : > { %v3110_v39 = vpop.f32.mrf.mxu0  ;;  %3623 = vmatmul.mubr.bf16.gmra.mxu0 %v5659_v34 }
 0x20c   : > { %8845 = vst [vmem:[#allocation7_spill] sm:$0xff] %v8016_v3  ;;  %v3111_v7 = vadd.f32 %v3110_v39, %v8846_v26  ;;  %v3399_v37 = vpop.f32.mrf.mxu1  ;;  %3912 = vmatmul.mubr.bf16.gmra.mxu1 %v5661_v16  ;;  %3630 = vmatprep.mubr.bf16.mxu0 %v5668_v8  ;;  %v5669_v8 = vcombine.low %v678_v20, %v682_v28 }
 0x20d   : > { %v3112_v35 = vpop.f32.mrf.mxu0  ;;  %5811 = vmatprep.mubr.msk.bf16.mxu1 %vm2731_vm0, %v5670_v0 }
 0x20e   : > { %v8026_v36 = vadd.f32 %v3399_v37, %v3111_v7  ;;  %v3401_v4 = vpop.f32.mrf.mxu1  ;;  %v690_v35 = vld [vmem:[%s8782_s1 + $0x678] sm:$0xff]  ;;  %v8850_v7 = vld [vmem:[#allocation19_spill] sm:$0xff] }
 0x20f   : > { %v3113_v34 = vpop.f32.mrf.mxu0  ;;  %v5678_v24 = vcombine.high %v686_v15, %v690_v35 }
 0x210   : > { %8847 = vst [vmem:[#allocation2_spill] sm:$0xff] %v8026_v36  ;;  %v3114_v51 = vadd.f32 %v3113_v34, %v8848_v50  ;;  %v3402_v16 = vpop.f32.mrf.mxu1  ;;  %v694_v34 = vld [vmem:[%s8782_s1 + $0x698] sm:$0xff]  ;;  %v5675_v50 = vcombine.low %v685_v22, %v689_v54  ;;  %v705_v22 = vld [vmem:[%s8782_s1 + $0x6f0] sm:$0xff] }
 0x211   : > { %v3115_v0 = vpop.f32.mrf.mxu0 }
 0x212   : > { %v8035_v37 = vadd.f32 %v3402_v16, %v3114_v51  ;;  %v3404_v39 = vpop.f32.mrf.mxu1 }
 0x213   : > { %v3440_v26 = vpop.f32.mrf.mxu0  ;;  %3631 = vmatmul.mubr.bf16.gmra.mxu0 %v5667_v60 }
 0x214   : > { %8849 = vst [vmem:[#allocation3_spill] sm:$0xff] %v8035_v37  ;;  %v3441_v4 = vadd.f32 %v3440_v26, %v8850_v7  ;;  %v3729_v36 = vpop.f32.mrf.mxu1  ;;  %3920 = vmatmul.mubr.bf16.gmra.mxu1 %v5669_v8  ;;  %3638 = vmatprep.mubr.bf16.mxu0 %v5676_v5  ;;  %v5677_v8 = vcombine.low %v686_v15, %v690_v35 }
 0x215   : > { %v3442_v3 = vpop.f32.mrf.mxu0  ;;  %5812 = vmatprep.mubr.msk.bf16.mxu1 %vm2731_vm0, %v5678_v24  ;;  %v5684_v5 = vcombine.high %v693_v6, %v697_v52 }
 0x216   : > { %v3730_v20 = vadd.f32 %v3729_v36, %v3441_v4  ;;  %v3731_v28 = vpop.f32.mrf.mxu1  ;;  %v698_v3 = vld [vmem:[%s8782_s1 + $0x6b8] sm:$0xff] }
 0x217   : > { %v3443_v60 = vpop.f32.mrf.mxu0  ;;  %v5686_v24 = vcombine.high %v694_v34, %v698_v3 }
 0x218   : > { %v3444_v51 = vadd.f32 %v3443_v60, %v7303_v55  ;;  %v3732_v16 = vpop.f32.mrf.mxu1  ;;  %v3984_v7 = vmax.f32 %v3730_v20, 0.0  ;;  %v701_v55 = vld [vmem:[%s8782_s1 + $0x6d0] sm:$0xff]  ;;  %v5683_v60 = vcombine.low %v693_v6, %v697_v52 }
 0x219   : > { %v3445_v0 = vpop.f32.mrf.mxu0  ;;  %v713_v6 = vld [vmem:[%s8782_s1 + $0x730] sm:$0xff] }
 0x21a   : > { %v3733_v39 = vadd.f32 %v3732_v16, %v3444_v51  ;;  %v3734_v36 = vpop.f32.mrf.mxu1  ;;  %v5685_v16 = vcombine.low %v694_v34, %v698_v3 }
 0x21b   : > { %v3448_v26 = vpop.f32.mrf.mxu0  ;;  %3639 = vmatmul.mubr.bf16.gmra.mxu0 %v5675_v50 }
 0x21c   : > { %v3985_v4 = vmax.f32 %v3733_v39, 0.0  ;;  %v3449_v28 = vadd.f32 %v3448_v26, %v7312_v2  ;;  %v3737_v37 = vpop.f32.mrf.mxu1  ;;  %3928 = vmatmul.mubr.bf16.gmra.mxu1 %v5677_v8  ;;  %3646 = vmatprep.mubr.bf16.mxu0 %v5684_v5  ;;  %v702_v2 = vld [vmem:[%s8782_s1 + $0x6d8] sm:$0xff]  ;;  %v5692_v8 = vcombine.high %v701_v55, %v705_v22 }
 0x21d   : > { %v3450_v43 = vpop.f32.mrf.mxu0  ;;  %5813 = vmatprep.mubr.msk.bf16.mxu1 %vm2731_vm0, %v5686_v24 }
 0x21e   : > { %v8060_v54 = vpack.c.bf16 %v3985_v4, %v3984_v7  ;;  %v3738_v15 = vadd.f32 %v3737_v37, %v3449_v28  ;;  %v3739_v35 = vpop.f32.mrf.mxu1  ;;  %v706_v43 = vld [vmem:[%s8782_s1 + $0x6f8] sm:$0xff] }
 0x21f   : > { %v3451_v20 = vpop.f32.mrf.mxu0  ;;  %v5694_v0 = vcombine.high %v702_v2, %v706_v43 }
 0x220   : > { %v3452_v50 = vadd.f32 %v3451_v20, %v7321_v45  ;;  %v3740_v51 = vpop.f32.mrf.mxu1  ;;  %v3986_v36 = vmax.f32 %v3738_v15, 0.0  ;;  %v709_v45 = vld [vmem:[%s8782_s1 + $0x710] sm:$0xff]  ;;  %v714_v15 = vld [vmem:[%s8782_s1 + $0x738] sm:$0xff]  ;;  %v5691_v20 = vcombine.low %v701_v55, %v705_v22 }
 0x221   : > { %v3453_v5 = vpop.f32.mrf.mxu0  ;;  %v721_v55 = vld [vmem:[%s8782_s1 + $0x770] sm:$0xff] }
 0x222   : > { %v3741_v24 = vadd.f32 %v3740_v51, %v3452_v50  ;;  %v3742_v37 = vpop.f32.mrf.mxu1  ;;  %v5693_v51 = vcombine.low %v702_v2, %v706_v43 }
 0x223   : > { %v3456_v39 = vpop.f32.mrf.mxu0  ;;  %3647 = vmatmul.mubr.bf16.gmra.mxu0 %v5683_v60 }
 0x224   : > { %v3987_v26 = vmax.f32 %v3741_v24, 0.0  ;;  %v3457_v7 = vadd.f32 %v3456_v39, %v7330_v18  ;;  %v3745_v4 = vpop.f32.mrf.mxu1  ;;  %3936 = vmatmul.mubr.bf16.gmra.mxu1 %v5685_v16  ;;  %3654 = vmatprep.mubr.bf16.mxu0 %v5692_v8  ;;  %v710_v18 = vld [vmem:[%s8782_s1 + $0x718] sm:$0xff]  ;;  %v5700_v16 = vcombine.high %v709_v45, %v713_v6 }
 0x225   : > { %v3458_v28 = vpop.f32.mrf.mxu0  ;;  %5814 = vmatprep.mubr.msk.bf16.mxu1 %vm2731_vm0, %v5694_v0  ;;  %v5702_v5 = vcombine.high %v710_v18, %v714_v15 }
 0x226   : > { %v8077_v52 = vpack.c.bf16 %v3987_v26, %v3986_v36  ;;  %v3746_v34 = vadd.f32 %v3745_v4, %v3457_v7  ;;  %v3747_v3 = vpop.f32.mrf.mxu1  ;;  %v722_v28 = vld [vmem:[%s8782_s1 + $0x778] sm:$0xff] }
 0x227   : > { %v3459_v35 = vpop.f32.mrf.mxu0  ;;  %v5699_v3 = vcombine.low %v709_v45, %v713_v6  ;;  %v729_v45 = vld [vmem:[%s8782_s1 + $0x7b0] sm:$0xff] }
 0x228   : > { %v3460_v60 = vadd.f32 %v3459_v35, %v7339_v10  ;;  %v3748_v50 = vpop.f32.mrf.mxu1  ;;  %v3988_v39 = vmax.f32 %v3746_v34, 0.0  ;;  %v717_v10 = vld [vmem:[%s8782_s1 + $0x750] sm:$0xff] }
 0x229   : > { %v3461_v8 = vpop.f32.mrf.mxu0 }
 0x22a   : > { %v3749_v0 = vadd.f32 %v3748_v50, %v3460_v60  ;;  %v3750_v24 = vpop.f32.mrf.mxu1  ;;  %v5701_v60 = vcombine.low %v710_v18, %v714_v15  ;;  %v5708_v50 = vcombine.high %v717_v10, %v721_v55 }
 0x22b   : > { %v3464_v37 = vpop.f32.mrf.mxu0  ;;  %3655 = vmatmul.mubr.bf16.gmra.mxu0 %v5691_v20 }
 0x22c   : > { %v3989_v36 = vmax.f32 %v3749_v0, 0.0  ;;  %v3465_v26 = vadd.f32 %v3464_v37, %v7348_v40  ;;  %v3753_v7 = vpop.f32.mrf.mxu1  ;;  %3944 = vmatmul.mubr.bf16.gmra.mxu1 %v5693_v51  ;;  %3662 = vmatprep.mubr.bf16.mxu0 %v5700_v16  ;;  %v718_v40 = vld [vmem:[%s8782_s1 + $0x758] sm:$0xff] }
 0x22d   : > { %v3466_v4 = vpop.f32.mrf.mxu0  ;;  %5815 = vmatprep.mubr.msk.bf16.mxu1 %vm2731_vm0, %v5702_v5  ;;  %v5710_v16 = vcombine.high %v718_v40, %v722_v28 }
 0x22e   : > { %v8094_v22 = vpack.c.bf16 %v3989_v36, %v3988_v39  ;;  %v3754_v2 = vadd.f32 %v3753_v7, %v3465_v26  ;;  %v3755_v43 = vpop.f32.mrf.mxu1  ;;  %v730_v7 = vld [vmem:[%s8782_s1 + $0x7b8] sm:$0xff] }
 0x22f   : > { %v3467_v34 = vpop.f32.mrf.mxu0 }
 0x230   : > { %v3468_v35 = vadd.f32 %v3467_v34, %v7357_v32  ;;  %v3756_v20 = vpop.f32.mrf.mxu1  ;;  %v3990_v24 = vmax.f32 %v3754_v2, 0.0  ;;  %v725_v32 = vld [vmem:[%s8782_s1 + $0x790] sm:$0xff]  ;;  %v5707_v2 = vcombine.low %v717_v10, %v721_v55 }
 0x231   : > { %v3469_v51 = vpop.f32.mrf.mxu0  ;;  %v737_v10 = vld [vmem:[%s8782_s1 + $0x7f0] sm:$0xff] }
 0x232   : > { %v3757_v8 = vadd.f32 %v3756_v20, %v3468_v35  ;;  %v3758_v5 = vpop.f32.mrf.mxu1  ;;  %v5716_v35 = vcombine.high %v725_v32, %v729_v45 }
 0x233   : > { %v3472_v0 = vpop.f32.mrf.mxu0  ;;  %3663 = vmatmul.mubr.bf16.gmra.mxu0 %v5699_v3  ;;  %v5709_v3 = vcombine.low %v718_v40, %v722_v28 }
 0x234   : > { %v3991_v37 = vmax.f32 %v3757_v8, 0.0  ;;  %v3473_v39 = vadd.f32 %v3472_v0, %v7366_v17  ;;  %v3761_v36 = vpop.f32.mrf.mxu1  ;;  %3952 = vmatmul.mubr.bf16.gmra.mxu1 %v5701_v60  ;;  %3670 = vmatprep.mubr.bf16.mxu0 %v5708_v50  ;;  %v726_v17 = vld [vmem:[%s8782_s1 + $0x798] sm:$0xff] }
 0x235   : > { %v3474_v26 = vpop.f32.mrf.mxu0  ;;  %5816 = vmatprep.mubr.msk.bf16.mxu1 %vm2731_vm0, %v5710_v16  ;;  %v5718_v60 = vcombine.high %v726_v17, %v730_v7 }
 0x236   : > { %v8111_v6 = vpack.c.bf16 %v3991_v37, %v3990_v24  ;;  %v3762_v18 = vadd.f32 %v3761_v36, %v3473_v39  ;;  %v3763_v15 = vpop.f32.mrf.mxu1  ;;  %v738_v39 = vld [vmem:[%s8782_s1 + $0x7f8] sm:$0xff]  ;;  %v5715_v26 = vcombine.low %v725_v32, %v729_v45 }
 0x237   : > { %v3475_v4 = vpop.f32.mrf.mxu0 }
 0x238   : > { %v3476_v43 = vadd.f32 %v3475_v4, %v7375_v33  ;;  %v3764_v34 = vpop.f32.mrf.mxu1  ;;  %v3992_v8 = vmax.f32 %v3762_v18, 0.0  ;;  %v733_v33 = vld [vmem:[%s8782_s1 + $0x7d0] sm:$0xff]  ;;  %v5717_v4 = vcombine.low %v726_v17, %v730_v7 }
 0x239   : > { %v3477_v20 = vpop.f32.mrf.mxu0  ;;  %v5723_v7 = vcombine.low %v733_v33, %v737_v10 }
 0x23a   : > { %v3765_v50 = vadd.f32 %v3764_v34, %v3476_v43  ;;  %v3766_v51 = vpop.f32.mrf.mxu1 }
 0x23b   : > { %v3480_v16 = vpop.f32.mrf.mxu0  ;;  %3671 = vmatmul.mubr.bf16.gmra.mxu0 %v5707_v2  ;;  %v5724_v2 = vcombine.high %v733_v33, %v737_v10 }
 0x23c   : > { %v3993_v5 = vmax.f32 %v3765_v50, 0.0  ;;  %v3481_v0 = vadd.f32 %v3480_v16, %v7384_v57  ;;  %v3769_v24 = vpop.f32.mrf.mxu1  ;;  %3960 = vmatmul.mubr.bf16.gmra.mxu1 %v5709_v3  ;;  %3678 = vmatprep.mubr.bf16.mxu0 %v5716_v35  ;;  %v734_v57 = vld [vmem:[%s8782_s1 + $0x7d8] sm:$0xff] }
 0x23d   : > { %v3482_v37 = vpop.f32.mrf.mxu0  ;;  %5817 = vmatprep.mubr.msk.bf16.mxu1 %vm2731_vm0, %v5718_v60  ;;  %v5726_v34 = vcombine.high %v734_v57, %v738_v39 }
 0x23e   : > { %v8128_v55 = vpack.c.bf16 %v3993_v5, %v3992_v8  ;;  %v3770_v40 = vadd.f32 %v3769_v24, %v3481_v0  ;;  %v3771_v28 = vpop.f32.mrf.mxu1  ;;  %v5725_v24 = vcombine.low %v734_v57, %v738_v39 }
 0x23f   : > { %v3483_v36 = vpop.f32.mrf.mxu0 }
 0x240   : > { %v3484_v18 = vadd.f32 %v3483_v36, %v7393_v46  ;;  %v3772_v15 = vpop.f32.mrf.mxu1  ;;  %v3994_v60 = vmax.f32 %v3770_v40, 0.0 }
 0x241   : > { %v3485_v43 = vpop.f32.mrf.mxu0 }
 0x242   : > { %v3773_v3 = vadd.f32 %v3772_v15, %v3484_v18  ;;  %v3774_v35 = vpop.f32.mrf.mxu1 }
 0x243   : > { %v3488_v20 = vpop.f32.mrf.mxu0  ;;  %3679 = vmatmul.mubr.bf16.gmra.mxu0 %v5715_v26 }
 0x244   : > { %v3995_v50 = vmax.f32 %v3773_v3, 0.0  ;;  %v3489_v51 = vadd.f32 %v3488_v20, %v7402_v49  ;;  %v3777_v16 = vpop.f32.mrf.mxu1  ;;  %3968 = vmatmul.mubr.bf16.gmra.mxu1 %v5717_v4  ;;  %3686 = vmatprep.mubr.bf16.mxu0 %v5724_v2  ;;  %v6310_v49 = vld [vmem:[%s8784_s3 + $0x4] ss:$16 sps:$4 sm:$0xff]  }
 0x245   : > { %v3490_v8 = vpop.f32.mrf.mxu0  ;;  %5818 = vmatprep.mubr.msk.bf16.mxu1 %vm2731_vm0, %v5726_v34 }
 0x246   : > { %v8139_v46 = vpack.c.bf16 %v3995_v50, %v3994_v60  ;;  %v3778_v32 = vadd.f32 %v3777_v16, %v3489_v51  ;;  %v3779_v45 = vpop.f32.mrf.mxu1 }
 0x247   : > { %v3491_v17 = vpop.f32.mrf.mxu0 }
 0x248   : > { %v3492_v5 = vadd.f32 %v3491_v17, %v7411_v30  ;;  %v3780_v0 = vpop.f32.mrf.mxu1  ;;  %v3996_v26 = vmax.f32 %v3778_v32, 0.0 }
 0x249   : > { %v3493_v37 = vpop.f32.mrf.mxu0 }
 0x24a   : > { %v3781_v40 = vadd.f32 %v3780_v0, %v3492_v5  ;;  %v3782_v28 = vpop.f32.mrf.mxu1 }
 0x24b   : > { %v3496_v36 = vpop.f32.mrf.mxu0  ;;  %3687 = vmatmul.mubr.bf16.gmra.mxu0 %v5723_v7 }
 0x24c   : > { %v3997_v18 = vmax.f32 %v3781_v40, 0.0  ;;  %v3497_v15 = vadd.f32 %v3496_v36, %v7421_v29  ;;  %v3785_v4 = vpop.f32.mrf.mxu1  ;;  %3976 = vmatmul.mubr.bf16.gmra.mxu1 %v5725_v24  ;;  %4688 = vmatprep.mubr.bf16.mxu0 %v6310_v49 }
 0x24d   : > { %v3498_v33 = vpop.f32.mrf.mxu0 }
 0x24e   : > { %v8146_v30 = vpack.c.bf16 %v3997_v18, %v3996_v26  ;;  %v3786_v10 = vadd.f32 %v3785_v4, %v3497_v15  ;;  %v3787_v57 = vpop.f32.mrf.mxu1 }
 0x24f   : > { %v3499_v39 = vpop.f32.mrf.mxu0 }
 0x250   : > { %v3500_v2 = vadd.f32 %v3499_v39, %v7433_v13  ;;  %v3788_v43 = vpop.f32.mrf.mxu1  ;;  %v3998_v60 = vmax.f32 %v3786_v10, 0.0 }
 0x251   : > { %v3501_v34 = vpop.f32.mrf.mxu0 }
 0x252   : > { %v3789_v3 = vadd.f32 %v3788_v43, %v3500_v2  ;;  %v3790_v35 = vpop.f32.mrf.mxu1 }
 0x253   : > { %v3504_v20 = vpop.f32.mrf.mxu0 }
 0x254   : > { %v3999_v50 = vmax.f32 %v3789_v3, 0.0  ;;  %v3505_v29 = vadd.f32 %v3504_v20, %v7449_v44  ;;  %v3793_v51 = vpop.f32.mrf.mxu1 }
 0x255   : > { %v3506_v16 = vpop.f32.mrf.mxu0 }
 0x256   : > { %v8150_v8 = vpack.c.bf16 %v3999_v50, %v3998_v60  ;;  %v3794_v32 = vadd.f32 %v3793_v51, %v3505_v29  ;;  %v3795_v45 = vpop.f32.mrf.mxu1 }
 0x257   : > { %v3507_v17 = vpop.f32.mrf.mxu0 }
 0x258   : > { %v3508_v7 = vadd.f32 %v3507_v17, %v7464_v21  ;;  %v3796_v5 = vpop.f32.mrf.mxu1  ;;  %v4000_v37 = vmax.f32 %v3794_v32, 0.0 }
 0x259   : > { %v3509_v13 = vpop.f32.mrf.mxu0 }
 0x25a   : > { %v3797_v0 = vadd.f32 %v3796_v5, %v3508_v7  ;;  %v3798_v24 = vpop.f32.mrf.mxu1 }
 0x25b   : > { %v3512_v49 = vpop.f32.mrf.mxu0 }
 0x25c   : > { %v4001_v40 = vmax.f32 %v3797_v0, 0.0  ;;  %v3513_v28 = vadd.f32 %v3512_v49, %v7480_v25  ;;  %v3801_v36 = vpop.f32.mrf.mxu1 }
 0x25d   : > { %v3514_v44 = vpop.f32.mrf.mxu0 }
 0x25e   : > { %v8154_v26 = vpack.c.bf16 %v4001_v40, %v4000_v37  ;;  %v3802_v18 = vadd.f32 %v3801_v36, %v3513_v28  ;;  %v3803_v15 = vpop.f32.mrf.mxu1 }
 0x25f   : > { %v3515_v4 = vpop.f32.mrf.mxu0 }
 0x260   : > { %v3516_v33 = vadd.f32 %v3515_v4, %v7495_v27  ;;  %v3804_v10 = vpop.f32.mrf.mxu1  ;;  %v4002_v43 = vmax.f32 %v3802_v18, 0.0 }
 0x261   : > { %v3517_v21 = vpop.f32.mrf.mxu0 }
 0x262   : > { %v3805_v57 = vadd.f32 %v3804_v10, %v3516_v33  ;;  %v3806_v39 = vpop.f32.mrf.mxu1 }
 0x263   : > { %v3520_v2 = vpop.f32.mrf.mxu0 }
 0x264   : > { %v4003_v34 = vmax.f32 %v3805_v57, 0.0  ;;  %v3521_v3 = vadd.f32 %v3520_v2, %v7511_v48  ;;  %v3809_v35 = vpop.f32.mrf.mxu1 }
 0x265   : > { %v3522_v25 = vpop.f32.mrf.mxu0 }
 0x266   : > { %v8158_v20 = vpack.c.bf16 %v4003_v34, %v4002_v43  ;;  %v3811_v60 = vpop.f32.mrf.mxu1  ;;  %v3810_v29 = vadd.f32 %v3809_v35, %v3521_v3 }
 0x267   : > { %v3523_v50 = vpop.f32.mrf.mxu0 }
 0x268   : > { %v3524_v51 = vadd.f32 %v3523_v50, %v7526_v53  ;;  %v3812_v16 = vpop.f32.mrf.mxu1  ;;  %v4004_v7 = vmax.f32 %v3810_v29, 0.0 }
 0x269   : > { %v3525_v27 = vpop.f32.mrf.mxu0 }
 0x26a   : > { %v3813_v32 = vadd.f32 %v3812_v16, %v3524_v51  ;;  %v3814_v45 = vpop.f32.mrf.mxu1 }
 0x26b   : > { %v3528_v17 = vpop.f32.mrf.mxu0 }
 0x26c   : > { %v4005_v5 = vmax.f32 %v3813_v32, 0.0  ;;  %v3529_v13 = vadd.f32 %v3528_v17, %v7542_v23  ;;  %v3817_v0 = vpop.f32.mrf.mxu1 }
 0x26d   : > { %v3530_v48 = vpop.f32.mrf.mxu0 }
 0x26e   : > { %v8162_v24 = vpack.c.bf16 %v4005_v5, %v4004_v7  ;;  %v3819_v49 = vpop.f32.mrf.mxu1  ;;  %v3818_v40 = vadd.f32 %v3817_v0, %v3529_v13 }
 0x26f   : > { %v3531_v37 = vpop.f32.mrf.mxu0 }
 0x270   : > { %v3532_v28 = vadd.f32 %v3531_v37, %v7557_v1  ;;  %v3820_v36 = vpop.f32.mrf.mxu1  ;;  %v4006_v4 = vmax.f32 %v3818_v40, 0.0 }
 0x271   : > { %v3533_v53 = vpop.f32.mrf.mxu0 }
 0x272   : > { %v3821_v44 = vadd.f32 %v3820_v36, %v3532_v28  ;;  %v3822_v18 = vpop.f32.mrf.mxu1 }
 0x273   : > { %v3536_v15 = vpop.f32.mrf.mxu0 }
 0x274   : > { %v4007_v33 = vmax.f32 %v3821_v44, 0.0  ;;  %v3537_v10 = vadd.f32 %v3536_v15, %v7573_v56  ;;  %v3825_v21 = vpop.f32.mrf.mxu1 }
 0x275   : > { %v3538_v23 = vpop.f32.mrf.mxu0 }
 0x276   : > { %v8166_v57 = vpack.c.bf16 %v4007_v33, %v4006_v4  ;;  %v3827_v39 = vpop.f32.mrf.mxu1  ;;  %v3826_v43 = vadd.f32 %v3825_v21, %v3537_v10 }
 0x277   : > { %v3539_v2 = vpop.f32.mrf.mxu0 }
 0x278   : > { %v3540_v34 = vadd.f32 %v3539_v2, %v7588_v14  ;;  %v3828_v3 = vpop.f32.mrf.mxu1  ;;  %v4008_v50 = vmax.f32 %v3826_v43, 0.0  ;;  %v8851_v2 = vld [vmem:[#allocation20_spill] sm:$0xff] }
 0x279   : > { %v3541_v1 = vpop.f32.mrf.mxu0 }
 0x27a   : > { %v3829_v35 = vadd.f32 %v3828_v3, %v3540_v34  ;;  %v3830_v25 = vpop.f32.mrf.mxu1 }
 0x27b   : > { %v3544_v60 = vpop.f32.mrf.mxu0 }
 0x27c   : > { %v4009_v29 = vmax.f32 %v3829_v35, 0.0  ;;  %v3545_v51 = vadd.f32 %v3544_v60, %v7604_v31  ;;  %v3833_v16 = vpop.f32.mrf.mxu1  ;;  %v8852_v60 = vld [vmem:[#allocation21_spill] sm:$0xff] }
 0x27d   : > { %v3546_v56 = vpop.f32.mrf.mxu0 }
 0x27e   : > { %v8170_v27 = vpack.c.bf16 %v4009_v29, %v4008_v50  ;;  %v3835_v32 = vpop.f32.mrf.mxu1  ;;  %v3834_v17 = vadd.f32 %v3833_v16, %v3545_v51 }
 0x27f   : > { %v3547_v45 = vpop.f32.mrf.mxu0 }
 0x280   : > { %v3548_v7 = vadd.f32 %v3547_v45, %v7619_v12  ;;  %v3836_v5 = vpop.f32.mrf.mxu1  ;;  %v4010_v49 = vmax.f32 %v3834_v17, 0.0  ;;  %v8853_v17 = vld [vmem:[#allocation22_spill] sm:$0xff] }
 0x281   : > { %v3549_v14 = vpop.f32.mrf.mxu0 }
 0x282   : > { %v3837_v13 = vadd.f32 %v3836_v5, %v3548_v7  ;;  %v3838_v0 = vpop.f32.mrf.mxu1 }
 0x283   : > { %v3552_v48 = vpop.f32.mrf.mxu0 }
 0x284   : > { %v4011_v37 = vmax.f32 %v3837_v13, 0.0  ;;  %v3553_v40 = vadd.f32 %v3552_v48, %v7635_v11  ;;  %v3841_v28 = vpop.f32.mrf.mxu1 }
 0x285   : > { %v3554_v31 = vpop.f32.mrf.mxu0 }
 0x286   : > { %v4061_v36 = vpack.c.bf16 %v4011_v37, %v4010_v49  ;;  %v3843_v53 = vpop.f32.mrf.mxu1  ;;  %v3842_v18 = vadd.f32 %v3841_v28, %v3553_v40 }
 0x287   : > { %v3555_v44 = vpop.f32.mrf.mxu0 }
 0x288   : > { %v3556_v15 = vadd.f32 %v3555_v44, %v7650_v42  ;;  %v3844_v4 = vpop.f32.mrf.mxu1  ;;  %v4012_v23 = vmax.f32 %v3842_v18, 0.0 }
 0x289   : > { %v3557_v33 = vpop.f32.mrf.mxu0 }
 0x28a   : > { %v3845_v12 = vadd.f32 %v3844_v4, %v3556_v15  ;;  %v3846_v10 = vpop.f32.mrf.mxu1 }
 0x28b   : > { %v3560_v21 = vpop.f32.mrf.mxu0 }
 0x28c   : > { %v4013_v39 = vmax.f32 %v3845_v12, 0.0  ;;  %v3561_v43 = vadd.f32 %v3560_v21, %v8851_v2  ;;  %v3849_v34 = vpop.f32.mrf.mxu1 }
 0x28d   : > { %v3562_v3 = vpop.f32.mrf.mxu0 }
 0x28e   : > { %v4062_v11 = vpack.c.bf16 %v4013_v39, %v4012_v23  ;;  %v3851_v1 = vpop.f32.mrf.mxu1  ;;  %v3850_v25 = vadd.f32 %v3849_v34, %v3561_v43 }
 0x28f   : > { %v3563_v35 = vpop.f32.mrf.mxu0 }
 0x290   : > { %v3564_v50 = vadd.f32 %v3563_v35, %v8852_v60  ;;  %v3852_v29 = vpop.f32.mrf.mxu1  ;;  %v4014_v32 = vmax.f32 %v3850_v25, 0.0 }
 0x291   : > { %v3565_v51 = vpop.f32.mrf.mxu0 }
 0x292   : > { %v3853_v42 = vadd.f32 %v3852_v29, %v3564_v50  ;;  %v3854_v16 = vpop.f32.mrf.mxu1 }
 0x293   : > { %v3568_v56 = vpop.f32.mrf.mxu0 }
 0x294   : > { %v4015_v45 = vmax.f32 %v3853_v42, 0.0  ;;  %v3569_v7 = vadd.f32 %v3568_v56, %v8853_v17  ;;  %v3857_v5 = vpop.f32.mrf.mxu1 }
 0x295   : > { %v3570_v14 = vpop.f32.mrf.mxu0 }
 0x296   : > { %v4063_v13 = vpack.c.bf16 %v4015_v45, %v4014_v32  ;;  %v3858_v0 = vadd.f32 %v3857_v5, %v3569_v7  ;;  %v3859_v48 = vpop.f32.mrf.mxu1 }
 0x297   : > { %v3571_v49 = vpop.f32.mrf.mxu0 }
 0x298   : > { %v3572_v37 = vadd.f32 %v3571_v49, %v7714_v9  ;;  %v3860_v40 = vpop.f32.mrf.mxu1  ;;  %5901 = vmatprep.subr.bf16.mxu0 %v4063_v13  ;;  %v4016_v18 = vmax.f32 %v3858_v0, 0.0  ;;  %v8854_v0 = vld [vmem:[#allocation23_spill] sm:$0xff] }
 0x299   : > { %v3573_v28 = vpop.f32.mrf.mxu0  ;;  %5902 = vmatpush3.bf16.msra.mxu0 %v8150_v8 }
 0x29a   : > { %v3861_v31 = vadd.f32 %v3860_v40, %v3572_v37  ;;  %v3862_v53 = vpop.f32.mrf.mxu1  ;;  %5903 = vmatprep.subr.bf16.mxu0 %v4062_v11 }
 0x29b   : > { %v3576_v44 = vpop.f32.mrf.mxu0 }
 0x29c   : > { %v4017_v15 = vmax.f32 %v3861_v31, 0.0  ;;  %v3577_v4 = vadd.f32 %v3576_v44, %v7730_v58  ;;  %v3865_v33 = vpop.f32.mrf.mxu1 }
 0x29d   : > { %v3578_v12 = vpop.f32.mrf.mxu0  ;;  %5904 = vmatpush3.bf16.msra.mxu0 %v8146_v30 }
 0x29e   : > { %v8182_v10 = vpack.c.bf16 %v4017_v15, %v4016_v18  ;;  %v3866_v9 = vadd.f32 %v3865_v33, %v3577_v4  ;;  %v3867_v21 = vpop.f32.mrf.mxu1  ;;  %5905 = vmatprep.subr.bf16.mxu0 %v4061_v36 }
 0x29f   : > { %v3579_v23 = vpop.f32.mrf.mxu0 }
 0x2a0   : > { %v3580_v8 = vadd.f32 %v3579_v23, %v7745_v47  ;;  %v3868_v39 = vpop.f32.mrf.mxu1  ;;  %v4018_v3 = vmax.f32 %v3866_v9, 0.0  ;;  %v6311_v23 = vld [vmem:[%s8784_s3 + $0x20] ss:$16 sps:$4 sm:$0xff]  }
 0x2a1   : > { %v3581_v2 = vpop.f32.mrf.mxu0  ;;  %5906 = vmatpush3.bf16.msra.mxu0 %v8139_v46 }
 0x2a2   : > { %v3869_v43 = vadd.f32 %v3868_v39, %v3580_v8  ;;  %v3870_v34 = vpop.f32.mrf.mxu1  ;;  %5907 = vmatprep.subr.bf16.mxu0 %v8170_v27 }
 0x2a3   : > { %v3584_v58 = vpop.f32.mrf.mxu0 }
 0x2a4   : > { %v4019_v11 = vmax.f32 %v3869_v43, 0.0  ;;  %v3585_v30 = vadd.f32 %v3584_v58, %v7761_v61  ;;  %v3873_v1 = vpop.f32.mrf.mxu1  ;;  %v8855_v58 = vld [vmem:[#allocation24_spill] sm:$0xff] }
 0x2a5   : > { %v3586_v35 = vpop.f32.mrf.mxu0  ;;  %5908 = vmatpush3.bf16.msra.mxu0 %v8128_v55 }
 0x2a6   : > { %v8189_v36 = vpack.c.bf16 %v4019_v11, %v4018_v3  ;;  %v3874_v47 = vadd.f32 %v3873_v1, %v3585_v30  ;;  %v3875_v25 = vpop.f32.mrf.mxu1  ;;  %5909 = vmatprep.subr.bf16.mxu0 %v8166_v57 }
 0x2a7   : > { %v3587_v46 = vpop.f32.mrf.mxu0 }
 0x2a8   : > { %v3588_v60 = vadd.f32 %v3587_v46, %v7776_v41  ;;  %v3876_v50 = vpop.f32.mrf.mxu1  ;;  %v4020_v42 = vmax.f32 %v3874_v47, 0.0  ;;  %v8856_v46 = vld [vmem:[#allocation25_spill] sm:$0xff] }
 0x2a9   : > { %v3589_v27 = vpop.f32.mrf.mxu0  ;;  %5910 = vmatpush3.bf16.msra.mxu0 %v8111_v6 }
 0x2aa   : > { %v3877_v29 = vadd.f32 %v3876_v50, %v3588_v60  ;;  %v3878_v51 = vpop.f32.mrf.mxu1  ;;  %5911 = vmatprep.subr.bf16.mxu0 %v8162_v24  ;;  %v6314_v27 = vld [vmem:[%s8784_s3 + $0x40] ss:$16 sps:$4 sm:$0xff]  }
 0x2ab   : > { %v3592_v61 = vpop.f32.mrf.mxu0  ;;  %v6319_v51 = vld [vmem:[%s8784_s3 + $0x64] ss:$16 sps:$4 sm:$0xff]  }
 0x2ac   : > { %v4021_v55 = vmax.f32 %v3877_v29, 0.0  ;;  %v3593_v16 = vadd.f32 %v3592_v61, %v7792_v38  ;;  %v3881_v56 = vpop.f32.mrf.mxu1 }
 0x2ad   : > { %v3594_v32 = vpop.f32.mrf.mxu0  ;;  %5912 = vmatpush3.bf16.msra.mxu0 %v8094_v22 }
 0x2ae   : > { %v8197_v57 = vpack.c.bf16 %v4021_v55, %v4020_v42  ;;  %v3882_v41 = vadd.f32 %v3881_v56, %v3593_v16  ;;  %v3883_v45 = vpop.f32.mrf.mxu1  ;;  %5913 = vmatprep.subr.bf16.mxu0 %v8158_v20  ;;  %v6308_v20 = vld [vmem:[%s8784_s3] ss:$16 sps:$4 sm:$0xff]  }
 0x2af   : > { %v3595_v6 = vpop.f32.mrf.mxu0 }
 0x2b0   : > { %v3596_v17 = vadd.f32 %v3595_v6, %v7807_v59  ;;  %v3884_v7 = vpop.f32.mrf.mxu1  ;;  %v4022_v13 = vmax.f32 %v3882_v41, 0.0  ;;  %v6313_v59 = vld [vmem:[%s8784_s3 + $0x24] ss:$16 sps:$4 sm:$0xff]  }
 0x2b1   : > { %v3597_v24 = vpop.f32.mrf.mxu0  ;;  %5914 = vmatpush3.bf16.msra.mxu0 %v8077_v52  ;;  %v6358_v52 = vld [vmem:[%s8784_s3 + $0xc] ss:$16 sps:$4 sm:$0xff]  }
 0x2b2   : > { %v3885_v5 = vadd.f32 %v3884_v7, %v3596_v17  ;;  %v3886_v14 = vpop.f32.mrf.mxu1  ;;  %5915 = vmatprep.subr.bf16.mxu0 %v8154_v26  ;;  %4849 = vmatprep.mubr.bf16.mxu1 %v6358_v52 }
 0x2b3   : > { %v3600_v38 = vpop.f32.mrf.mxu0 }
 0x2b4   : > { %v4023_v22 = vmax.f32 %v3885_v5, 0.0  ;;  %v3601_v48 = vadd.f32 %v3600_v38, %v8854_v0  ;;  %v3889_v49 = vpop.f32.mrf.mxu1  ;;  %v8857_v5 = vld [vmem:[#allocation8_spill] sm:$0xff] }
 0x2b5   : > { %v3602_v37 = vpop.f32.mrf.mxu0  ;;  %5916 = vmatpush3.bf16.msra.mxu0 %v8060_v54 }
 0x2b6   : > { %v8214_v26 = vpack.c.bf16 %v4023_v22, %v4022_v13  ;;  %v3890_v40 = vadd.f32 %v3889_v49, %v3601_v48  ;;  %v3891_v28 = vpop.f32.mrf.mxu1  ;;  %v6317_v13 = vld [vmem:[%s8784_s3 + $0x60] ss:$16 sps:$4 sm:$0xff]  }
 0x2b7   : > { %v3603_v31 = vpop.f32.mrf.mxu0  ;;  %v8858_v37 = vld [vmem:[#allocation4_spill] sm:$0xff] }
 0x2b8   : > { %v3604_v53 = vadd.f32 %v3603_v31, %v7826_v63  ;;  %v3892_v44 = vpop.f32.mrf.mxu1  ;;  %4689 = vmatmul.mubr.bf16.vlgmr.msra.gmra.mxu0 %v6308_v20  ;;  %v4024_v33 = vmax.f32 %v3890_v40, 0.0  ;;  %v6316_v63 = vld [vmem:[%s8784_s3 + $0x44] ss:$16 sps:$4 sm:$0xff]  }
 0x2b9   : > { %v3605_v18 = vpop.f32.mrf.mxu0  ;;  %4696 = vmatprep.mubr.bf16.mxu0 %v6313_v59 }
 0x2ba   : > { %v3893_v54 = vadd.f32 %v3892_v44, %v3604_v53  ;;  %v3894_v15 = vpop.f32.mrf.mxu1 }
 0x2bb   : > { %v3608_v4 = vpop.f32.mrf.mxu0 }
 0x2bc   : > { %v4025_v12 = vmax.f32 %v3893_v54, 0.0  ;;  %v3609_v9 = vadd.f32 %v3608_v4, %v7836_v62  ;;  %v3897_v21 = vpop.f32.mrf.mxu1  ;;  %v8859_v54 = vld [vmem:[#allocation5_spill] sm:$0xff] }
 0x2bd   : > { %v3610_v8 = vpop.f32.mrf.mxu0 }
 0x2be   : > { %v8224_v39 = vpack.c.bf16 %v4025_v12, %v4024_v33  ;;  %v3898_v2 = vadd.f32 %v3897_v21, %v3609_v9  ;;  %v3899_v43 = vpop.f32.mrf.mxu1  ;;  %v6320_v33 = vld [vmem:[%s8784_s3 + $0x80] ss:$16 sps:$4 sm:$0xff]   ;;  %v6325_v9 = vld [vmem:[%s8784_s3 + $0xa4] ss:$16 sps:$4 sm:$0xff]  }
 0x2bf   : > { %v3611_v34 = vpop.f32.mrf.mxu0 }
 0x2c0   : > { %v3612_v3 = vadd.f32 %v3611_v34, %v8855_v58  ;;  %v3900_v11 = vpop.f32.mrf.mxu1  ;;  %4697 = vmatmul.mubr.bf16.gmra.mxu0 %v6311_v23  ;;  %v4026_v47 = vmax.f32 %v3898_v2, 0.0  ;;  %v8860_v2 = vld [vmem:[#allocation26_spill] sm:$0xff] }
 0x2c1   : > { %v3613_v62 = vpop.f32.mrf.mxu0  ;;  %4704 = vmatprep.mubr.bf16.mxu0 %v6316_v63 }
 0x2c2   : > { %v3901_v30 = vadd.f32 %v3900_v11, %v3612_v3  ;;  %v3902_v1 = vpop.f32.mrf.mxu1 }
 0x2c3   : > { %v3616_v35 = vpop.f32.mrf.mxu0 }
 0x2c4   : > { %v4027_v25 = vmax.f32 %v3901_v30, 0.0  ;;  %v3617_v60 = vadd.f32 %v3616_v35, %v8856_v46  ;;  %v3905_v50 = vpop.f32.mrf.mxu1  ;;  %v8861_v35 = vld [vmem:[#allocation17_spill] sm:$0xff]  ;;  %v6323_v46 = vld [vmem:[%s8784_s3 + $0xa0] ss:$16 sps:$4 sm:$0xff]  }
 0x2c5   : > { %v3618_v29 = vpop.f32.mrf.mxu0 }
 0x2c6   : > { %v8234_v61 = vpack.c.bf16 %v4027_v25, %v4026_v47  ;;  %v3906_v42 = vadd.f32 %v3905_v50, %v3617_v60  ;;  %v3907_v55 = vpop.f32.mrf.mxu1  ;;  %v6328_v50 = vld [vmem:[%s8784_s3 + $0xc4] ss:$16 sps:$4 sm:$0xff]  }
 0x2c7   : > { %v3619_v16 = vpop.f32.mrf.mxu0  ;;  %v8862_v55 = vld [vmem:[#allocation18_spill] sm:$0xff] }
 0x2c8   : > { %v3620_v56 = vadd.f32 %v3619_v16, %v7864_v19  ;;  %v3908_v32 = vpop.f32.mrf.mxu1  ;;  %4705 = vmatmul.mubr.bf16.gmra.mxu0 %v6314_v27  ;;  %v4028_v7 = vmax.f32 %v3906_v42, 0.0  ;;  %v6322_v19 = vld [vmem:[%s8784_s3 + $0x84] ss:$16 sps:$4 sm:$0xff]  }
 0x2c9   : > { %v3621_v41 = vpop.f32.mrf.mxu0  ;;  %4712 = vmatprep.mubr.bf16.mxu0 %v6319_v51 }
 0x2ca   : > { %v3909_v45 = vadd.f32 %v3908_v32, %v3620_v56  ;;  %v3910_v6 = vpop.f32.mrf.mxu1 }
 0x2cb   : > { %v3624_v17 = vpop.f32.mrf.mxu0 }
 0x2cc   : > { %v4029_v24 = vmax.f32 %v3909_v45, 0.0  ;;  %v3625_v14 = vadd.f32 %v3624_v17, %v8857_v5  ;;  %v3913_v38 = vpop.f32.mrf.mxu1 }
 0x2cd   : > { %v3626_v22 = vpop.f32.mrf.mxu0 }
 0x2ce   : > { %v8244_v0 = vpack.c.bf16 %v4029_v24, %v4028_v7  ;;  %v3914_v48 = vadd.f32 %v3913_v38, %v3625_v14  ;;  %v3915_v49 = vpop.f32.mrf.mxu1  ;;  %v8863_v24 = vld [vmem:[#allocation15_spill] sm:$0xff]  ;;  %v6326_v38 = vld [vmem:[%s8784_s3 + $0xc0] ss:$16 sps:$4 sm:$0xff]   ;;  %v6331_v22 = vld [vmem:[%s8784_s3 + $0xe4] ss:$16 sps:$4 sm:$0xff]  }
 0x2cf   : > { %v3627_v20 = vpop.f32.mrf.mxu0 }
 0x2d0   : > { %v3628_v59 = vadd.f32 %v3627_v20, %v8858_v37  ;;  %v3916_v52 = vpop.f32.mrf.mxu1  ;;  %4713 = vmatmul.mubr.bf16.gmra.mxu0 %v6317_v13  ;;  %v4030_v44 = vmax.f32 %v3914_v48, 0.0  ;;  %v8864_v37 = vld [vmem:[#allocation16_spill] sm:$0xff] }
 0x2d1   : > { %v3629_v40 = vpop.f32.mrf.mxu0  ;;  %4720 = vmatprep.mubr.bf16.mxu0 %v6322_v19 }
 0x2d2   : > { %v3917_v28 = vadd.f32 %v3916_v52, %v3628_v59  ;;  %v3918_v31 = vpop.f32.mrf.mxu1 }
 0x2d3   : > { %v3632_v53 = vpop.f32.mrf.mxu0 }
 0x2d4   : > { %v4031_v18 = vmax.f32 %v3917_v28, 0.0  ;;  %v3633_v15 = vadd.f32 %v3632_v53, %v8859_v54  ;;  %v3921_v4 = vpop.f32.mrf.mxu1  ;;  %v8865_v54 = vld [vmem:[#allocation13_spill] sm:$0xff] }
 0x2d5   : > { %v3634_v12 = vpop.f32.mrf.mxu0 }
 0x2d6   : > { %v8254_v21 = vpack.c.bf16 %v4031_v18, %v4030_v44  ;;  %v3922_v23 = vadd.f32 %v3921_v4, %v3633_v15  ;;  %v3923_v8 = vpop.f32.mrf.mxu1 }
 0x2d7   : > { %v3635_v63 = vpop.f32.mrf.mxu0 }
 0x2d8   : > { %v3636_v43 = vadd.f32 %v3635_v63, %v8860_v2  ;;  %v3924_v34 = vpop.f32.mrf.mxu1  ;;  %4721 = vmatmul.mubr.bf16.gmra.mxu0 %v6320_v33  ;;  %v4032_v30 = vmax.f32 %v3922_v23, 0.0  ;;  %v6329_v33 = vld [vmem:[%s8784_s3 + $0xe0] ss:$16 sps:$4 sm:$0xff]  }
 0x2d9   : > { %v3637_v58 = vpop.f32.mrf.mxu0  ;;  %4728 = vmatprep.mubr.bf16.mxu0 %v6325_v9  ;;  %v6334_v9 = vld [vmem:[%s8784_s3 + $0x104] ss:$16 sps:$4 sm:$0xff]  }
 0x2da   : > { %v3925_v3 = vadd.f32 %v3924_v34, %v3636_v43  ;;  %v3926_v11 = vpop.f32.mrf.mxu1  ;;  %v8866_v43 = vld [vmem:[#allocation14_spill] sm:$0xff] }
 0x2db   : > { %v3640_v62 = vpop.f32.mrf.mxu0 }
 0x2dc   : > { %v4033_v1 = vmax.f32 %v3925_v3, 0.0  ;;  %v3641_v47 = vadd.f32 %v3640_v62, %v8861_v35  ;;  %v3929_v25 = vpop.f32.mrf.mxu1 }
 0x2dd   : > { %v3642_v60 = vpop.f32.mrf.mxu0 }
 0x2de   : > { %v8264_v27 = vpack.c.bf16 %v4033_v1, %v4032_v30  ;;  %v3930_v29 = vadd.f32 %v3929_v25, %v3641_v47  ;;  %v3931_v51 = vpop.f32.mrf.mxu1  ;;  %v8867_v47 = vld [vmem:[#allocation11_spill] sm:$0xff]  ;;  %v6332_v60 = vld [vmem:[%s8784_s3 + $0x100] ss:$16 sps:$4 sm:$0xff]  }
 0x2df   : > { %v3643_v42 = vpop.f32.mrf.mxu0 }
 0x2e0   : > { %v3644_v16 = vadd.f32 %v3643_v42, %v8862_v55  ;;  %v3932_v56 = vpop.f32.mrf.mxu1  ;;  %4729 = vmatmul.mubr.bf16.gmra.mxu0 %v6323_v46  ;;  %v4034_v17 = vmax.f32 %v3930_v29, 0.0  ;;  %v6337_v29 = vld [vmem:[%s8784_s3 + $0x124] ss:$16 sps:$4 sm:$0xff]  }
 0x2e1   : > { %v3645_v32 = vpop.f32.mrf.mxu0  ;;  %4736 = vmatprep.mubr.bf16.mxu0 %v6328_v50 }
 0x2e2   : > { %v3933_v41 = vadd.f32 %v3932_v56, %v3644_v16  ;;  %v3934_v45 = vpop.f32.mrf.mxu1  ;;  %v8868_v56 = vld [vmem:[#allocation12_spill] sm:$0xff] }
 0x2e3   : > { %v3648_v6 = vpop.f32.mrf.mxu0 }
 0x2e4   : > { %v4035_v7 = vmax.f32 %v3933_v41, 0.0  ;;  %v3649_v5 = vadd.f32 %v3648_v6, %v8863_v24  ;;  %v3937_v14 = vpop.f32.mrf.mxu1 }
 0x2e5   : > { %v3650_v13 = vpop.f32.mrf.mxu0 }
 0x2e6   : > { %v8274_v19 = vpack.c.bf16 %v4035_v7, %v4034_v17  ;;  %v3939_v48 = vpop.f32.mrf.mxu1  ;;  %v3938_v20 = vadd.f32 %v3937_v14, %v3649_v5  ;;  %v8869_v14 = vld [vmem:[#allocation9_spill] sm:$0xff] }
 0x2e7   : > { %v3651_v49 = vpop.f32.mrf.mxu0 }
 0x2e8   : > { %v3652_v59 = vadd.f32 %v3651_v49, %v8864_v37  ;;  %v3940_v52 = vpop.f32.mrf.mxu1  ;;  %4737 = vmatmul.mubr.bf16.gmra.mxu0 %v6326_v38  ;;  %v4036_v44 = vmax.f32 %v3938_v20, 0.0  ;;  %v6340_v49 = vld [vmem:[%s8784_s3 + $0x144] ss:$16 sps:$4 sm:$0xff]  }
 0x2e9   : > { %v3653_v40 = vpop.f32.mrf.mxu0  ;;  %4744 = vmatprep.mubr.bf16.mxu0 %v6331_v22  ;;  %v6335_v22 = vld [vmem:[%s8784_s3 + $0x120] ss:$16 sps:$4 sm:$0xff]  }
 0x2ea   : > { %v3941_v28 = vadd.f32 %v3940_v52, %v3652_v59  ;;  %v3942_v31 = vpop.f32.mrf.mxu1  ;;  %v8870_v40 = vld [vmem:[#allocation10_spill] sm:$0xff] }
 0x2eb   : > { %v3656_v53 = vpop.f32.mrf.mxu0 }
 0x2ec   : > { %v4037_v18 = vmax.f32 %v3941_v28, 0.0  ;;  %v3657_v15 = vadd.f32 %v3656_v53, %v8865_v54  ;;  %v3945_v4 = vpop.f32.mrf.mxu1 }
 0x2ed   : > { %v3658_v12 = vpop.f32.mrf.mxu0 }
 0x2ee   : > { %v8284_v23 = vpack.c.bf16 %v4037_v18, %v4036_v44  ;;  %v3947_v8 = vpop.f32.mrf.mxu1  ;;  %v3946_v2 = vadd.f32 %v3945_v4, %v3657_v15 }
 0x2ef   : > { %v3659_v63 = vpop.f32.mrf.mxu0  ;;  %v6338_v8 = vld [vmem:[%s8784_s3 + $0x140] ss:$16 sps:$4 sm:$0xff]  }
 0x2f0   : > { %v3660_v34 = vadd.f32 %v3659_v63, %v8866_v43  ;;  %v3948_v58 = vpop.f32.mrf.mxu1  ;;  %4745 = vmatmul.mubr.bf16.gmra.mxu0 %v6329_v33  ;;  %v4038_v1 = vmax.f32 %v3946_v2, 0.0  ;;  %v8871_v33 = vld [vmem:[#allocation6_spill] sm:$0xff] }
 0x2f1   : > { %v3661_v3 = vpop.f32.mrf.mxu0  ;;  %4752 = vmatprep.mubr.bf16.mxu0 %v6334_v9  ;;  %v6343_v2 = vld [vmem:[%s8784_s3 + $0x164] ss:$16 sps:$4 sm:$0xff]  }
 0x2f2   : > { %v3949_v11 = vadd.f32 %v3948_v58, %v3660_v34  ;;  %v3950_v62 = vpop.f32.mrf.mxu1 }
 0x2f3   : > { %v3664_v30 = vpop.f32.mrf.mxu0 }
 0x2f4   : > { %v4039_v35 = vmax.f32 %v3949_v11, 0.0  ;;  %v3665_v25 = vadd.f32 %v3664_v30, %v8867_v47  ;;  %v3953_v46 = vpop.f32.mrf.mxu1  ;;  %v8872_v11 = vld [vmem:[#allocation7_spill] sm:$0xff] }
 0x2f5   : > { %v3666_v50 = vpop.f32.mrf.mxu0 }
 0x2f6   : > { %v8294_v51 = vpack.c.bf16 %v4039_v35, %v4038_v1  ;;  %v3955_v42 = vpop.f32.mrf.mxu1  ;;  %v3954_v16 = vadd.f32 %v3953_v46, %v3665_v25  ;;  %v8873_v50 = vld [vmem:[#allocation2_spill] sm:$0xff] }
 0x2f7   : > { %v3667_v55 = vpop.f32.mrf.mxu0 }
 0x2f8   : > { %v3668_v32 = vadd.f32 %v3667_v55, %v8868_v56  ;;  %v3956_v41 = vpop.f32.mrf.mxu1  ;;  %4753 = vmatmul.mubr.bf16.gmra.mxu0 %v6332_v60  ;;  %v4040_v24 = vmax.f32 %v3954_v16, 0.0  ;;  %v6341_v55 = vld [vmem:[%s8784_s3 + $0x160] ss:$16 sps:$4 sm:$0xff]   ;;  %v6346_v56 = vld [vmem:[%s8784_s3 + $0x184] ss:$16 sps:$4 sm:$0xff]  }
 0x2f9   : > { %v3669_v45 = vpop.f32.mrf.mxu0  ;;  %4760 = vmatprep.mubr.bf16.mxu0 %v6337_v29 }
 0x2fa   : > { %v3957_v6 = vadd.f32 %v3956_v41, %v3668_v32  ;;  %v3958_v17 = vpop.f32.mrf.mxu1 }
 0x2fb   : > { %v3672_v7 = vpop.f32.mrf.mxu0  ;;  %v8874_v17 = vld [vmem:[#allocation3_spill] sm:$0xff] }
 0x2fc   : > { %v4041_v5 = vmax.f32 %v3957_v6, 0.0  ;;  %v3673_v38 = vadd.f32 %v3672_v7, %v8869_v14  ;;  %v3961_v13 = vpop.f32.mrf.mxu1 }
 0x2fd   : > { %v3674_v48 = vpop.f32.mrf.mxu0 }
 0x2fe   : > { %v8304_v20 = vpack.c.bf16 %v4041_v5, %v4040_v24  ;;  %v3963_v37 = vpop.f32.mrf.mxu1  ;;  %v3962_v52 = vadd.f32 %v3961_v13, %v3673_v38  ;;  %v6344_v48 = vld [vmem:[%s8784_s3 + $0x180] ss:$16 sps:$4 sm:$0xff]  }
 0x2ff   : > { %v3675_v59 = vpop.f32.mrf.mxu0 }
 0x300   : > { %v3676_v28 = vadd.f32 %v3675_v59, %v8870_v40  ;;  %v3964_v31 = vpop.f32.mrf.mxu1  ;;  %4761 = vmatmul.mubr.bf16.gmra.mxu0 %v6335_v22  ;;  %v4042_v15 = vmax.f32 %v3962_v52, 0.0  ;;  %v6347_v59 = vld [vmem:[%s8784_s3 + $0x1a0] ss:$16 sps:$4 sm:$0xff]   ;;  %v6352_v52 = vld [vmem:[%s8784_s3 + $0x1c4] ss:$16 sps:$4 sm:$0xff]  }
 0x301   : > { %v3677_v53 = vpop.f32.mrf.mxu0  ;;  %4768 = vmatprep.mubr.bf16.mxu0 %v6340_v49  ;;  %v6349_v49 = vld [vmem:[%s8784_s3 + $0x1a4] ss:$16 sps:$4 sm:$0xff]   ;;  %v6371_v40 = vld [vmem:[%s8784_s3 + $0xa8] ss:$16 sps:$4 sm:$0xff]  }
 0x302   : > { %v3965_v44 = vadd.f32 %v3964_v31, %v3676_v28  ;;  %v3966_v18 = vpop.f32.mrf.mxu1  ;;  %v6376_v28 = vld [vmem:[%s8784_s3 + $0xcc] ss:$16 sps:$4 sm:$0xff]   ;;  %v6374_v31 = vld [vmem:[%s8784_s3 + $0xc8] ss:$16 sps:$4 sm:$0xff]  }
 0x303   : > { %v3680_v54 = vpop.f32.mrf.mxu0  ;;  %v6379_v53 = vld [vmem:[%s8784_s3 + $0xec] ss:$16 sps:$4 sm:$0xff]  }
 0x304   : > { %v4043_v4 = vmax.f32 %v3965_v44, 0.0  ;;  %v3681_v12 = vadd.f32 %v3680_v54, %v8871_v33  ;;  %v3969_v9 = vpop.f32.mrf.mxu1  ;;  %v6377_v44 = vld [vmem:[%s8784_s3 + $0xe8] ss:$16 sps:$4 sm:$0xff]   ;;  %v6382_v18 = vld [vmem:[%s8784_s3 + $0x10c] ss:$16 sps:$4 sm:$0xff]  }
 0x305   : > { %v3682_v63 = vpop.f32.mrf.mxu0  ;;  %v6380_v54 = vld [vmem:[%s8784_s3 + $0x108] ss:$16 sps:$4 sm:$0xff]  }
 0x306   : > { %v4077_v43 = vpack.c.bf16 %v4043_v4, %v4042_v15  ;;  %v3971_v34 = vpop.f32.mrf.mxu1  ;;  %v3970_v3 = vadd.f32 %v3969_v9, %v3681_v12  ;;  %v6385_v15 = vld [vmem:[%s8784_s3 + $0x12c] ss:$16 sps:$4 sm:$0xff]  }
 0x307   : > { %v3683_v58 = vpop.f32.mrf.mxu0  ;;  %v6388_v63 = vld [vmem:[%s8784_s3 + $0x14c] ss:$16 sps:$4 sm:$0xff]  }
 0x308   : > { %v3684_v62 = vadd.f32 %v3683_v58, %v8872_v11  ;;  %v3972_v30 = vpop.f32.mrf.mxu1  ;;  %4769 = vmatmul.mubr.bf16.gmra.mxu0 %v6338_v8  ;;  %v4044_v46 = vmax.f32 %v3970_v3, 0.0  ;;  %v6383_v8 = vld [vmem:[%s8784_s3 + $0x128] ss:$16 sps:$4 sm:$0xff]  }
 0x309   : > { %v3685_v1 = vpop.f32.mrf.mxu0  ;;  %4776 = vmatprep.mubr.bf16.mxu0 %v6343_v2 }
 0x30a   : > { %v3973_v35 = vadd.f32 %v3972_v30, %v3684_v62  ;;  %v3974_v47 = vpop.f32.mrf.mxu1  ;;  %v6386_v62 = vld [vmem:[%s8784_s3 + $0x148] ss:$16 sps:$4 sm:$0xff]   ;;  %v6391_v30 = vld [vmem:[%s8784_s3 + $0x16c] ss:$16 sps:$4 sm:$0xff]  }
 0x30b   : > { %v3688_v25 = vpop.f32.mrf.mxu0 }
 0x30c   : > { %v4045_v60 = vmax.f32 %v3973_v35, 0.0  ;;  %v3689_v29 = vadd.f32 %v3688_v25, %v8873_v50  ;;  %v3977_v42 = vpop.f32.mrf.mxu1  ;;  %v6389_v50 = vld [vmem:[%s8784_s3 + $0x168] ss:$16 sps:$4 sm:$0xff]  }
 0x30d   : > { %v3690_v16 = vpop.f32.mrf.mxu0 }
 0x30e   : > { %v4078_v32 = vpack.c.bf16 %v4045_v60, %v4044_v46  ;;  %v3979_v41 = vpop.f32.mrf.mxu1  ;;  %v3978_v6 = vadd.f32 %v3977_v42, %v3689_v29  ;;  %v6394_v29 = vld [vmem:[%s8784_s3 + $0x18c] ss:$16 sps:$4 sm:$0xff]  }
 0x30f   : > { %v3691_v45 = vpop.f32.mrf.mxu0 }
 0x310   : > { %v3692_v7 = vadd.f32 %v3691_v45, %v8874_v17  ;;  %v3980_v24 = vpop.f32.mrf.mxu1  ;;  %4777 = vmatmul.mubr.bf16.gmra.mxu0 %v6341_v55  ;;  %v4046_v13 = vmax.f32 %v3978_v6, 0.0  ;;  %v6392_v45 = vld [vmem:[%s8784_s3 + $0x188] ss:$16 sps:$4 sm:$0xff]   ;;  %v6397_v6 = vld [vmem:[%s8784_s3 + $0x1ac] ss:$16 sps:$4 sm:$0xff]  }
 0x311   : > { %v3693_v5 = vpop.f32.mrf.mxu0  ;;  %4784 = vmatprep.mubr.bf16.mxu0 %v6346_v56 }
 0x312   : > { %v3981_v14 = vadd.f32 %v3980_v24, %v3692_v7  ;;  %v3982_v38 = vpop.f32.mrf.mxu1 }
 0x314   : > { %v4047_v22 = vmax.f32 %v3981_v14, 0.0 }
 0x316   : > { %v4079_v37 = vpack.c.bf16 %v4047_v22, %v4046_v13  ;;  %v6395_v13 = vld [vmem:[%s8784_s3 + $0x1a8] ss:$16 sps:$4 sm:$0xff]   ;;  %v6400_v22 = vld [vmem:[%s8784_s3 + $0x1cc] ss:$16 sps:$4 sm:$0xff]  }
 0x318   : > { %4785 = vmatmul.mubr.bf16.gmra.mxu0 %v6344_v48  ;;  %6013 = vmatprep.subr.bf16.mxu1 %v4079_v37  ;;  %v8461_v37 = vpop.permute.xlu0 %4328 }
 0x319   : > { %6014 = vmatpush3.bf16.msra.mxu1 %v8254_v21  ;;  %4792 = vmatprep.mubr.bf16.mxu0 %v6349_v49  ;;  %v6350_v21 = vld [vmem:[%s8784_s3 + $0x1c0] ss:$16 sps:$4 sm:$0xff]  }
 0x31a   : > { %6015 = vmatprep.subr.bf16.mxu1 %v4078_v32 }
 0x31d   : > { %6016 = vmatpush3.bf16.msra.mxu1 %v8244_v0  ;;  %v6355_v0 = vld [vmem:[%s8784_s3 + $0x1e4] ss:$16 sps:$4 sm:$0xff]  }
 0x31e   : > { %6017 = vmatprep.subr.bf16.mxu1 %v4077_v43 }
 0x320   : > { %4793 = vmatmul.mubr.bf16.gmra.mxu0 %v6347_v59 }
 0x321   : > { %6018 = vmatpush3.bf16.msra.mxu1 %v8234_v61  ;;  %4800 = vmatprep.mubr.bf16.mxu0 %v6352_v52  ;;  %v6353_v61 = vld [vmem:[%s8784_s3 + $0x1e0] ss:$16 sps:$4 sm:$0xff]  }
 0x322   : > { %6019 = vmatprep.subr.bf16.mxu1 %v8304_v20  ;;  %v6373_v20 = vld [vmem:[%s8784_s3 + $0xac] ss:$16 sps:$4 sm:$0xff]  }
 0x325   : > { %6020 = vmatpush3.bf16.msra.mxu1 %v8224_v39  ;;  %v6361_v39 = vld [vmem:[%s8784_s3 + $0x2c] ss:$16 sps:$4 sm:$0xff]  }
 0x326   : > { %6021 = vmatprep.subr.bf16.mxu1 %v8294_v51  ;;  %v6368_v51 = vld [vmem:[%s8784_s3 + $0x88] ss:$16 sps:$4 sm:$0xff]  }
 0x328   : > { %4801 = vmatmul.mubr.bf16.gmra.mxu0 %v6350_v21 }
 0x329   : > { %6022 = vmatpush3.bf16.msra.mxu1 %v8214_v26  ;;  %4808 = vmatprep.mubr.bf16.mxu0 %v6355_v0  ;;  %v6356_v26 = vld [vmem:[%s8784_s3 + $0x8] ss:$16 sps:$4 sm:$0xff]   ;;  %v8465_v0 = vpop.permute.xlu1 %4333 }
 0x32a   : > { %6023 = vmatprep.subr.bf16.mxu1 %v8284_v23  ;;  %v6370_v23 = vld [vmem:[%s8784_s3 + $0x8c] ss:$16 sps:$4 sm:$0xff]  }
 0x32d   : > { %6024 = vmatpush3.bf16.msra.mxu1 %v8197_v57  ;;  %v6359_v57 = vld [vmem:[%s8784_s3 + $0x28] ss:$16 sps:$4 sm:$0xff]  }
 0x32e   : > { %6025 = vmatprep.subr.bf16.mxu1 %v8274_v19  ;;  %v6365_v19 = vld [vmem:[%s8784_s3 + $0x68] ss:$16 sps:$4 sm:$0xff]  }
 0x330   : > { %4809 = vmatmul.mubr.bf16.gmra.mxu0 %v6353_v61 }
 0x331   : > { %6026 = vmatpush3.bf16.msra.mxu1 %v8189_v36  ;;  %v6364_v36 = vld [vmem:[%s8784_s3 + $0x4c] ss:$16 sps:$4 sm:$0xff]  }
 0x332   : > { %6027 = vmatprep.subr.bf16.mxu1 %v8264_v27  ;;  %v6367_v27 = vld [vmem:[%s8784_s3 + $0x6c] ss:$16 sps:$4 sm:$0xff]  }
 0x335   : > { %6028 = vmatpush3.bf16.msra.mxu1 %v8182_v10  ;;  %v6362_v10 = vld [vmem:[%s8784_s3 + $0x48] ss:$16 sps:$4 sm:$0xff]  }
 0x338   : > { %4850 = vmatmul.mubr.bf16.vlgmr.msra.gmra.mxu1 %v6356_v26  ;;  %v6398_v26 = vld [vmem:[%s8784_s3 + $0x1c8] ss:$16 sps:$4 sm:$0xff]  }
 0x339   : > { %4857 = vmatprep.mubr.bf16.mxu1 %v6361_v39  ;;  %v6403_v39 = vld [vmem:[%s8784_s3 + $0x1ec] ss:$16 sps:$4 sm:$0xff]  }
 0x340   : > { %4858 = vmatmul.mubr.bf16.gmra.mxu1 %v6359_v57  ;;  %v8473_v57 = vpop.permute.xlu0 %4248 }
 0x341   : > { %4865 = vmatprep.mubr.bf16.mxu1 %v6364_v36 }
 0x348   : > { %4866 = vmatmul.mubr.bf16.gmra.mxu1 %v6362_v10 }
 0x349   : > { %4873 = vmatprep.mubr.bf16.mxu1 %v6367_v27 }
 0x350   : > { %4874 = vmatmul.mubr.bf16.gmra.mxu1 %v6365_v19  ;;  %v8477_v19 = vpop.permute.xlu1 %4253 }
 0x351   : > { %4881 = vmatprep.mubr.bf16.mxu1 %v6370_v23 }
 0x358   : > { %4882 = vmatmul.mubr.bf16.gmra.mxu1 %v6368_v51 }
 0x359   : > { %4889 = vmatprep.mubr.bf16.mxu1 %v6373_v20  ;;  %v8481_v20 = vpop.permute.xlu0 %4318 }
 0x360   : > { %4890 = vmatmul.mubr.bf16.gmra.mxu1 %v6371_v40 }
 0x361   : > { %4897 = vmatprep.mubr.bf16.mxu1 %v6376_v28  ;;  %v6401_v28 = vld [vmem:[%s8784_s3 + $0x1e8] ss:$16 sps:$4 sm:$0xff]  }
 0x368   : > { %4898 = vmatmul.mubr.bf16.gmra.mxu1 %v6374_v31 }
 0x369   : > { %4905 = vmatprep.mubr.bf16.mxu1 %v6379_v53 }
 0x370   : > { %4906 = vmatmul.mubr.bf16.gmra.mxu1 %v6377_v44  ;;  %v8488_v44 = vpop.permute.xlu1 %4323 }
 0x371   : > { %4913 = vmatprep.mubr.bf16.mxu1 %v6382_v18 }
 0x378   : > { %v5917_v4 = vpop.f32.mrf.mxu0  ;;  %4914 = vmatmul.mubr.bf16.gmra.mxu1 %v6380_v54  ;;  %v8490_v54 = vpop.permute.xlu0 %4238 }
 0x379   : > { %4921 = vmatprep.mubr.bf16.mxu1 %v6385_v15 }
 0x37a   : > { %v5918_v33 = vpop.f32.mrf.mxu0 }
 0x37b   : > { %v8411_v12 = vadd.f32 %v5918_v33, %v5917_v4 }
 0x37c   : > { %v5920_v9 = vpop.f32.mrf.mxu0 }
 0x37e   : > { %v5921_v2 = vpop.f32.mrf.mxu0 }
 0x37f   : > { %v8419_v43 = vadd.f32 %v5921_v2, %v5920_v9  ;;  %v8494_v9 = vpop.permute.xlu1 %4243  ;;  %v8498_v2 = vpop.permute.xlu0 %4308 }
 0x380   : > { %v5923_v34 = vpop.f32.mrf.mxu0  ;;  %4922 = vmatmul.mubr.bf16.gmra.mxu1 %v6383_v8  ;;  %8875 = vst [vmem:[#allocation19_spill] sm:$0xff] %v8498_v2 }
 0x381   : > { %4929 = vmatprep.mubr.bf16.mxu1 %v6388_v63 }
 0x382   : > { %v5924_v58 = vpop.f32.mrf.mxu0 }
 0x383   : > { %v8421_v3 = vadd.f32 %v5924_v58, %v5923_v34 }
 0x384   : > { %v5926_v11 = vpop.f32.mrf.mxu0 }
 0x386   : > { %v5927_v1 = vpop.f32.mrf.mxu0 }
 0x387   : > { %v8429_v35 = vadd.f32 %v5927_v1, %v5926_v11  ;;  %v8504_v1 = vpop.permute.xlu0 %4228 }
 0x388   : > { %v5929_v47 = vpop.f32.mrf.mxu0  ;;  %4930 = vmatmul.mubr.bf16.gmra.mxu1 %v6386_v62  ;;  %v8502_v62 = vpop.permute.xlu1 %4313 }
 0x389   : > { %4937 = vmatprep.mubr.bf16.mxu1 %v6391_v30 }
 0x38a   : > { %v5930_v25 = vpop.f32.mrf.mxu0 }
 0x38b   : > { %v8431_v46 = vadd.f32 %v5930_v25, %v5929_v47 }
 0x38c   : > { %v5932_v60 = vpop.f32.mrf.mxu0 }
 0x38e   : > { %v5933_v42 = vpop.f32.mrf.mxu0 }
 0x38f   : > { %v8439_v55 = vadd.f32 %v5933_v42, %v5932_v60 }
 0x390   : > { %v5935_v16 = vpop.f32.mrf.mxu0  ;;  %4938 = vmatmul.mubr.bf16.gmra.mxu1 %v6389_v50  ;;  %v8508_v50 = vpop.permute.xlu1 %4233 }
 0x391   : > { %4945 = vmatprep.mubr.bf16.mxu1 %v6394_v29 }
 0x392   : > { %v5936_v56 = vpop.f32.mrf.mxu0 }
 0x393   : > { %v8441_v32 = vadd.f32 %v5936_v56, %v5935_v16  ;;  %v8512_v16 = vpop.permute.xlu0 %4298 }
 0x394   : > { %v5938_v41 = vpop.f32.mrf.mxu0  ;;  %8876 = vst [vmem:[#allocation20_spill] sm:$0xff] %v8512_v16 }
 0x396   : > { %v5939_v17 = vpop.f32.mrf.mxu0 }
 0x397   : > { %v8449_v7 = vadd.f32 %v5939_v17, %v5938_v41  ;;  %v8518_v17 = vpop.permute.xlu0 %4218 }
 0x398   : > { %v5941_v24 = vpop.f32.mrf.mxu0  ;;  %4946 = vmatmul.mubr.bf16.gmra.mxu1 %v6392_v45 }
 0x399   : > { %4953 = vmatprep.mubr.bf16.mxu1 %v6397_v6  ;;  %v8516_v6 = vpop.permute.xlu1 %4303 }
 0x39a   : > { %v5942_v5 = vpop.f32.mrf.mxu0  ;;  %8877 = vst [vmem:[#allocation21_spill] sm:$0xff] %v8516_v6 }
 0x39b   : > { %v8451_v14 = vadd.f32 %v5942_v5, %v5941_v24  ;;  %v8522_v5 = vpop.permute.xlu0 %4288 }
 0x39c   : > { %v5944_v38 = vpop.f32.mrf.mxu0  ;;  %8878 = vst [vmem:[#allocation22_spill] sm:$0xff] %v8522_v5 }
 0x39d   : > { %v8520_v24 = vpop.permute.xlu1 %4223 }
 0x39e   : > { %v5945_v48 = vpop.f32.mrf.mxu0 }
 0x39f   : > { %v8459_v49 = vadd.f32 %v5945_v48, %v5944_v38 }
 0x3a0   : > { %v5947_v59 = vpop.f32.mrf.mxu0  ;;  %4954 = vmatmul.mubr.bf16.gmra.mxu1 %v6395_v13  ;;  %v4209_v13 = vpop.permute.xlu0 %4208 }
 0x3a1   : > { %4961 = vmatprep.mubr.bf16.mxu1 %v6400_v22  ;;  %v8524_v38 = vpop.permute.xlu1 %4293 }
 0x3a2   : > { %v5948_v52 = vpop.f32.mrf.mxu0  ;;  %8879 = vst [vmem:[#allocation23_spill] sm:$0xff] %v8524_v38 }
 0x3a3   : > { %v8463_v21 = vadd.f32 %v5948_v52, %v5947_v59 }
 0x3a4   : > { %v5950_v61 = vpop.f32.mrf.mxu0  ;;  %v8526_v48 = vpop.permute.xlu0 %4278 }
 0x3a5   : > { %v4214_v22 = vpop.permute.xlu1 %4213 }
 0x3a6   : > { %v5951_v36 = vpop.f32.mrf.mxu0 }
 0x3a7   : > { %v8475_v10 = vadd.f32 %v5951_v36, %v5950_v61 }
 0x3a8   : > { %v5953_v27 = vpop.f32.mrf.mxu0  ;;  %4962 = vmatmul.mubr.bf16.gmra.mxu1 %v6398_v26  ;;  %v4199_v52 = vpop.permute.xlu0 %4198 }
 0x3a9   : > { %4969 = vmatprep.mubr.bf16.mxu1 %v6403_v39  ;;  %v8528_v59 = vpop.permute.xlu1 %4283 }
 0x3aa   : > { %v5954_v23 = vpop.f32.mrf.mxu0  ;;  %8880 = vst [vmem:[#allocation24_spill] sm:$0xff] %v8528_v59 }
 0x3ab   : > { %v8479_v51 = vadd.f32 %v5954_v23, %v5953_v27 }
 0x3ac   : > { %v5956_v40 = vpop.f32.mrf.mxu0  ;;  %v8530_v26 = vpop.permute.xlu0 %4268 }
 0x3ad   : > { %v4204_v61 = vpop.permute.xlu1 %4203 }
 0x3ae   : > { %v5957_v31 = vpop.f32.mrf.mxu0 }
 0x3af   : > { %v8486_v53 = vadd.f32 %v5957_v31, %v5956_v40 }
 0x3b0   : > { %v5959_v18 = vpop.f32.mrf.mxu0  ;;  %4970 = vmatmul.mubr.bf16.gmra.mxu1 %v6401_v28  ;;  %v4189_v36 = vpop.permute.xlu0 %4188 }
 0x3b1   : > { %v8532_v39 = vpop.permute.xlu1 %4273  ;;  %v4699_v59 = vadd.f32 %v8421_v3, %v4189_v36 }
 0x3b2   : > { %v5960_v15 = vpop.f32.mrf.mxu0 }
 0x3b3   : > { %v8492_v4 = vadd.f32 %v5960_v15, %v5959_v18 }
 0x3b4   : > { %v5962_v33 = vpop.f32.mrf.mxu0  ;;  %v8534_v23 = vpop.permute.xlu0 %4258 }
 0x3b5   : > { %v4194_v27 = vpop.permute.xlu1 %4193 }
 0x3b6   : > { %v5963_v8 = vpop.f32.mrf.mxu0 }
 0x3b7   : > { %v8496_v63 = vadd.f32 %v5963_v8, %v5962_v33 }
 0x3b8   : > { %v5965_v34 = vpop.f32.mrf.mxu0  ;;  %v4179_v31 = vpop.permute.xlu0 %4178 }
 0x3b9   : > { %v8536_v40 = vpop.permute.xlu1 %4263  ;;  %v4691_v15 = vadd.f32 %v8411_v12, %v4179_v31  ;;  %v4702_v31 = vadd.f32 %v8429_v35, %v4194_v27 }
 0x3ba   : > { %v5966_v58 = vpop.f32.mrf.mxu0 }
 0x3bb   : > { %v8500_v11 = vadd.f32 %v5966_v58, %v5965_v34 }
 0x3bc   : > { %v5968_v30 = vpop.f32.mrf.mxu0 }
 0x3bd   : > { %v4184_v58 = vpop.permute.xlu1 %4183 }
 0x3be   : > { %v5969_v47 = vpop.f32.mrf.mxu0 }
 0x3bf   : > { %v8506_v25 = vadd.f32 %v5969_v47, %v5968_v30  ;;  %v4694_v47 = vadd.f32 %v8419_v43, %v4184_v58 }
 0x3c0   : > { %v5971_v60 = vpop.f32.mrf.mxu0 }
 0x3c2   : > { %v5972_v29 = vpop.f32.mrf.mxu0 }
 0x3c3   : > { %v8510_v42 = vadd.f32 %v5972_v29, %v5971_v60 }
 0x3c4   : > { %v5974_v56 = vpop.f32.mrf.mxu0 }
 0x3c6   : > { %v5975_v41 = vpop.f32.mrf.mxu0 }
 0x3c7   : > { %v8514_v45 = vadd.f32 %v5975_v41, %v5974_v56 }
 0x3c8   : > { %v8549_v27 = vpop.f32.mrf.mxu0 }
 0x3f8   : > { %v6029_v28 = vpop.f32.mrf.mxu1 }
 0x3fa   : > { %v6030_v18 = vpop.f32.mrf.mxu1 }
 0x3fb   : > { %v6031_v33 = vadd.f32 %v6030_v18, %v6029_v28 }
 0x3fc   : > { %v6032_v8 = vpop.f32.mrf.mxu1 }
 0x3fd   : > { %v4852_v34 = vadd.f32 %v6031_v33, %v4691_v15 }
 0x3fe   : > { %v6033_v30 = vpop.f32.mrf.mxu1 }
 0x3ff   : > { %v6034_v60 = vadd.f32 %v6033_v30, %v6032_v8  ;;  %v4978_v5 = vmax.f32 %v4852_v34, 0.0  ;;  %v4707_v8 = vadd.f32 %v8431_v46, %v4199_v52 }
 0x400   : > { %v6035_v29 = vpop.f32.mrf.mxu1 }
 0x401   : > { %v4855_v56 = vadd.f32 %v6034_v60, %v4694_v47 }
 0x402   : > { %v6036_v41 = vpop.f32.mrf.mxu1 }
 0x403   : > { %v4979_v38 = vmax.f32 %v4855_v56, 0.0  ;;  %v6037_v16 = vadd.f32 %v6036_v41, %v6035_v29 }
 0x404   : > { %v6038_v6 = vpop.f32.mrf.mxu1 }
 0x405   : > { %v8541_v2 = vpack.c.bf16 %v4979_v38, %v4978_v5  ;;  %v4860_v12 = vadd.f32 %v6037_v16, %v4699_v59  ;;  %v4710_v5 = vadd.f32 %v8439_v55, %v4204_v61 }
 0x406   : > { %v6039_v28 = vpop.f32.mrf.mxu1 }
 0x407   : > { %8881 = vst [vmem:[#allocation25_spill] sm:$0xff] %v8541_v2  ;;  %v6040_v18 = vadd.f32 %v6039_v28, %v6038_v6  ;;  %v4980_v58 = vmax.f32 %v4860_v12, 0.0  ;;  %v4715_v6 = vadd.f32 %v8441_v32, %v4209_v13  ;;  %v4723_v32 = vadd.f32 %v8451_v14, %v8518_v17 }
 0x408   : > { %v6041_v15 = vpop.f32.mrf.mxu1 }
 0x409   : > { %v4863_v33 = vadd.f32 %v6040_v18, %v4702_v31  ;;  %v4718_v31 = vadd.f32 %v8449_v7, %v4214_v22  ;;  %v8554_v18 = vpop.f32.mrf.mxu0 }
 0x40a   : > { %v6042_v43 = vpop.f32.mrf.mxu1 }
 0x40b   : > { %v4981_v30 = vmax.f32 %v4863_v33, 0.0  ;;  %v6043_v47 = vadd.f32 %v6042_v43, %v6041_v15  ;;  %v8558_v13 = vpop.f32.mrf.mxu0 }
 0x40c   : > { %v6044_v3 = vpop.f32.mrf.mxu1 }
 0x40d   : > { %v8545_v36 = vpack.c.bf16 %v4981_v30, %v4980_v58  ;;  %v4868_v34 = vadd.f32 %v6043_v47, %v4707_v8  ;;  %v6406_v47 = vld [vmem:[%s8786_s5 + $0x4] ss:$8 sps:$4 sm:$0xff]  }
 0x40e   : > { %v6045_v60 = vpop.f32.mrf.mxu1  ;;  %5250 = vmatprep.mubr.bf16.mxu0 %v6406_v47 }
 0x40f   : > { %8882 = vst [vmem:[#allocation8_spill] sm:$0xff] %v8545_v36  ;;  %v6046_v16 = vadd.f32 %v6045_v60, %v6044_v3  ;;  %v4982_v29 = vmax.f32 %v4868_v34, 0.0  ;;  %v4726_v34 = vadd.f32 %v8459_v49, %v8520_v24  ;;  %v8567_v60 = vpop.f32.mrf.mxu0  ;;  %v4734_v49 = vadd.f32 %v8475_v10, %v8508_v50 }
 0x410   : > { %v6047_v38 = vpop.f32.mrf.mxu1  ;;  %v4742_v10 = vadd.f32 %v8486_v53, %v8494_v9  ;;  %v4750_v53 = vadd.f32 %v8496_v63, %v8477_v19  ;;  %v4758_v19 = vadd.f32 %v8506_v25, %v8536_v40  ;;  %v4766_v25 = vadd.f32 %v8514_v45, %v8532_v39 }
 0x411   : > { %v4871_v59 = vadd.f32 %v6046_v16, %v4710_v5  ;;  %v5979_v40 = vadd.f32 %v8554_v18, %v8549_v27 }
 0x412   : > { %v6048_v35 = vpop.f32.mrf.mxu1 }
 0x413   : > { %v4983_v46 = vmax.f32 %v4871_v59, 0.0  ;;  %v6049_v52 = vadd.f32 %v6048_v35, %v6047_v38  ;;  %v4731_v38 = vadd.f32 %v8463_v21, %v8504_v1  ;;  %v8571_v59 = vpop.f32.mrf.mxu0  ;;  %v4739_v21 = vadd.f32 %v8479_v51, %v8490_v54 }
 0x414   : > { %v6050_v56 = vpop.f32.mrf.mxu1  ;;  %v4747_v51 = vadd.f32 %v8492_v4, %v8473_v57  ;;  %v4755_v57 = vadd.f32 %v8500_v11, %v8534_v23  ;;  %v4763_v11 = vadd.f32 %v8510_v42, %v8530_v26  ;;  %v4771_v26 = vadd.f32 %v5979_v40, %v8526_v48 }
 0x415   : > { %v8551_v41 = vpack.c.bf16 %v4983_v46, %v4982_v29  ;;  %v4876_v12 = vadd.f32 %v6049_v52, %v4715_v6  ;;  %v8577_v24 = vpop.f32.mrf.mxu0 }
 0x416   : > { %v6051_v28 = vpop.f32.mrf.mxu1 }
 0x417   : > { %8883 = vst [vmem:[#allocation4_spill] sm:$0xff] %v8551_v41  ;;  %v6052_v55 = vadd.f32 %v6051_v28, %v6050_v56  ;;  %v4984_v43 = vmax.f32 %v4876_v12, 0.0  ;;  %v8581_v1 = vpop.f32.mrf.mxu0 }
 0x418   : > { %v6053_v61 = vpop.f32.mrf.mxu1 }
 0x419   : > { %v4879_v15 = vadd.f32 %v6052_v55, %v4718_v31  ;;  %v8587_v50 = vpop.f32.mrf.mxu0 }
 0x41a   : > { %v6054_v33 = vpop.f32.mrf.mxu1 }
 0x41b   : > { %v4985_v8 = vmax.f32 %v4879_v15, 0.0  ;;  %v6055_v58 = vadd.f32 %v6054_v33, %v6053_v61  ;;  %v8591_v54 = vpop.f32.mrf.mxu0 }
 0x41c   : > { %v6056_v30 = vpop.f32.mrf.mxu1 }
 0x41d   : > { %v8563_v7 = vpack.c.bf16 %v4985_v8, %v4984_v43  ;;  %v4884_v22 = vadd.f32 %v6055_v58, %v4723_v32  ;;  %v8597_v9 = vpop.f32.mrf.mxu0 }
 0x41e   : > { %v6057_v3 = vpop.f32.mrf.mxu1 }
 0x41f   : > { %8884 = vst [vmem:[#allocation5_spill] sm:$0xff] %v8563_v7  ;;  %v6058_v14 = vadd.f32 %v6057_v3, %v6056_v30  ;;  %v4986_v35 = vmax.f32 %v4884_v22, 0.0  ;;  %v8601_v4 = vpop.f32.mrf.mxu0 }
 0x420   : > { %v6059_v17 = vpop.f32.mrf.mxu1 }
 0x421   : > { %v4887_v5 = vadd.f32 %v6058_v14, %v4726_v34  ;;  %v8607_v63 = vpop.f32.mrf.mxu0 }
 0x422   : > { %v6060_v16 = vpop.f32.mrf.mxu1 }
 0x423   : > { %v4987_v6 = vmax.f32 %v4887_v5, 0.0  ;;  %v6061_v29 = vadd.f32 %v6060_v16, %v6059_v17  ;;  %v5995_v23 = vpop.f32.mrf.mxu0 }
 0x424   : > { %v6062_v46 = vpop.f32.mrf.mxu1 }
 0x425   : > { %v8573_v52 = vpack.c.bf16 %v4987_v6, %v4986_v35  ;;  %v4892_v56 = vadd.f32 %v6061_v29, %v4731_v38 }
 0x426   : > { %v6063_v12 = vpop.f32.mrf.mxu1 }
 0x427   : > { %8885 = vst [vmem:[#allocation26_spill] sm:$0xff] %v8573_v52  ;;  %v6064_v28 = vadd.f32 %v6063_v12, %v6062_v46  ;;  %v4988_v15 = vmax.f32 %v4892_v56, 0.0 }
 0x428   : > { %v6065_v31 = vpop.f32.mrf.mxu1 }
 0x429   : > { %v4895_v55 = vadd.f32 %v6064_v28, %v4734_v49 }
 0x42a   : > { %v6066_v61 = vpop.f32.mrf.mxu1 }
 0x42b   : > { %v4989_v33 = vmax.f32 %v4895_v55, 0.0  ;;  %v6067_v32 = vadd.f32 %v6066_v61, %v6065_v31 }
 0x42c   : > { %v6068_v43 = vpop.f32.mrf.mxu1 }
 0x42d   : > { %v8583_v8 = vpack.c.bf16 %v4989_v33, %v4988_v15  ;;  %v4900_v58 = vadd.f32 %v6067_v32, %v4739_v21 }
 0x42e   : > { %v6069_v30 = vpop.f32.mrf.mxu1 }
 0x42f   : > { %8886 = vst [vmem:[#allocation17_spill] sm:$0xff] %v8583_v8  ;;  %v6070_v47 = vadd.f32 %v6069_v30, %v6068_v43  ;;  %v4990_v14 = vmax.f32 %v4900_v58, 0.0 }
 0x430   : > { %v6071_v22 = vpop.f32.mrf.mxu1 }
 0x431   : > { %v4903_v3 = vadd.f32 %v6070_v47, %v4742_v10 }
 0x432   : > { %v6072_v34 = vpop.f32.mrf.mxu1 }
 0x433   : > { %v4991_v17 = vmax.f32 %v4903_v3, 0.0  ;;  %v6073_v5 = vadd.f32 %v6072_v34, %v6071_v22 }
 0x434   : > { %v6074_v16 = vpop.f32.mrf.mxu1 }
 0x435   : > { %v8593_v38 = vpack.c.bf16 %v4991_v17, %v4990_v14  ;;  %v4908_v35 = vadd.f32 %v6073_v5, %v4747_v51  ;;  %v5996_v14 = vpop.f32.mrf.mxu0 }
 0x436   : > { %v6075_v6 = vpop.f32.mrf.mxu1  ;;  %v5997_v7 = vadd.f32 %v5996_v14, %v5995_v23  ;;  %v8890_v23 = vld [vmem:[#allocation19_spill] sm:$0xff] }
 0x437   : > { %v6076_v29 = vadd.f32 %v6075_v6, %v6074_v16  ;;  %v4992_v49 = vmax.f32 %v4908_v35, 0.0  ;;  %v5998_v35 = vpop.f32.mrf.mxu0 }
 0x438   : > { %v6077_v46 = vpop.f32.mrf.mxu1 }
 0x439   : > { %v4911_v56 = vadd.f32 %v6076_v29, %v4750_v53  ;;  %v5999_v39 = vpop.f32.mrf.mxu0 }
 0x43a   : > { %v6078_v12 = vpop.f32.mrf.mxu1 }
 0x43b   : > { %v4993_v28 = vmax.f32 %v4911_v56, 0.0  ;;  %v6079_v31 = vadd.f32 %v6078_v12, %v6077_v46 }
 0x43c   : > { %v6080_v55 = vpop.f32.mrf.mxu1 }
 0x43d   : > { %v8603_v61 = vpack.c.bf16 %v4993_v28, %v4992_v49  ;;  %v4916_v21 = vadd.f32 %v6079_v31, %v4755_v57  ;;  %v6001_v57 = vpop.f32.mrf.mxu0 }
 0x43e   : > { %v6081_v15 = vpop.f32.mrf.mxu1 }
 0x43f   : > { %v6082_v33 = vadd.f32 %v6081_v15, %v6080_v55  ;;  %v4994_v30 = vmax.f32 %v4916_v21, 0.0  ;;  %v6002_v28 = vpop.f32.mrf.mxu0 }
 0x440   : > { %v6083_v32 = vpop.f32.mrf.mxu1 }
 0x441   : > { %v4919_v43 = vadd.f32 %v6082_v33, %v4758_v19  ;;  %v6004_v21 = vpop.f32.mrf.mxu0 }
 0x442   : > { %v6084_v58 = vpop.f32.mrf.mxu1 }
 0x443   : > { %v4995_v10 = vmax.f32 %v4919_v43, 0.0  ;;  %v6085_v47 = vadd.f32 %v6084_v58, %v6083_v32  ;;  %v6005_v33 = vpop.f32.mrf.mxu0 }
 0x444   : > { %v6086_v22 = vpop.f32.mrf.mxu1 }
 0x445   : > { %v4924_v3 = vadd.f32 %v6085_v47, %v4763_v11  ;;  %v8611_v34 = vpack.c.bf16 %v4995_v10, %v4994_v30  ;;  %v6007_v58 = vpop.f32.mrf.mxu0 }
 0x446   : > { %v6087_v51 = vpop.f32.mrf.mxu1 }
 0x447   : > { %8887 = vst [vmem:[#allocation18_spill] sm:$0xff] %v8611_v34  ;;  %v6088_v17 = vadd.f32 %v6087_v51, %v6086_v22  ;;  %v4996_v6 = vmax.f32 %v4924_v3, 0.0  ;;  %v6008_v10 = vpop.f32.mrf.mxu0  ;;  %v6000_v34 = vadd.f32 %v5999_v39, %v5998_v35 }
 0x448   : > { %v6089_v5 = vpop.f32.mrf.mxu1 }
 0x449   : > { %v4927_v16 = vadd.f32 %v6088_v17, %v4766_v25  ;;  %v6010_v3 = vpop.f32.mrf.mxu0  ;;  %v4798_v35 = vadd.f32 %v6000_v34, %v8502_v62 }
 0x44a   : > { %v6090_v42 = vpop.f32.mrf.mxu1 }
 0x44b   : > { %v4997_v53 = vmax.f32 %v4927_v16, 0.0  ;;  %v6091_v29 = vadd.f32 %v6090_v42, %v6089_v5  ;;  %v6011_v40 = vpop.f32.mrf.mxu0  ;;  %v6006_v5 = vadd.f32 %v6005_v33, %v6004_v21  ;;  %v6009_v16 = vadd.f32 %v6008_v10, %v6007_v58 }
 0x44c   : > { %v8618_v46 = vpop.f32.mrf.mxu1  ;;  %v6003_v42 = vadd.f32 %v6002_v28, %v6001_v57  ;;  %v5994_v58 = vadd.f32 %v8607_v63, %v8601_v4 }
 0x44d   : > { %v8620_v56 = vadd.f32 %v6091_v29, %v4771_v26  ;;  %v8622_v12 = vpack.c.bf16 %v4997_v53, %v4996_v6  ;;  %v6012_v26 = vadd.f32 %v6011_v40, %v6010_v3  ;;  %v4806_v36 = vadd.f32 %v6006_v5, %v8488_v44 }
 0x44e   : > { %v8624_v45 = vpop.f32.mrf.mxu1 }
 0x44f   : > { %8888 = vst [vmem:[#allocation15_spill] sm:$0xff] %v8620_v56  ;;  %8889 = vst [vmem:[#allocation16_spill] sm:$0xff] %v8622_v12  ;;  %v4811_v12 = vadd.f32 %v6009_v16, %v8461_v37  ;;  %v4803_v56 = vadd.f32 %v6003_v42, %v8481_v20  ;;  %v4814_v52 = vadd.f32 %v6012_v26, %v8465_v0  ;;  %v8899_v16 = vld [vmem:[#allocation5_spill] sm:$0xff]  ;;  %v8900_v42 = vld [vmem:[#allocation4_spill] sm:$0xff] }
 0x450   : > { %v8626_v27 = vpop.f32.mrf.mxu1  ;;  %v5991_v37 = vadd.f32 %v8597_v9, %v8591_v54  ;;  %v4795_v20 = vadd.f32 %v5997_v7, %v8890_v23  ;;  %v8892_v54 = vld [vmem:[#allocation20_spill] sm:$0xff] }
 0x451   : > { %v6419_v23 = vld [vmem:[%s8786_s5 + $0x50] ss:$8 sps:$4 sm:$0xff]  }
 0x452   : > { %v8628_v18 = vpop.f32.mrf.mxu1  ;;  %v4787_v9 = vadd.f32 %v5991_v37, %v8892_v54  ;;  %v6421_v37 = vld [vmem:[%s8786_s5 + $0x54] ss:$8 sps:$4 sm:$0xff]  }
 0x454   : > { %v6098_v49 = vpop.f32.mrf.mxu1 }
 0x456   : > { %v6099_v48 = vpop.f32.mrf.mxu1  ;;  %v8901_v26 = vld [vmem:[#allocation16_spill] sm:$0xff] }
 0x457   : > { %v6100_v7 = vadd.f32 %v6099_v48, %v6098_v49  ;;  %v6094_v49 = vadd.f32 %v8624_v45, %v8618_v46  ;;  %v8897_v46 = vld [vmem:[#allocation26_spill] sm:$0xff]  ;;  %v8898_v45 = vld [vmem:[#allocation15_spill] sm:$0xff] }
 0x458   : > { %v6101_v31 = vpop.f32.mrf.mxu1  ;;  %v4998_v5 = vmax.f32 %v8898_v45, 0.0 }
 0x45a   : > { %v6102_v55 = vpop.f32.mrf.mxu1 }
 0x45b   : > { %v6103_v63 = vadd.f32 %v6102_v55, %v6101_v31  ;;  %v6097_v31 = vadd.f32 %v8628_v18, %v8626_v27 }
 0x45c   : > { %v6104_v15 = vpop.f32.mrf.mxu1 }
 0x45d   : > { %v4948_v55 = vadd.f32 %v6103_v63, %v4787_v9 }
 0x45e   : > { %v6105_v19 = vpop.f32.mrf.mxu1 }
 0x45f   : > { %v6106_v14 = vadd.f32 %v6105_v19, %v6104_v15  ;;  %v5982_v19 = vadd.f32 %v8567_v60, %v8558_v13  ;;  %v8895_v13 = vld [vmem:[#allocation24_spill] sm:$0xff] }
 0x460   : > { %v6107_v32 = vpop.f32.mrf.mxu1 }
 0x461   : > { %v4774_v60 = vadd.f32 %v5982_v19, %v8895_v13 }
 0x462   : > { %v6108_v43 = vpop.f32.mrf.mxu1 }
 0x463   : > { %v6109_v39 = vadd.f32 %v6108_v43, %v6107_v32  ;;  %v4935_v3 = vadd.f32 %v6094_v49, %v4774_v60 }
 0x464   : > { %v6110_v11 = vpop.f32.mrf.mxu1 }
 0x465   : > { %v4956_v62 = vadd.f32 %v6109_v39, %v4795_v20  ;;  %v4999_v40 = vmax.f32 %v4935_v3, 0.0  ;;  %v6413_v39 = vld [vmem:[%s8786_s5 + $0x30] ss:$8 sps:$4 sm:$0xff]   ;;  %v6424_v20 = vld [vmem:[%s8786_s5 + $0x64] ss:$8 sps:$4 sm:$0xff]  }
 0x466   : > { %v6111_v30 = vpop.f32.mrf.mxu1 }
 0x467   : > { %v6112_v21 = vadd.f32 %v6111_v30, %v6110_v11  ;;  %v5004_v32 = vmax.f32 %v4956_v62, 0.0 }
 0x468   : > { %v6113_v47 = vpop.f32.mrf.mxu1 }
 0x469   : > { %v4959_v0 = vadd.f32 %v6112_v21, %v4798_v35  ;;  %v8904_v21 = vld [vmem:[#allocation25_spill] sm:$0xff] }
 0x46a   : > { %v6114_v22 = vpop.f32.mrf.mxu1  ;;  %v6415_v35 = vld [vmem:[%s8786_s5 + $0x34] ss:$8 sps:$4 sm:$0xff]  }
 0x46b   : > { %v6115_v41 = vadd.f32 %v6114_v22, %v6113_v47  ;;  %v5002_v22 = vmax.f32 %v4948_v55, 0.0 }
 0x46c   : > { %v6116_v51 = vpop.f32.mrf.mxu1 }
 0x46d   : > { %v4964_v44 = vadd.f32 %v6115_v41, %v4803_v56 }
 0x46e   : > { %v6117_v25 = vpop.f32.mrf.mxu1 }
 0x46f   : > { %v6118_v53 = vadd.f32 %v6117_v25, %v6116_v51  ;;  %v5006_v34 = vmax.f32 %v4964_v44, 0.0  ;;  %v8896_v51 = vld [vmem:[#allocation17_spill] sm:$0xff]  ;;  %v6418_v44 = vld [vmem:[%s8786_s5 + $0x44] ss:$8 sps:$4 sm:$0xff]  }
 0x470   : > { %v6119_v17 = vpop.f32.mrf.mxu1 }
 0x471   : > { %v4967_v33 = vadd.f32 %v6118_v53, %v4806_v36  ;;  %v8903_v53 = vld [vmem:[#allocation18_spill] sm:$0xff] }
 0x472   : > { %v6120_v6 = vpop.f32.mrf.mxu1 }
 0x473   : > { %v6121_v29 = vadd.f32 %v6120_v6, %v6119_v17  ;;  %v5007_v47 = vmax.f32 %v4967_v33, 0.0  ;;  %v8902_v6 = vld [vmem:[#allocation8_spill] sm:$0xff] }
 0x474   : > { %v6122_v2 = vpop.f32.mrf.mxu1  ;;  %v6409_v33 = vld [vmem:[%s8786_s5 + $0x14] ss:$8 sps:$4 sm:$0xff]  }
 0x475   : > { %v4972_v57 = vadd.f32 %v6121_v29, %v4811_v12  ;;  %v5005_v12 = vmax.f32 %v4959_v0, 0.0  ;;  %v5024_v15 = vpack.c.bf16 %v5007_v47, %v5006_v34  ;;  %v6404_v29 = vld [vmem:[%s8786_s5] ss:$8 sps:$4 sm:$0xff]   ;;  %v6427_v0 = vld [vmem:[%s8786_s5 + $0x74] ss:$8 sps:$4 sm:$0xff]  }
 0x476   : > { %v6123_v8 = vpop.f32.mrf.mxu1  ;;  %v6425_v47 = vld [vmem:[%s8786_s5 + $0x70] ss:$8 sps:$4 sm:$0xff]  }
 0x477   : > { %v6124_v28 = vadd.f32 %v6123_v8, %v6122_v2  ;;  %v5008_v11 = vmax.f32 %v4972_v57, 0.0  ;;  %v5988_v2 = vadd.f32 %v8587_v50, %v8581_v1  ;;  %v8891_v8 = vld [vmem:[#allocation21_spill] sm:$0xff]  ;;  %v8893_v1 = vld [vmem:[#allocation23_spill] sm:$0xff]  ;;  %v5023_v30 = vpack.c.bf16 %v5005_v12, %v5004_v32 }
 0x478   : > { %v4790_v4 = vadd.f32 %v5994_v58, %v8891_v8  ;;  %v6407_v57 = vld [vmem:[%s8786_s5 + $0x10] ss:$8 sps:$4 sm:$0xff]   ;;  %v6410_v58 = vld [vmem:[%s8786_s5 + $0x20] ss:$8 sps:$4 sm:$0xff]  }
 0x479   : > { %v4975_v10 = vadd.f32 %v6124_v28, %v4814_v52  ;;  %v5985_v52 = vadd.f32 %v8577_v24, %v8571_v59  ;;  %v4782_v50 = vadd.f32 %v5988_v2, %v8893_v1  ;;  %v8894_v59 = vld [vmem:[#allocation22_spill] sm:$0xff]  ;;  %v8714_v2 = vpop.permute.xlu1 %5135 }
 0x47a   : > { %v4951_v56 = vadd.f32 %v6106_v14, %v4790_v4  ;;  %v6412_v28 = vld [vmem:[%s8786_s5 + $0x24] ss:$8 sps:$4 sm:$0xff]   ;;  %v6422_v14 = vld [vmem:[%s8786_s5 + $0x60] ss:$8 sps:$4 sm:$0xff]  }
 0x47b   : > { %v5009_v36 = vmax.f32 %v4975_v10, 0.0  ;;  %v4779_v24 = vadd.f32 %v5985_v52, %v8894_v59  ;;  %v4943_v48 = vadd.f32 %v6100_v7, %v4782_v50  ;;  %v6416_v10 = vld [vmem:[%s8786_s5 + $0x40] ss:$8 sps:$4 sm:$0xff]  }
 0x47c   : > { %v5003_v43 = vmax.f32 %v4951_v56, 0.0 }
 0x47d   : > { %v5025_v41 = vpack.c.bf16 %v5009_v36, %v5008_v11  ;;  %v5001_v27 = vmax.f32 %v4943_v48, 0.0  ;;  %v6453_v11 = vmov 0.0   ;;  %v8712_v36 = vpop.permute.xlu0 %5130  ;;  %v8718_v4 = vpop.permute.xlu1 %5125 }
 0x47e   : > { %v5022_v18 = vpack.c.bf16 %v5003_v43, %v5002_v22  ;;  %6198 = vmatprep.subr.bf16.mxu1 %v6453_v11  ;;  %6214 = vmatprep.mubr.msk.bf16.mxu1 %vm6454_vm1, %v6453_v11 }
 0x47f   : > { %6125 = vmatprep.subr.bf16.mxu0 %v5025_v41 }
 0x480   : > { %6126 = vmatpush3.bf16.msra.mxu0 %v8603_v61  ;;  %v4940_v61 = vadd.f32 %v6097_v31, %v4779_v24 }
 0x481   : > { %6127 = vmatprep.subr.bf16.mxu0 %v5024_v15  ;;  %v8716_v8 = vpop.permute.xlu0 %5120  ;;  %v8723_v62 = vpop.permute.xlu1 %5115 }
 0x482   : > { %v5000_v25 = vmax.f32 %v4940_v61, 0.0 }
 0x484   : > { %6128 = vmatpush3.bf16.msra.mxu0 %v8593_v38  ;;  %v5021_v17 = vpack.c.bf16 %v5001_v27, %v5000_v25  ;;  %v5020_v38 = vpack.c.bf16 %v4999_v40, %v4998_v5 }
 0x485   : > { %6129 = vmatprep.subr.bf16.mxu0 %v5023_v30  ;;  %v8721_v63 = vpop.permute.xlu0 %5110  ;;  %v8727_v41 = vpop.permute.xlu1 %5105 }
 0x488   : > { %6130 = vmatpush3.bf16.msra.mxu0 %v8896_v51 }
 0x489   : > { %6131 = vmatprep.subr.bf16.mxu0 %v5022_v18  ;;  %v8725_v34 = vpop.permute.xlu0 %5100  ;;  %v8731_v54 = vpop.permute.xlu1 %5095 }
 0x48c   : > { %6132 = vmatpush3.bf16.msra.mxu0 %v8897_v46 }
 0x48d   : > { %6133 = vmatprep.subr.bf16.mxu0 %v5021_v17  ;;  %v8729_v52 = vpop.permute.xlu0 %5090  ;;  %v8735_v7 = vpop.permute.xlu1 %5085 }
 0x490   : > { %6134 = vmatpush3.bf16.msra.mxu0 %v8899_v16 }
 0x491   : > { %6135 = vmatprep.subr.bf16.mxu0 %v5020_v38  ;;  %v8733_v9 = vpop.permute.xlu0 %5080  ;;  %v5076_v15 = vpop.permute.xlu1 %5075 }
 0x494   : > { %6136 = vmatpush3.bf16.msra.mxu0 %v8900_v42 }
 0x495   : > { %6137 = vmatprep.subr.bf16.mxu0 %v8901_v26  ;;  %v5071_v56 = vpop.permute.xlu0 %5070  ;;  %v5066_v24 = vpop.permute.xlu1 %5065 }
 0x498   : > { %6138 = vmatpush3.bf16.msra.mxu0 %v8902_v6 }
 0x499   : > { %6139 = vmatprep.subr.bf16.mxu0 %v8903_v53  ;;  %v5061_v31 = vpop.permute.xlu0 %5060 }
 0x49c   : > { %6140 = vmatpush3.bf16.msra.mxu0 %v8904_v21 }
 0x49f   : > { %5251 = vmatmul.mubr.bf16.vlgmr.msra.gmra.mxu0 %v6404_v29 }
 0x4a0   : > { %5258 = vmatprep.mubr.bf16.mxu0 %v6409_v33 }
 0x4a7   : > { %5259 = vmatmul.mubr.bf16.gmra.mxu0 %v6407_v57 }
 0x4a8   : > { %5266 = vmatprep.mubr.bf16.mxu0 %v6412_v28 }
 0x4af   : > { %5267 = vmatmul.mubr.bf16.gmra.mxu0 %v6410_v58 }
 0x4b0   : > { %5274 = vmatprep.mubr.bf16.mxu0 %v6415_v35 }
 0x4b7   : > { %5275 = vmatmul.mubr.bf16.gmra.mxu0 %v6413_v39 }
 0x4b8   : > { %5282 = vmatprep.mubr.bf16.mxu0 %v6418_v44 }
 0x4bf   : > { %5283 = vmatmul.mubr.bf16.gmra.mxu0 %v6416_v10 }
 0x4c0   : > { %5290 = vmatprep.mubr.bf16.mxu0 %v6421_v37 }
 0x4c7   : > { %5291 = vmatmul.mubr.bf16.gmra.mxu0 %v6419_v23 }
 0x4c8   : > { %5298 = vmatprep.mubr.bf16.mxu0 %v6424_v20 }
 0x4cf   : > { %5299 = vmatmul.mubr.bf16.gmra.mxu0 %v6422_v14 }
 0x4d0   : > { %5306 = vmatprep.mubr.bf16.mxu0 %v6427_v0 }
 0x4d7   : > { %5307 = vmatmul.mubr.bf16.gmra.mxu0 %v6425_v47 }
 0x55f   : > { %v6141_v12 = vpop.f32.mrf.mxu0 }
 0x561   : > { %v6142_v19 = vpop.f32.mrf.mxu0 }
 0x562   : > { %v6143_v1 = vadd.f32 %v6142_v19, %v6141_v12 }
 0x563   : > { %v6144_v50 = vpop.f32.mrf.mxu0 }
 0x564   : > { %v5253_v32 = vadd.f32 %v6143_v1, %v5061_v31 }
 0x565   : > { %v6145_v55 = vpop.f32.mrf.mxu0 }
 0x566   : > { %v6146_v59 = vadd.f32 %v6145_v55, %v6144_v50  ;;  %v5315_v30 = vmax.f32 %v5253_v32, 0.0 }
 0x567   : > { %v6147_v49 = vpop.f32.mrf.mxu0 }
 0x568   : > { %v5256_v48 = vadd.f32 %v6146_v59, %v5066_v24 }
 0x569   : > { %v6148_v43 = vpop.f32.mrf.mxu0 }
 0x56a   : > { %v5316_v13 = vmax.f32 %v5256_v48, 0.0  ;;  %v6149_v60 = vadd.f32 %v6148_v43, %v6147_v49 }
 0x56b   : > { %v6150_v61 = vpop.f32.mrf.mxu0 }
 0x56c   : > { %v8737_v22 = vpack.c.bf16 %v5316_v13, %v5315_v30  ;;  %v5261_v27 = vadd.f32 %v6149_v60, %v5071_v56 }
 0x56d   : > { %v6151_v3 = vpop.f32.mrf.mxu0 }
 0x56e   : > { %v6152_v18 = vadd.f32 %v6151_v3, %v6150_v61  ;;  %v5317_v17 = vmax.f32 %v5261_v27, 0.0 }
 0x56f   : > { %v6153_v51 = vpop.f32.mrf.mxu0 }
 0x570   : > { %v5264_v25 = vadd.f32 %v6152_v18, %v5076_v15 }
 0x571   : > { %v6154_v40 = vpop.f32.mrf.mxu0 }
 0x572   : > { %v5318_v46 = vmax.f32 %v5264_v25, 0.0  ;;  %v8739_v45 = vadd.f32 %v6154_v40, %v6153_v51 }
 0x573   : > { %v6156_v5 = vpop.f32.mrf.mxu0 }
 0x574   : > { %v8741_v38 = vpack.c.bf16 %v5318_v46, %v5317_v17 }
 0x575   : > { %v6157_v16 = vpop.f32.mrf.mxu0 }
 0x577   : > { %v6159_v42 = vpop.f32.mrf.mxu0 }
 0x579   : > { %v6160_v26 = vpop.f32.mrf.mxu0 }
 0x57b   : > { %v6162_v6 = vpop.f32.mrf.mxu0 }
 0x57d   : > { %v6163_v53 = vpop.f32.mrf.mxu0 }
 0x57f   : > { %v6165_v29 = vpop.f32.mrf.mxu0 }
 0x581   : > { %v6166_v21 = vpop.f32.mrf.mxu0 }
 0x582   : > { %v6167_v60 = vadd.f32 %v6166_v21, %v6165_v29 }
 0x583   : > { %v6168_v33 = vpop.f32.mrf.mxu0 }
 0x584   : > { %v5285_v18 = vadd.f32 %v6167_v60, %v8725_v34  ;;  %v5269_v34 = vadd.f32 %v8739_v45, %v8733_v9  ;;  %v5339_v9 = vld [vmem:[%s8788_s7] sm:$0x3] }
 0x585   : > { %v6169_v57 = vpop.f32.mrf.mxu0 }
 0x586   : > { %v6170_v48 = vadd.f32 %v6169_v57, %v6168_v33  ;;  %v5323_v46 = vmax.f32 %v5285_v18, 0.0 }
 0x587   : > { %v6171_v28 = vpop.f32.mrf.mxu0 }
 0x589   : > { %v6172_v58 = vpop.f32.mrf.mxu0 }
 0x58a   : > { %v6173_v32 = vadd.f32 %v6172_v58, %v6171_v28 }
 0x58b   : > { %v6174_v35 = vpop.f32.mrf.mxu0 }
 0x58c   : > { %v5293_v61 = vadd.f32 %v6173_v32, %v8721_v63 }
 0x58d   : > { %v6175_v39 = vpop.f32.mrf.mxu0 }
 0x58e   : > { %v6176_v50 = vadd.f32 %v6175_v39, %v6174_v35  ;;  %v5325_v51 = vmax.f32 %v5293_v61, 0.0 }
 0x58f   : > { %v6177_v44 = vpop.f32.mrf.mxu0 }
 0x590   : > { %v5296_v43 = vadd.f32 %v6176_v50, %v8723_v62  ;;  %v6158_v62 = vadd.f32 %v6157_v16, %v6156_v5  ;;  %v5319_v16 = vmax.f32 %v5269_v34, 0.0 }
 0x591   : > { %v6178_v10 = vpop.f32.mrf.mxu0 }
 0x592   : > { %v6179_v15 = vadd.f32 %v6178_v10, %v6177_v44  ;;  %v5326_v3 = vmax.f32 %v5296_v43, 0.0 }
 0x593   : > { %v6180_v37 = vpop.f32.mrf.mxu0 }
 0x594   : > { %v5301_v59 = vadd.f32 %v6179_v15, %v8716_v8  ;;  %v6161_v8 = vadd.f32 %v6160_v26, %v6159_v42  ;;  %v5336_v40 = vpack.c.bf16 %v5326_v3, %v5325_v51 }
 0x595   : > { %v6181_v23 = vpop.f32.mrf.mxu0 }
 0x596   : > { %v6182_v56 = vadd.f32 %v6181_v23, %v6180_v37  ;;  %v5277_v17 = vadd.f32 %v6161_v8, %v8729_v52 }
 0x597   : > { %v6183_v20 = vpop.f32.mrf.mxu0 }
 0x598   : > { %v5304_v31 = vadd.f32 %v6182_v56, %v8718_v4  ;;  %v6164_v4 = vadd.f32 %v6163_v53, %v6162_v6  ;;  %v5321_v6 = vmax.f32 %v5277_v17, 0.0 }
 0x599   : > { %v6184_v14 = vpop.f32.mrf.mxu0 }
 0x59a   : > { %v6185_v0 = vadd.f32 %v6184_v14, %v6183_v20  ;;  %v5328_v30 = vmax.f32 %v5304_v31, 0.0  ;;  %v5280_v25 = vadd.f32 %v6164_v4, %v8731_v54 }
 0x59b   : > { %v6186_v47 = vpop.f32.mrf.mxu0 }
 0x59c   : > { %v5309_v19 = vadd.f32 %v6185_v0, %v8712_v36  ;;  %v5327_v36 = vmax.f32 %v5301_v59, 0.0  ;;  %v5322_v42 = vmax.f32 %v5280_v25, 0.0 }
 0x59d   : > { %v6187_v12 = vpop.f32.mrf.mxu0 }
 0x59e   : > { %v6188_v1 = vadd.f32 %v6187_v12, %v6186_v47  ;;  %v5329_v24 = vmax.f32 %v5309_v19, 0.0  ;;  %v5337_v27 = vpack.c.bf16 %v5328_v30, %v5327_v36  ;;  %v5334_v5 = vpack.c.bf16 %v5322_v42, %v5321_v6 }
 0x5a0   : > { %v5312_v55 = vadd.f32 %v6188_v1, %v8714_v2  ;;  %v5288_v2 = vadd.f32 %v6170_v48, %v8727_v41  ;;  %v5272_v41 = vadd.f32 %v6158_v62, %v8735_v7  ;;  %v5344_v7 = vpop.permute.xlu0 %5343 }
 0x5a2   : > { %v5330_v49 = vmax.f32 %v5312_v55, 0.0  ;;  %v5324_v63 = vmax.f32 %v5288_v2, 0.0  ;;  %v5320_v54 = vmax.f32 %v5272_v41, 0.0 }
 0x5a4   : > { %v5338_v13 = vpack.c.bf16 %v5330_v49, %v5329_v24  ;;  %v5335_v26 = vpack.c.bf16 %v5324_v63, %v5323_v46  ;;  %v5333_v52 = vpack.c.bf16 %v5320_v54, %v5319_v16 }
 0x5a6   : > { %6199 = vmatpush3.bf16.msra.mxu1 %v5338_v13 }
 0x5a7   : > { %6200 = vmatprep.subr.bf16.mxu1 %v6453_v11 }
 0x5aa   : > { %6201 = vmatpush3.bf16.msra.mxu1 %v5337_v27 }
 0x5ab   : > { %6202 = vmatprep.subr.bf16.mxu1 %v6453_v11 }
 0x5ae   : > { %6203 = vmatpush3.bf16.msra.mxu1 %v5336_v40 }
 0x5af   : > { %6204 = vmatprep.subr.bf16.mxu1 %v6453_v11 }
 0x5b2   : > { %6205 = vmatpush3.bf16.msra.mxu1 %v5335_v26 }
 0x5b3   : > { %6206 = vmatprep.subr.bf16.mxu1 %v6453_v11 }
 0x5b6   : > { %6207 = vmatpush3.bf16.msra.mxu1 %v5334_v5 }
 0x5b7   : > { %6208 = vmatprep.subr.bf16.mxu1 %v6453_v11 }
 0x5ba   : > { %6209 = vmatpush3.bf16.msra.mxu1 %v5333_v52 }
 0x5bb   : > { %6210 = vmatprep.subr.bf16.mxu1 %v6453_v11 }
 0x5be   : > { %6211 = vmatpush3.bf16.msra.mxu1 %v8741_v38 }
 0x5bf   : > { %6212 = vmatprep.subr.bf16.mxu1 %v6453_v11 }
 0x5c2   : > { %6213 = vmatpush3.bf16.msra.mxu1 %v8737_v22 }
 0x5c5   : > { %6215 = vmatmul.mubr.bf16.vlgmr.msra.gmra.mxu1 %v5339_v9 }
 0x685   : > { %v5380_v45 = vpop.f32.mrf.mxu1 }
 0x686   : > { %v5381_v53 = vadd.f32 %v5380_v45, %v5344_v7 }
 0x687   : > { %v6216_v29 = vpop.f32.mrf.mxu1 }
 0x688   : > { %5386 = vst [vmem:[%s361_s18] sm:$0x7] %v5381_v53 }
 0x689   : > { %v5383_v38 = vpop.f32.mrf.mxu1 }
 0x68b   : > { %v6217_v21 = vpop.f32.mrf.mxu1 }
 0x68c PF: > { %s19_s11 = sadd.s32 1, %s6450_s11   ;;  %s8905_s30 = smov %s6446_s10 }
 0x68d   : > { %p16_p5 = scmp.ge.s32.totalorder %s19_s11, 4   ;;  %s8906_s10 = smov %s8908_s12 }
 0x68f   :  { %18 = sbr.rel (!%p16_p5) target bundleno = 2 (0x2), region = 86 }

</bundles_post_ra>
